<compile_context>
chip_gen: v7x
topology: tpu7x:2x2x1
jax: 0.10.0
libtpu: 0.0.40
codegen_flags: <defaults>
</compile_context>

<pallas_src>
import functools

import jax
import jax.numpy as jnp
from jax.experimental import pallas as pl
from jax.experimental.pallas import tpu as pltpu


# ----------------------------------------------------------------------------
# Fused adaptive-graph GRU sequence kernel (whole time loop in one pallas_call)
# ----------------------------------------------------------------------------

def _gru_seq_kernel(x_ref, sup_ref, wg_ref, wu_ref, gb_ref, ub_ref, e_ref,
                    out_ref, *, unroll):
    """All T steps of the AGCRN-style adaptive-graph GRU for one batch element.

    Kernel-view shapes (batch dim squeezed out by the BlockSpec):
      x:   (T, N, Cin)
      sup: (K, N, N)     Chebyshev supports; sup[0] == I is never matmul'd
      wg:  (D*K*I, 2H)   gate (z,r) weight pool flattened to one matrix
      wu:  (D*K*I, H)    candidate weight pool flattened to one matrix
      gb:  (N, 2H)       E @ bias_pool_gate
      ub:  (N, H)        E @ bias_pool_update
      e:   (N, D)        node embeddings
      out: (T, N, H)
    Per step: (K-1) support matmuls per gconv + ONE wide weight matmul per
    gconv (contraction dim D*K*I).
    """
    T, N, _ = x_ref.shape
    H = out_ref.shape[2]
    K = sup_ref.shape[0]
    D = e_ref.shape[1]

    sup = sup_ref[...]                                   # small, VMEM resident
    gb = gb_ref[...]
    ub = ub_ref[...]
    ecols = [e_ref[:, d:d + 1] for d in range(D)]        # (N, 1) each, hoisted

    def gconv_pre(cat, w_ref_):
        # cat: (N, I).  x_g = [cat, S_1 cat, ...]; fold the embedding dim into
        # the contraction: A_aug[:, d*K*I + k*I + i] = E[:, d] * x_g[k][:, i].
        xg = [cat]
        for k in range(1, K):                            # S_0 == I: no matmul
            xg.append(jnp.dot(sup[k], cat, preferred_element_type=jnp.float32))
        a = jnp.concatenate(xg, axis=1)                  # (N, K*I)
        a_aug = jnp.concatenate([ec * a for ec in ecols], axis=1)  # (N, D*K*I)
        return jnp.dot(a_aug, w_ref_[...], preferred_element_type=jnp.float32)

    def step(t, h):
        xt = x_ref[t]                                    # (N, Cin)
        cat0 = jnp.concatenate([xt, h], axis=1)          # (N, I)
        # AGCRN cell convention (TARGCN's GRU is the AGCRN cell):
        #   z,r = split(sigmoid(gate(cat(x,h)))); candidate uses z*h; blend r.
        zr = jax.nn.sigmoid(gconv_pre(cat0, wg_ref) + gb)
        z = zr[:, :H]
        r = zr[:, H:]
        cat1 = jnp.concatenate([xt, z * h], axis=1)
        hc = jnp.tanh(gconv_pre(cat1, wu_ref) + ub)
        hn = r * h + (1.0 - r) * hc
        out_ref[t] = hn
        return hn

    h0 = jnp.zeros((N, H), dtype=jnp.float32)            # init_hidden == zeros
    jax.lax.fori_loop(0, T, step, h0, unroll=unroll)


def gru_layer_seq(x_seq, supports, wg, wu, gb, ub, E, H):
    """One GRU layer over the full sequence; grid=(B,) is a parallel axis."""
    B, T, N, Cin = x_seq.shape
    K = supports.shape[0]
    D = E.shape[1]
    KID = wg.shape[0]

    # Cap unrolling of the time loop so long sequences don't spill vregs.
    unroll = True if T <= 8 else 4

    blk_f32 = (T * N * Cin + T * N * H + K * N * N +
               KID * 3 * H + N * 3 * H + N * D)
    vmem_limit = min(2 * 4 * int(blk_f32) + (8 << 20), 64 << 20)

    return pl.pallas_call(
        functools.partial(_gru_seq_kernel, unroll=unroll),
        out_shape=jax.ShapeDtypeStruct((B, T, N, H), jnp.float32),
        grid_spec=pltpu.PrefetchScalarGridSpec(
            num_scalar_prefetch=0,
            grid=(B,),
            in_specs=[
                # Batch selected in the BlockSpec (dim None -> squeezed);
                # no host transposes around the call.
                pl.BlockSpec((None, T, N, Cin), lambda b: (b, 0, 0, 0)),
                # Constant block indices: DMA'd once, VMEM-resident across B.
                pl.BlockSpec((K, N, N), lambda b: (0, 0, 0)),
                pl.BlockSpec((KID, 2 * H), lambda b: (0, 0)),
                pl.BlockSpec((KID, H), lambda b: (0, 0)),
                pl.BlockSpec((N, 2 * H), lambda b: (0, 0)),
                pl.BlockSpec((N, H), lambda b: (0, 0)),
                pl.BlockSpec((N, D), lambda b: (0, 0)),
            ],
            out_specs=pl.BlockSpec((None, T, N, H), lambda b: (b, 0, 0, 0)),
        ),
        compiler_params=pltpu.CompilerParams(
            dimension_semantics=("parallel",),
            vmem_limit_bytes=vmem_limit),
    )(x_seq, supports, wg, wu, gb, ub, E)


# ----------------------------------------------------------------------------
# Fused lane-dense TCN kernel (3 residual blocks x 2 causal dilated convs)
# ----------------------------------------------------------------------------

def _tcn_kernel(x_ref, w_ref, b_ref, o_ref, slab_a, slab_b, *, dils, ksz, pad):
    """x/o: (T, PT) — time on sublanes, B*N series on lanes.
    w: (2*levels, ksz) SMEM; b: (2*levels,) SMEM (weight_norm folded at init).
    slabs: (pad+T, PT) ping-pong VMEM scratch; rows [0, pad) stay zero so all
    dilated taps read the causal zero padding for free."""
    T, PT = x_ref.shape
    zeros_pad = jnp.zeros((pad, PT), jnp.float32)
    slab_a[:pad, :] = zeros_pad
    slab_b[:pad, :] = zeros_pad
    slab_a[pad:, :] = x_ref[...]

    slabs = (slab_a, slab_b)
    cur, c = 0, 0
    conv_out = None
    for dil in dils:                                     # residual blocks
        res = slabs[cur][pad:, :]                        # block input (vregs)
        for _ in range(2):                               # 2 causal convs
            src, dst = slabs[cur], slabs[1 - cur]
            acc = jnp.full((T, PT), b_ref[c], jnp.float32)
            for j in range(ksz):
                shift = (ksz - 1 - j) * dil
                if shift >= T:                           # tap entirely in pad
                    continue
                acc = acc + w_ref[c, j] * src[pad - shift: pad - shift + T, :]
            conv_out = jnp.maximum(acc, 0.0)             # ReLU; dropout no-op
            dst[pad:, :] = conv_out                      # conv output -> slab
            cur = 1 - cur
            c += 1
        conv_out = jnp.maximum(conv_out + res, 0.0)      # residual (1->1 ch)
        slabs[cur][pad:, :] = conv_out
    o_ref[...] = conv_out


def tcn_forward_fused(x_tp, w_all, b_all, *, dils, ksz):
    """x_tp: (T, P) with the P = B*N series axis on lanes; tiled over P with a
    parallel grid (128 series per block)."""
    T, P = x_tp.shape
    pad = (ksz - 1) * max(dils)
    PT = 128
    P_pad = pl.cdiv(P, PT) * PT
    if P_pad != P:
        x_tp = jnp.pad(x_tp, ((0, 0), (0, P_pad - P)))
    out = pl.pallas_call(
        functools.partial(_tcn_kernel, dils=dils, ksz=ksz, pad=pad),
        out_shape=jax.ShapeDtypeStruct((T, P_pad), jnp.float32),
        grid_spec=pltpu.PrefetchScalarGridSpec(
            num_scalar_prefetch=0,
            grid=(P_pad // PT,),
            in_specs=[
                pl.BlockSpec((T, PT), lambda p: (0, p)),
                pl.BlockSpec(memory_space=pltpu.MemorySpace.SMEM),
                pl.BlockSpec(memory_space=pltpu.MemorySpace.SMEM),
            ],
            out_specs=pl.BlockSpec((T, PT), lambda p: (0, p)),
            scratch_shapes=[pltpu.VMEM((pad + T, PT), jnp.float32),
                            pltpu.VMEM((pad + T, PT), jnp.float32)],
        ),
        compiler_params=pltpu.CompilerParams(
            dimension_semantics=("parallel",)),
    )(x_tp, w_all, b_all)
    return out[:, :P]


# ----------------------------------------------------------------------------
# Plain-JAX glue (parameter prep, transformer, end_conv)
# ----------------------------------------------------------------------------

def compute_supports(E, cheb_k):
    # softmax(relu(E E^T), dim=1); Chebyshev set [I, S, ...]
    N = E.shape[0]
    S = jax.nn.softmax(jax.nn.relu(E @ E.T), axis=1)
    support_set = [jnp.eye(N, dtype=jnp.float32), S]
    for _ in range(2, cheb_k):
        support_set.append(2.0 * S @ support_set[-1] - support_set[-2])
    return jnp.stack(support_set[:max(cheb_k, 1)], axis=0)   # (K, N, N)


def prep_gru_weights(wpool_gate, bpool_gate, wpool_upd, bpool_upd, E):
    # wpool_*: (D, K, I, O). Flatten to (D*K*I, O) rows ordered d-major, k, i —
    # matching the in-kernel A_aug column layout (embedding dim folded into
    # the contraction).
    D, K, I, O2 = wpool_gate.shape
    wg = wpool_gate.reshape(D * K * I, O2)
    wu = wpool_upd.reshape(D * K * I, wpool_upd.shape[-1])
    return wg, wu, E @ bpool_gate, E @ bpool_upd


def layer_norm(x, g, b, eps=1e-5):
    mu = x.mean(-1, keepdims=True)
    var = ((x - mu) ** 2).mean(-1, keepdims=True)
    return (x - mu) / jnp.sqrt(var + eps) * g + b


def transformer_layer_T(x, p, num_heads=2):
    # TODO(synk): exact `transformer_layer` source is not in the provided
    # module; implemented as a standard 2-head temporal MHA + FFN (post-norm).
    B, T, N, H = x.shape
    h = jnp.transpose(x, (0, 2, 1, 3)).reshape(B * N, T, H)
    q = h @ p['wq'] + p['bq']
    k = h @ p['wk'] + p['bk']
    v = h @ p['wv'] + p['bv']
    hd = H // num_heads

    def heads(a):
        return a.reshape(B * N, T, num_heads, hd).transpose(0, 2, 1, 3)

    qh, kh, vh = heads(q), heads(k), heads(v)
    att = jax.nn.softmax(jnp.einsum('bhqd,bhkd->bhqk', qh, kh) /
                         jnp.sqrt(float(hd)), axis=-1)
    o = jnp.einsum('bhqk,bhkd->bhqd', att, vh).transpose(0, 2, 1, 3)
    o = o.reshape(B * N, T, H) @ p['wo'] + p['bo']
    h1 = layer_norm(h + o, p['ln1_g'], p['ln1_b'])
    f = jax.nn.relu(h1 @ p['w1'] + p['b1']) @ p['w2'] + p['b2']
    h2 = layer_norm(h1 + f, p['ln2_g'], p['ln2_b'])
    return h2.reshape(B, N, T, H).transpose(0, 2, 1, 3)


# ----------------------------------------------------------------------------
# TARGCN forward
# ----------------------------------------------------------------------------

def targcn_forward(source, params, cfg):
    B, T, N, Din = source.shape
    assert N == cfg['num_nodes'] and Din == cfg['input_dim']
    # TODO(synk): TCN path assumes input_dim == 1 (channels [1,1,1], so the
    # reference downsample conv is never instantiated).
    assert Din == 1
    assert T >= 6
    H = cfg['rnn_units']
    horizon = cfg['horizon']
    out_dim = cfg['output_dim']
    E = params['node_embeddings']

    # ---- fused, lane-dense TCN over time per (b, n) series ----
    dils = tuple(2 ** i for i in range(cfg['tcn_levels']))    # static ints
    x_tp = jnp.transpose(source, (1, 0, 2, 3)).reshape(T, B * N * Din)
    x_tp = tcn_forward_fused(x_tp, params['tcn_w'], params['tcn_b'],
                             dils=dils, ksz=cfg['tcn_kernel'])
    cur = x_tp.reshape(T, B, N, Din).transpose(1, 0, 2, 3)    # (B, T, N, Din)

    # ---- adaptive-graph GRU encoder (whole time loop fused per layer) ----
    supports = compute_supports(E, cfg['cheb_k'])
    for lp in params['gru_layers']:
        wg, wu, gb, ub = prep_gru_weights(
            lp['wpool_gate'], lp['bpool_gate'],
            lp['wpool_update'], lp['bpool_update'], E)
        cur = gru_layer_seq(cur, supports, wg, wu, gb, ub, E, H)  # (B,T,N,H)

    # ---- temporal transformer layer ----
    cur = transformer_layer_T(cur, params['trans'])

    # ---- last 6 steps + end_conv: Conv2d(6, horizon*out_dim, (1,H)) == matmul
    out6 = cur[:, -6:]                                          # (B, 6, N, H)
    X = jnp.transpose(out6, (0, 2, 1, 3)).reshape(B * N, 6 * H)
    Wf = params['end_conv_w'].reshape(horizon * out_dim, 6 * H)
    o2 = X @ Wf.T + params['end_conv_b'][None, :]               # (B*N, C)
    o = o2.reshape(B, N, horizon * out_dim).transpose(0, 2, 1)
    o = o.reshape(B, horizon, out_dim, N).transpose(0, 1, 3, 2)
    return o                                                    # (B, horizon, N, out_dim)


# ----------------------------------------------------------------------------
# Deterministic parameter init (synthetic; mirrors module __init__ shapes)
# ----------------------------------------------------------------------------

def init_params(key, cfg):
    N, Din, H = cfg['num_nodes'], cfg['input_dim'], cfg['rnn_units']
    D, K, L = cfg['embed_dim'], cfg['cheb_k'], cfg['num_layers']
    horizon, out_dim = cfg['horizon'], cfg['output_dim']
    ksz, levels = cfg['tcn_kernel'], cfg['tcn_levels']

    keys = iter(jax.random.split(key, 64))

    def nrm(shape, std=0.1):
        return std * jax.random.normal(next(keys), shape, dtype=jnp.float32)

    params = {'node_embeddings': jax.random.normal(next(keys), (N, D),
                                                   dtype=jnp.float32)}

    # TCN: `levels` residual blocks x 2 convs, channels [1]*levels.
    # TODO(synk): weight_norm is folded into the effective weights at init
    # (inference-mode semantics); dilations/kernel size are static in cfg.
    params['tcn_w'] = nrm((2 * levels, ksz), 0.3)
    params['tcn_b'] = nrm((2 * levels,), 0.1)

    gru_layers = []
    d_in = Din
    for _ in range(L):
        I = d_in + H
        gru_layers.append(dict(wpool_gate=nrm((D, K, I, 2 * H)),
                               bpool_gate=nrm((D, 2 * H)),
                               wpool_update=nrm((D, K, I, H)),
                               bpool_update=nrm((D, H))))
        d_in = H
    params['gru_layers'] = gru_layers

    params['trans'] = dict(
        wq=nrm((H, H)), bq=jnp.zeros((H,), jnp.float32),
        wk=nrm((H, H)), bk=jnp.zeros((H,), jnp.float32),
        wv=nrm((H, H)), bv=jnp.zeros((H,), jnp.float32),
        wo=nrm((H, H)), bo=jnp.zeros((H,), jnp.float32),
        w1=nrm((H, H)), b1=jnp.zeros((H,), jnp.float32),
        w2=nrm((H, H)), b2=jnp.zeros((H,), jnp.float32),
        ln1_g=jnp.ones((H,), jnp.float32), ln1_b=jnp.zeros((H,), jnp.float32),
        ln2_g=jnp.ones((H,), jnp.float32), ln2_b=jnp.zeros((H,), jnp.float32))

    params['end_conv_w'] = nrm((horizon * out_dim, 6, 1, H))
    params['end_conv_b'] = jnp.zeros((horizon * out_dim,), jnp.float32)
    return params


if __name__ == "__main__":
    cfg = dict(num_nodes=16, input_dim=1, rnn_units=32, output_dim=1,
               horizon=3, num_layers=1, cheb_k=2, embed_dim=4,
               seq_len=8, batch=2, tcn_levels=3, tcn_kernel=3)

    key = jax.random.PRNGKey(0)
    kp, kx = jax.random.split(key)
    params = init_params(kp, cfg)
    source = jax.random.normal(
        kx, (cfg['batch'], cfg['seq_len'], cfg['num_nodes'], cfg['input_dim']),
        dtype=jnp.float32)

    fwd = jax.jit(lambda s, p: targcn_forward(s, p, cfg))
    out = fwd(source, params)
    out = jax.block_until_ready(out)
    assert out.shape == (cfg['batch'], cfg['horizon'],
                         cfg['num_nodes'], cfg['output_dim'])
    assert bool(jnp.all(jnp.isfinite(out)))
    print("KERNEL_OK")
</pallas_src>

<mosaic_0001>
module attributes {stable_mosaic.version = 11 : i64} {
  func.func @_tcn_kernel(%arg0: i32, %arg1: memref<8x128xf32, #tpu.memory_space<vmem>>, %arg2: memref<6x3xf32, #tpu.memory_space<smem>>, %arg3: memref<6xf32, #tpu.memory_space<smem>>, %arg4: memref<8x128xf32, #tpu.memory_space<vmem>>, %arg5: memref<16x128xf32, #tpu.memory_space<vmem>>, %arg6: memref<16x128xf32, #tpu.memory_space<vmem>>) attributes {dimension_semantics = [#tpu.dimension_semantics<parallel>], iteration_bounds = array<i64: 1>, scalar_prefetch = 0 : i64, scratch_operands = 2 : i64, tpu.core_type = #tpu.core_type<tc>, window_params = [{transform_indices = @transform_0, window_bounds = array<i64: 8, 128>}, {transform_indices = @transform_1, window_bounds = array<i64: 6, 3>}, {transform_indices = @transform_2, window_bounds = array<i64: 6>}, {transform_indices = @transform_3, window_bounds = array<i64: 8, 128>}]} {
    %cst = arith.constant 0.000000e+00 : f32
    %0 = vector.broadcast %cst : f32 to vector<8x128xf32>
    %c0 = arith.constant 0 : index
    %c0_0 = arith.constant 0 : index
    %1 = vector.load %arg5[%c0, %c0_0] : memref<16x128xf32, #tpu.memory_space<vmem>>, vector<8x128xf32>
    tpu.vector_store %arg5[%c0, %c0_0], %0 {strides = array<i32>} : memref<16x128xf32, #tpu.memory_space<vmem>>, vector<8x128xf32>,
    %c0_1 = arith.constant 0 : index
    %c0_2 = arith.constant 0 : index
    %2 = vector.load %arg6[%c0_1, %c0_2] : memref<16x128xf32, #tpu.memory_space<vmem>>, vector<8x128xf32>
    tpu.vector_store %arg6[%c0_1, %c0_2], %0 {strides = array<i32>} : memref<16x128xf32, #tpu.memory_space<vmem>>, vector<8x128xf32>,
    %c0_3 = arith.constant 0 : index
    %c0_4 = arith.constant 0 : index
    %3 = vector.load %arg1[%c0_3, %c0_4] : memref<8x128xf32, #tpu.memory_space<vmem>>, vector<8x128xf32>
    %c8 = arith.constant 8 : index
    %c0_5 = arith.constant 0 : index
    %4 = vector.load %arg5[%c8, %c0_5] : memref<16x128xf32, #tpu.memory_space<vmem>>, vector<8x128xf32>
    tpu.vector_store %arg5[%c8, %c0_5], %3 {strides = array<i32>} : memref<16x128xf32, #tpu.memory_space<vmem>>, vector<8x128xf32>,
    %c8_6 = arith.constant 8 : index
    %c0_7 = arith.constant 0 : index
    %5 = vector.load %arg5[%c8_6, %c0_7] : memref<16x128xf32, #tpu.memory_space<vmem>>, vector<8x128xf32>
    %c0_8 = arith.constant 0 : index
    %6 = memref.load %arg3[%c0_8] : memref<6xf32, #tpu.memory_space<smem>>
    %7 = vector.broadcast %6 : f32 to vector<8x128xf32>
    %c0_9 = arith.constant 0 : index
    %c0_10 = arith.constant 0 : index
    %8 = memref.load %arg2[%c0_9, %c0_10] : memref<6x3xf32, #tpu.memory_space<smem>>
    %c6 = arith.constant 6 : index
    %c0_11 = arith.constant 0 : index
    %9 = vector.load %arg5[%c6, %c0_11] : memref<16x128xf32, #tpu.memory_space<vmem>>, vector<8x128xf32>
    %10 = vector.broadcast %8 : f32 to vector<8x128xf32>
    %11 = arith.mulf %10, %9 : vector<8x128xf32>
    %12 = arith.addf %7, %11 : vector<8x128xf32>
    %c0_12 = arith.constant 0 : index
    %c1 = arith.constant 1 : index
    %13 = memref.load %arg2[%c0_12, %c1] : memref<6x3xf32, #tpu.memory_space<smem>>
    %c7 = arith.constant 7 : index
    %c0_13 = arith.constant 0 : index
    %14 = vector.load %arg5[%c7, %c0_13] : memref<16x128xf32, #tpu.memory_space<vmem>>, vector<8x128xf32>
    %15 = vector.broadcast %13 : f32 to vector<8x128xf32>
    %16 = arith.mulf %15, %14 : vector<8x128xf32>
    %17 = arith.addf %12, %16 : vector<8x128xf32>
    %c0_14 = arith.constant 0 : index
    %c2 = arith.constant 2 : index
    %18 = memref.load %arg2[%c0_14, %c2] : memref<6x3xf32, #tpu.memory_space<smem>>
    %c8_15 = arith.constant 8 : index
    %c0_16 = arith.constant 0 : index
    %19 = vector.load %arg5[%c8_15, %c0_16] : memref<16x128xf32, #tpu.memory_space<vmem>>, vector<8x128xf32>
    %20 = vector.broadcast %18 : f32 to vector<8x128xf32>
    %21 = arith.mulf %20, %19 : vector<8x128xf32>
    %22 = arith.addf %17, %21 : vector<8x128xf32>
    %cst_17 = arith.constant 0.000000e+00 : f32
    %23 = vector.broadcast %cst_17 : f32 to vector<8x128xf32>
    %24 = arith.maximumf %22, %23 : vector<8x128xf32>
    %c8_18 = arith.constant 8 : index
    %c0_19 = arith.constant 0 : index
    %25 = vector.load %arg6[%c8_18, %c0_19] : memref<16x128xf32, #tpu.memory_space<vmem>>, vector<8x128xf32>
    tpu.vector_store %arg6[%c8_18, %c0_19], %24 {strides = array<i32>} : memref<16x128xf32, #tpu.memory_space<vmem>>, vector<8x128xf32>,
    %c1_20 = arith.constant 1 : index
    %26 = memref.load %arg3[%c1_20] : memref<6xf32, #tpu.memory_space<smem>>
    %27 = vector.broadcast %26 : f32 to vector<8x128xf32>
    %c1_21 = arith.constant 1 : index
    %c0_22 = arith.constant 0 : index
    %28 = memref.load %arg2[%c1_21, %c0_22] : memref<6x3xf32, #tpu.memory_space<smem>>
    %c6_23 = arith.constant 6 : index
    %c0_24 = arith.constant 0 : index
    %29 = vector.load %arg6[%c6_23, %c0_24] : memref<16x128xf32, #tpu.memory_space<vmem>>, vector<8x128xf32>
    %30 = vector.broadcast %28 : f32 to vector<8x128xf32>
    %31 = arith.mulf %30, %29 : vector<8x128xf32>
    %32 = arith.addf %27, %31 : vector<8x128xf32>
    %c1_25 = arith.constant 1 : index
    %c1_26 = arith.constant 1 : index
    %33 = memref.load %arg2[%c1_25, %c1_26] : memref<6x3xf32, #tpu.memory_space<smem>>
    %c7_27 = arith.constant 7 : index
    %c0_28 = arith.constant 0 : index
    %34 = vector.load %arg6[%c7_27, %c0_28] : memref<16x128xf32, #tpu.memory_space<vmem>>, vector<8x128xf32>
    %35 = vector.broadcast %33 : f32 to vector<8x128xf32>
    %36 = arith.mulf %35, %34 : vector<8x128xf32>
    %37 = arith.addf %32, %36 : vector<8x128xf32>
    %c1_29 = arith.constant 1 : index
    %c2_30 = arith.constant 2 : index
    %38 = memref.load %arg2[%c1_29, %c2_30] : memref<6x3xf32, #tpu.memory_space<smem>>
    %c8_31 = arith.constant 8 : index
    %c0_32 = arith.constant 0 : index
    %39 = vector.load %arg6[%c8_31, %c0_32] : memref<16x128xf32, #tpu.memory_space<vmem>>, vector<8x128xf32>
    %40 = vector.broadcast %38 : f32 to vector<8x128xf32>
    %41 = arith.mulf %40, %39 : vector<8x128xf32>
    %42 = arith.addf %37, %41 : vector<8x128xf32>
    %cst_33 = arith.constant 0.000000e+00 : f32
    %43 = vector.broadcast %cst_33 : f32 to vector<8x128xf32>
    %44 = arith.maximumf %42, %43 : vector<8x128xf32>
    %c8_34 = arith.constant 8 : index
    %c0_35 = arith.constant 0 : index
    %45 = vector.load %arg5[%c8_34, %c0_35] : memref<16x128xf32, #tpu.memory_space<vmem>>, vector<8x128xf32>
    tpu.vector_store %arg5[%c8_34, %c0_35], %44 {strides = array<i32>} : memref<16x128xf32, #tpu.memory_space<vmem>>, vector<8x128xf32>,
    %46 = arith.addf %44, %5 : vector<8x128xf32>
    %cst_36 = arith.constant 0.000000e+00 : f32
    %47 = vector.broadcast %cst_36 : f32 to vector<8x128xf32>
    %48 = arith.maximumf %46, %47 : vector<8x128xf32>
    %c8_37 = arith.constant 8 : index
    %c0_38 = arith.constant 0 : index
    %49 = vector.load %arg5[%c8_37, %c0_38] : memref<16x128xf32, #tpu.memory_space<vmem>>, vector<8x128xf32>
    tpu.vector_store %arg5[%c8_37, %c0_38], %48 {strides = array<i32>} : memref<16x128xf32, #tpu.memory_space<vmem>>, vector<8x128xf32>,
    %c8_39 = arith.constant 8 : index
    %c0_40 = arith.constant 0 : index
    %50 = vector.load %arg5[%c8_39, %c0_40] : memref<16x128xf32, #tpu.memory_space<vmem>>, vector<8x128xf32>
    %c2_41 = arith.constant 2 : index
    %51 = memref.load %arg3[%c2_41] : memref<6xf32, #tpu.memory_space<smem>>
    %52 = vector.broadcast %51 : f32 to vector<8x128xf32>
    %c2_42 = arith.constant 2 : index
    %c0_43 = arith.constant 0 : index
    %53 = memref.load %arg2[%c2_42, %c0_43] : memref<6x3xf32, #tpu.memory_space<smem>>
    %c4 = arith.constant 4 : index
    %c0_44 = arith.constant 0 : index
    %54 = vector.load %arg5[%c4, %c0_44] : memref<16x128xf32, #tpu.memory_space<vmem>>, vector<8x128xf32>
    %55 = vector.broadcast %53 : f32 to vector<8x128xf32>
    %56 = arith.mulf %55, %54 : vector<8x128xf32>
    %57 = arith.addf %52, %56 : vector<8x128xf32>
    %c2_45 = arith.constant 2 : index
    %c1_46 = arith.constant 1 : index
    %58 = memref.load %arg2[%c2_45, %c1_46] : memref<6x3xf32, #tpu.memory_space<smem>>
    %c6_47 = arith.constant 6 : index
    %c0_48 = arith.constant 0 : index
    %59 = vector.load %arg5[%c6_47, %c0_48] : memref<16x128xf32, #tpu.memory_space<vmem>>, vector<8x128xf32>
    %60 = vector.broadcast %58 : f32 to vector<8x128xf32>
    %61 = arith.mulf %60, %59 : vector<8x128xf32>
    %62 = arith.addf %57, %61 : vector<8x128xf32>
    %c2_49 = arith.constant 2 : index
    %c2_50 = arith.constant 2 : index
    %63 = memref.load %arg2[%c2_49, %c2_50] : memref<6x3xf32, #tpu.memory_space<smem>>
    %c8_51 = arith.constant 8 : index
    %c0_52 = arith.constant 0 : index
    %64 = vector.load %arg5[%c8_51, %c0_52] : memref<16x128xf32, #tpu.memory_space<vmem>>, vector<8x128xf32>
    %65 = vector.broadcast %63 : f32 to vector<8x128xf32>
    %66 = arith.mulf %65, %64 : vector<8x128xf32>
    %67 = arith.addf %62, %66 : vector<8x128xf32>
    %cst_53 = arith.constant 0.000000e+00 : f32
    %68 = vector.broadcast %cst_53 : f32 to vector<8x128xf32>
    %69 = arith.maximumf %67, %68 : vector<8x128xf32>
    %c8_54 = arith.constant 8 : index
    %c0_55 = arith.constant 0 : index
    %70 = vector.load %arg6[%c8_54, %c0_55] : memref<16x128xf32, #tpu.memory_space<vmem>>, vector<8x128xf32>
    tpu.vector_store %arg6[%c8_54, %c0_55], %69 {strides = array<i32>} : memref<16x128xf32, #tpu.memory_space<vmem>>, vector<8x128xf32>,
    %c3 = arith.constant 3 : index
    %71 = memref.load %arg3[%c3] : memref<6xf32, #tpu.memory_space<smem>>
    %72 = vector.broadcast %71 : f32 to vector<8x128xf32>
    %c3_56 = arith.constant 3 : index
    %c0_57 = arith.constant 0 : index
    %73 = memref.load %arg2[%c3_56, %c0_57] : memref<6x3xf32, #tpu.memory_space<smem>>
    %c4_58 = arith.constant 4 : index
    %c0_59 = arith.constant 0 : index
    %74 = vector.load %arg6[%c4_58, %c0_59] : memref<16x128xf32, #tpu.memory_space<vmem>>, vector<8x128xf32>
    %75 = vector.broadcast %73 : f32 to vector<8x128xf32>
    %76 = arith.mulf %75, %74 : vector<8x128xf32>
    %77 = arith.addf %72, %76 : vector<8x128xf32>
    %c3_60 = arith.constant 3 : index
    %c1_61 = arith.constant 1 : index
    %78 = memref.load %arg2[%c3_60, %c1_61] : memref<6x3xf32, #tpu.memory_space<smem>>
    %c6_62 = arith.constant 6 : index
    %c0_63 = arith.constant 0 : index
    %79 = vector.load %arg6[%c6_62, %c0_63] : memref<16x128xf32, #tpu.memory_space<vmem>>, vector<8x128xf32>
    %80 = vector.broadcast %78 : f32 to vector<8x128xf32>
    %81 = arith.mulf %80, %79 : vector<8x128xf32>
    %82 = arith.addf %77, %81 : vector<8x128xf32>
    %c3_64 = arith.constant 3 : index
    %c2_65 = arith.constant 2 : index
    %83 = memref.load %arg2[%c3_64, %c2_65] : memref<6x3xf32, #tpu.memory_space<smem>>
    %c8_66 = arith.constant 8 : index
    %c0_67 = arith.constant 0 : index
    %84 = vector.load %arg6[%c8_66, %c0_67] : memref<16x128xf32, #tpu.memory_space<vmem>>, vector<8x128xf32>
    %85 = vector.broadcast %83 : f32 to vector<8x128xf32>
    %86 = arith.mulf %85, %84 : vector<8x128xf32>
    %87 = arith.addf %82, %86 : vector<8x128xf32>
    %cst_68 = arith.constant 0.000000e+00 : f32
    %88 = vector.broadcast %cst_68 : f32 to vector<8x128xf32>
    %89 = arith.maximumf %87, %88 : vector<8x128xf32>
    %c8_69 = arith.constant 8 : index
    %c0_70 = arith.constant 0 : index
    %90 = vector.load %arg5[%c8_69, %c0_70] : memref<16x128xf32, #tpu.memory_space<vmem>>, vector<8x128xf32>
    tpu.vector_store %arg5[%c8_69, %c0_70], %89 {strides = array<i32>} : memref<16x128xf32, #tpu.memory_space<vmem>>, vector<8x128xf32>,
    %91 = arith.addf %89, %50 : vector<8x128xf32>
    %cst_71 = arith.constant 0.000000e+00 : f32
    %92 = vector.broadcast %cst_71 : f32 to vector<8x128xf32>
    %93 = arith.maximumf %91, %92 : vector<8x128xf32>
    %c8_72 = arith.constant 8 : index
    %c0_73 = arith.constant 0 : index
    %94 = vector.load %arg5[%c8_72, %c0_73] : memref<16x128xf32, #tpu.memory_space<vmem>>, vector<8x128xf32>
    tpu.vector_store %arg5[%c8_72, %c0_73], %93 {strides = array<i32>} : memref<16x128xf32, #tpu.memory_space<vmem>>, vector<8x128xf32>,
    %c8_74 = arith.constant 8 : index
    %c0_75 = arith.constant 0 : index
    %95 = vector.load %arg5[%c8_74, %c0_75] : memref<16x128xf32, #tpu.memory_space<vmem>>, vector<8x128xf32>
    %c4_76 = arith.constant 4 : index
    %96 = memref.load %arg3[%c4_76] : memref<6xf32, #tpu.memory_space<smem>>
    %97 = vector.broadcast %96 : f32 to vector<8x128xf32>
    %c4_77 = arith.constant 4 : index
    %c1_78 = arith.constant 1 : index
    %98 = memref.load %arg2[%c4_77, %c1_78] : memref<6x3xf32, #tpu.memory_space<smem>>
    %c4_79 = arith.constant 4 : index
    %c0_80 = arith.constant 0 : index
    %99 = vector.load %arg5[%c4_79, %c0_80] : memref<16x128xf32, #tpu.memory_space<vmem>>, vector<8x128xf32>
    %100 = vector.broadcast %98 : f32 to vector<8x128xf32>
    %101 = arith.mulf %100, %99 : vector<8x128xf32>
    %102 = arith.addf %97, %101 : vector<8x128xf32>
    %c4_81 = arith.constant 4 : index
    %c2_82 = arith.constant 2 : index
    %103 = memref.load %arg2[%c4_81, %c2_82] : memref<6x3xf32, #tpu.memory_space<smem>>
    %c8_83 = arith.constant 8 : index
    %c0_84 = arith.constant 0 : index
    %104 = vector.load %arg5[%c8_83, %c0_84] : memref<16x128xf32, #tpu.memory_space<vmem>>, vector<8x128xf32>
    %105 = vector.broadcast %103 : f32 to vector<8x128xf32>
    %106 = arith.mulf %105, %104 : vector<8x128xf32>
    %107 = arith.addf %102, %106 : vector<8x128xf32>
    %cst_85 = arith.constant 0.000000e+00 : f32
    %108 = vector.broadcast %cst_85 : f32 to vector<8x128xf32>
    %109 = arith.maximumf %107, %108 : vector<8x128xf32>
    %c8_86 = arith.constant 8 : index
    %c0_87 = arith.constant 0 : index
    %110 = vector.load %arg6[%c8_86, %c0_87] : memref<16x128xf32, #tpu.memory_space<vmem>>, vector<8x128xf32>
    tpu.vector_store %arg6[%c8_86, %c0_87], %109 {strides = array<i32>} : memref<16x128xf32, #tpu.memory_space<vmem>>, vector<8x128xf32>,
    %c5 = arith.constant 5 : index
    %111 = memref.load %arg3[%c5] : memref<6xf32, #tpu.memory_space<smem>>
    %112 = vector.broadcast %111 : f32 to vector<8x128xf32>
    %c5_88 = arith.constant 5 : index
    %c1_89 = arith.constant 1 : index
    %113 = memref.load %arg2[%c5_88, %c1_89] : memref<6x3xf32, #tpu.memory_space<smem>>
    %c4_90 = arith.constant 4 : index
    %c0_91 = arith.constant 0 : index
    %114 = vector.load %arg6[%c4_90, %c0_91] : memref<16x128xf32, #tpu.memory_space<vmem>>, vector<8x128xf32>
    %115 = vector.broadcast %113 : f32 to vector<8x128xf32>
    %116 = arith.mulf %115, %114 : vector<8x128xf32>
    %117 = arith.addf %112, %116 : vector<8x128xf32>
    %c5_92 = arith.constant 5 : index
    %c2_93 = arith.constant 2 : index
    %118 = memref.load %arg2[%c5_92, %c2_93] : memref<6x3xf32, #tpu.memory_space<smem>>
    %c8_94 = arith.constant 8 : index
    %c0_95 = arith.constant 0 : index
    %119 = vector.load %arg6[%c8_94, %c0_95] : memref<16x128xf32, #tpu.memory_space<vmem>>, vector<8x128xf32>
    %120 = vector.broadcast %118 : f32 to vector<8x128xf32>
    %121 = arith.mulf %120, %119 : vector<8x128xf32>
    %122 = arith.addf %117, %121 : vector<8x128xf32>
    %cst_96 = arith.constant 0.000000e+00 : f32
    %123 = vector.broadcast %cst_96 : f32 to vector<8x128xf32>
    %124 = arith.maximumf %122, %123 : vector<8x128xf32>
    %c8_97 = arith.constant 8 : index
    %c0_98 = arith.constant 0 : index
    %125 = vector.load %arg5[%c8_97, %c0_98] : memref<16x128xf32, #tpu.memory_space<vmem>>, vector<8x128xf32>
    tpu.vector_store %arg5[%c8_97, %c0_98], %124 {strides = array<i32>} : memref<16x128xf32, #tpu.memory_space<vmem>>, vector<8x128xf32>,
    %126 = arith.addf %124, %95 : vector<8x128xf32>
    %cst_99 = arith.constant 0.000000e+00 : f32
    %127 = vector.broadcast %cst_99 : f32 to vector<8x128xf32>
    %128 = arith.maximumf %126, %127 : vector<8x128xf32>
    %c8_100 = arith.constant 8 : index
    %c0_101 = arith.constant 0 : index
    %129 = vector.load %arg5[%c8_100, %c0_101] : memref<16x128xf32, #tpu.memory_space<vmem>>, vector<8x128xf32>
    tpu.vector_store %arg5[%c8_100, %c0_101], %128 {strides = array<i32>} : memref<16x128xf32, #tpu.memory_space<vmem>>, vector<8x128xf32>,
    %c0_102 = arith.constant 0 : index
    %c0_103 = arith.constant 0 : index
    %130 = vector.load %arg4[%c0_102, %c0_103] : memref<8x128xf32, #tpu.memory_space<vmem>>, vector<8x128xf32>
    tpu.vector_store %arg4[%c0_102, %c0_103], %128 {strides = array<i32>} : memref<8x128xf32, #tpu.memory_space<vmem>>, vector<8x128xf32>,
    return
  }
  func.func @transform_0(%arg0: i32) -> (i32, i32) {
    %c0_i32 = arith.constant 0 : i32
    %c0_i32_0 = arith.constant 0 : i32
    return %c0_i32, %arg0 : i32, i32
  }
  func.func @transform_1(%arg0: i32) -> (i32, i32) {
    %c0_i32 = arith.constant 0 : i32
    %c0_i32_0 = arith.constant 0 : i32
    %c0_i32_1 = arith.constant 0 : i32
    return %c0_i32, %c0_i32_0 : i32, i32
  }
  func.func @transform_2(%arg0: i32) -> i32 {
    %c0_i32 = arith.constant 0 : i32
    %c0_i32_0 = arith.constant 0 : i32
    return %c0_i32 : i32
  }
  func.func @transform_3(%arg0: i32) -> (i32, i32) {
    %c0_i32 = arith.constant 0 : i32
    %c0_i32_0 = arith.constant 0 : i32
    return %c0_i32, %arg0 : i32, i32
  }
}

module attributes {stable_mosaic.version = 11 : i64} {
  func.func @_gru_seq_kernel(%arg0: i32, %arg1: memref<1x8x16x1xf32, #tpu.memory_space<vmem>>, %arg2: memref<2x16x16xf32, #tpu.memory_space<vmem>>, %arg3: memref<264x64xf32, #tpu.memory_space<vmem>>, %arg4: memref<264x32xf32, #tpu.memory_space<vmem>>, %arg5: memref<16x64xf32, #tpu.memory_space<vmem>>, %arg6: memref<16x32xf32, #tpu.memory_space<vmem>>, %arg7: memref<16x4xf32, #tpu.memory_space<vmem>>, %arg8: memref<1x8x16x32xf32, #tpu.memory_space<vmem>>) attributes {dimension_semantics = [#tpu.dimension_semantics<parallel>], iteration_bounds = array<i64: 2>, scalar_prefetch = 0 : i64, scratch_operands = 0 : i64, tpu.core_type = #tpu.core_type<tc>, window_params = [{transform_indices = @transform_0, window_bounds = array<i64: 1, 8, 16, 1>}, {pipeline_mode = #tpu.pipeline_mode<synchronous>, transform_indices = @transform_1, window_bounds = array<i64: 2, 16, 16>}, {pipeline_mode = #tpu.pipeline_mode<synchronous>, transform_indices = @transform_2, window_bounds = array<i64: 264, 64>}, {pipeline_mode = #tpu.pipeline_mode<synchronous>, transform_indices = @transform_3, window_bounds = array<i64: 264, 32>}, {pipeline_mode = #tpu.pipeline_mode<synchronous>, transform_indices = @transform_4, window_bounds = array<i64: 16, 64>}, {pipeline_mode = #tpu.pipeline_mode<synchronous>, transform_indices = @transform_5, window_bounds = array<i64: 16, 32>}, {pipeline_mode = #tpu.pipeline_mode<synchronous>, transform_indices = @transform_6, window_bounds = array<i64: 16, 4>}, {transform_indices = @transform_7, window_bounds = array<i64: 1, 8, 16, 32>}]} {
    %c0 = arith.constant 0 : index
    %c0_0 = arith.constant 0 : index
    %c0_1 = arith.constant 0 : index
    %0 = vector.load %arg2[%c0, %c0_0, %c0_1] : memref<2x16x16xf32, #tpu.memory_space<vmem>>, vector<2x16x16xf32>
    %c0_2 = arith.constant 0 : index
    %c0_3 = arith.constant 0 : index
    %1 = vector.load %arg5[%c0_2, %c0_3] : memref<16x64xf32, #tpu.memory_space<vmem>>, vector<16x64xf32>
    %c0_4 = arith.constant 0 : index
    %c0_5 = arith.constant 0 : index
    %2 = vector.load %arg6[%c0_4, %c0_5] : memref<16x32xf32, #tpu.memory_space<vmem>>, vector<16x32xf32>
    %c0_6 = arith.constant 0 : index
    %c0_7 = arith.constant 0 : index
    %3 = vector.load %arg7[%c0_6, %c0_7] : memref<16x4xf32, #tpu.memory_space<vmem>>, vector<16x1xf32>
    %c0_8 = arith.constant 0 : index
    %c1 = arith.constant 1 : index
    %4 = vector.load %arg7[%c0_8, %c1] : memref<16x4xf32, #tpu.memory_space<vmem>>, vector<16x1xf32>
    %c0_9 = arith.constant 0 : index
    %c2 = arith.constant 2 : index
    %5 = vector.load %arg7[%c0_9, %c2] : memref<16x4xf32, #tpu.memory_space<vmem>>, vector<16x1xf32>
    %c0_10 = arith.constant 0 : index
    %c3 = arith.constant 3 : index
    %6 = vector.load %arg7[%c0_10, %c3] : memref<16x4xf32, #tpu.memory_space<vmem>>, vector<16x1xf32>
    %cst = arith.constant 0.000000e+00 : f32
    %7 = vector.broadcast %cst : f32 to vector<16x32xf32>
    %c0_i32 = arith.constant 0 : i32
    %c0_11 = arith.constant 0 : index
    %8 = arith.index_cast %c0_i32 : i32 to index
    %c0_12 = arith.constant 0 : index
    %c0_13 = arith.constant 0 : index
    %9 = vector.load %arg1[%c0_11, %8, %c0_12, %c0_13] : memref<1x8x16x1xf32, #tpu.memory_space<vmem>>, vector<1x1x16x1xf32>
    %10 = vector.shape_cast %9 : vector<1x1x16x1xf32> to vector<16x1xf32>
    %11 = tpu.concatenate %10, %7 in 1 : vector<16x1xf32>, vector<16x32xf32> -> vector<16x33xf32>
    %12 = vector.extract_strided_slice %0 {offsets = [1, 0, 0], sizes = [1, 16, 16], strides = [1, 1, 1]} : vector<2x16x16xf32> to vector<1x16x16xf32>
    %13 = vector.shape_cast %12 : vector<1x16x16xf32> to vector<16x16xf32>
    %cst_14 = arith.constant dense<0.000000e+00> : vector<16x33xf32>
    %14 = tpu.matmul %13, %11, %cst_14 {dimension_numbers = #tpu.dot_dimension_numbers<[1], [0], [0], [1], [0, 0, 1, 1], [], []>} : vector<16x16xf32>, vector<16x33xf32>, vector<16x33xf32> -> vector<16x33xf32>
    %15 = tpu.concatenate %11, %14 in 1 : vector<16x33xf32>, vector<16x33xf32> -> vector<16x66xf32>
    %16 = vector.broadcast %3 : vector<16x1xf32> to vector<16x66xf32>
    %17 = arith.mulf %16, %15 : vector<16x66xf32>
    %18 = vector.broadcast %4 : vector<16x1xf32> to vector<16x66xf32>
    %19 = arith.mulf %18, %15 : vector<16x66xf32>
    %20 = vector.broadcast %5 : vector<16x1xf32> to vector<16x66xf32>
    %21 = arith.mulf %20, %15 : vector<16x66xf32>
    %22 = vector.broadcast %6 : vector<16x1xf32> to vector<16x66xf32>
    %23 = arith.mulf %22, %15 : vector<16x66xf32>
    %24 = tpu.concatenate %17, %19, %21, %23 in 1 : vector<16x66xf32>, vector<16x66xf32>, vector<16x66xf32>, vector<16x66xf32> -> vector<16x264xf32>
    %c0_15 = arith.constant 0 : index
    %c0_16 = arith.constant 0 : index
    %25 = vector.load %arg3[%c0_15, %c0_16] : memref<264x64xf32, #tpu.memory_space<vmem>>, vector<264x64xf32>
    %cst_17 = arith.constant dense<0.000000e+00> : vector<16x64xf32>
    %26 = tpu.matmul %24, %25, %cst_17 {dimension_numbers = #tpu.dot_dimension_numbers<[1], [0], [0], [1], [0, 0, 1, 1], [], []>} : vector<16x264xf32>, vector<264x64xf32>, vector<16x64xf32> -> vector<16x64xf32>
    %27 = arith.addf %26, %1 : vector<16x64xf32>
    %28 = arith.negf %27 : vector<16x64xf32>
    %29 = math.exp %28 : vector<16x64xf32>
    %cst_18 = arith.constant 1.000000e+00 : f32
    %30 = vector.broadcast %cst_18 : f32 to vector<16x64xf32>
    %31 = arith.addf %30, %29 : vector<16x64xf32>
    %32 = arith.divf %30, %31 : vector<16x64xf32>
    %33 = vector.extract_strided_slice %32 {offsets = [0, 0], sizes = [16, 32], strides = [1, 1]} : vector<16x64xf32> to vector<16x32xf32>
    %34 = vector.extract_strided_slice %32 {offsets = [0, 32], sizes = [16, 32], strides = [1, 1]} : vector<16x64xf32> to vector<16x32xf32>
    %35 = arith.mulf %33, %7 : vector<16x32xf32>
    %36 = tpu.concatenate %10, %35 in 1 : vector<16x1xf32>, vector<16x32xf32> -> vector<16x33xf32>
    %37 = vector.extract_strided_slice %0 {offsets = [1, 0, 0], sizes = [1, 16, 16], strides = [1, 1, 1]} : vector<2x16x16xf32> to vector<1x16x16xf32>
    %38 = vector.shape_cast %37 : vector<1x16x16xf32> to vector<16x16xf32>
    %cst_19 = arith.constant dense<0.000000e+00> : vector<16x33xf32>
    %39 = tpu.matmul %38, %36, %cst_19 {dimension_numbers = #tpu.dot_dimension_numbers<[1], [0], [0], [1], [0, 0, 1, 1], [], []>} : vector<16x16xf32>, vector<16x33xf32>, vector<16x33xf32> -> vector<16x33xf32>
    %40 = tpu.concatenate %36, %39 in 1 : vector<16x33xf32>, vector<16x33xf32> -> vector<16x66xf32>
    %41 = vector.broadcast %3 : vector<16x1xf32> to vector<16x66xf32>
    %42 = arith.mulf %41, %40 : vector<16x66xf32>
    %43 = vector.broadcast %4 : vector<16x1xf32> to vector<16x66xf32>
    %44 = arith.mulf %43, %40 : vector<16x66xf32>
    %45 = vector.broadcast %5 : vector<16x1xf32> to vector<16x66xf32>
    %46 = arith.mulf %45, %40 : vector<16x66xf32>
    %47 = vector.broadcast %6 : vector<16x1xf32> to vector<16x66xf32>
    %48 = arith.mulf %47, %40 : vector<16x66xf32>
    %49 = tpu.concatenate %42, %44, %46, %48 in 1 : vector<16x66xf32>, vector<16x66xf32>, vector<16x66xf32>, vector<16x66xf32> -> vector<16x264xf32>
    %c0_20 = arith.constant 0 : index
    %c0_21 = arith.constant 0 : index
    %50 = vector.load %arg4[%c0_20, %c0_21] : memref<264x32xf32, #tpu.memory_space<vmem>>, vector<264x32xf32>
    %cst_22 = arith.constant dense<0.000000e+00> : vector<16x32xf32>
    %51 = tpu.matmul %49, %50, %cst_22 {dimension_numbers = #tpu.dot_dimension_numbers<[1], [0], [0], [1], [0, 0, 1, 1], [], []>} : vector<16x264xf32>, vector<264x32xf32>, vector<16x32xf32> -> vector<16x32xf32>
    %52 = arith.addf %51, %2 : vector<16x32xf32>
    %53 = math.tanh %52 : vector<16x32xf32>
    %54 = arith.mulf %34, %7 : vector<16x32xf32>
    %cst_23 = arith.constant 1.000000e+00 : f32
    %55 = vector.broadcast %cst_23 : f32 to vector<16x32xf32>
    %56 = arith.subf %55, %34 : vector<16x32xf32>
    %57 = arith.mulf %56, %53 : vector<16x32xf32>
    %58 = arith.addf %54, %57 : vector<16x32xf32>
    %c0_24 = arith.constant 0 : index
    %59 = arith.index_cast %c0_i32 : i32 to index
    %c0_25 = arith.constant 0 : index
    %c0_26 = arith.constant 0 : index
    %60 = vector.load %arg8[%c0_24, %59, %c0_25, %c0_26] : memref<1x8x16x32xf32, #tpu.memory_space<vmem>>, vector<1x1x16x32xf32>
    %61 = vector.shape_cast %60 : vector<1x1x16x32xf32> to vector<16x32xf32>
    %62 = vector.shape_cast %58 : vector<16x32xf32> to vector<1x1x16x32xf32>
    tpu.vector_store %arg8[%c0_24, %59, %c0_25, %c0_26], %62 {strides = array<i32>} : memref<1x8x16x32xf32, #tpu.memory_space<vmem>>, vector<1x1x16x32xf32>,
    %c1_i32 = arith.constant 1 : i32
    %c0_27 = arith.constant 0 : index
    %63 = arith.index_cast %c1_i32 : i32 to index
    %c0_28 = arith.constant 0 : index
    %c0_29 = arith.constant 0 : index
    %64 = vector.load %arg1[%c0_27, %63, %c0_28, %c0_29] : memref<1x8x16x1xf32, #tpu.memory_space<vmem>>, vector<1x1x16x1xf32>
    %65 = vector.shape_cast %64 : vector<1x1x16x1xf32> to vector<16x1xf32>
    %66 = tpu.concatenate %65, %58 in 1 : vector<16x1xf32>, vector<16x32xf32> -> vector<16x33xf32>
    %67 = vector.extract_strided_slice %0 {offsets = [1, 0, 0], sizes = [1, 16, 16], strides = [1, 1, 1]} : vector<2x16x16xf32> to vector<1x16x16xf32>
    %68 = vector.shape_cast %67 : vector<1x16x16xf32> to vector<16x16xf32>
    %cst_30 = arith.constant dense<0.000000e+00> : vector<16x33xf32>
    %69 = tpu.matmul %68, %66, %cst_30 {dimension_numbers = #tpu.dot_dimension_numbers<[1], [0], [0], [1], [0, 0, 1, 1], [], []>} : vector<16x16xf32>, vector<16x33xf32>, vector<16x33xf32> -> vector<16x33xf32>
    %70 = tpu.concatenate %66, %69 in 1 : vector<16x33xf32>, vector<16x33xf32> -> vector<16x66xf32>
    %71 = vector.broadcast %3 : vector<16x1xf32> to vector<16x66xf32>
    %72 = arith.mulf %71, %70 : vector<16x66xf32>
    %73 = vector.broadcast %4 : vector<16x1xf32> to vector<16x66xf32>
    %74 = arith.mulf %73, %70 : vector<16x66xf32>
    %75 = vector.broadcast %5 : vector<16x1xf32> to vector<16x66xf32>
    %76 = arith.mulf %75, %70 : vector<16x66xf32>
    %77 = vector.broadcast %6 : vector<16x1xf32> to vector<16x66xf32>
    %78 = arith.mulf %77, %70 : vector<16x66xf32>
    %79 = tpu.concatenate %72, %74, %76, %78 in 1 : vector<16x66xf32>, vector<16x66xf32>, vector<16x66xf32>, vector<16x66xf32> -> vector<16x264xf32>
    %c0_31 = arith.constant 0 : index
    %c0_32 = arith.constant 0 : index
    %80 = vector.load %arg3[%c0_31, %c0_32] : memref<264x64xf32, #tpu.memory_space<vmem>>, vector<264x64xf32>
    %cst_33 = arith.constant dense<0.000000e+00> : vector<16x64xf32>
    %81 = tpu.matmul %79, %80, %cst_33 {dimension_numbers = #tpu.dot_dimension_numbers<[1], [0], [0], [1], [0, 0, 1, 1], [], []>} : vector<16x264xf32>, vector<264x64xf32>, vector<16x64xf32> -> vector<16x64xf32>
    %82 = arith.addf %81, %1 : vector<16x64xf32>
    %83 = arith.negf %82 : vector<16x64xf32>
    %84 = math.exp %83 : vector<16x64xf32>
    %cst_34 = arith.constant 1.000000e+00 : f32
    %85 = vector.broadcast %cst_34 : f32 to vector<16x64xf32>
    %86 = arith.addf %85, %84 : vector<16x64xf32>
    %87 = arith.divf %85, %86 : vector<16x64xf32>
    %88 = vector.extract_strided_slice %87 {offsets = [0, 0], sizes = [16, 32], strides = [1, 1]} : vector<16x64xf32> to vector<16x32xf32>
    %89 = vector.extract_strided_slice %87 {offsets = [0, 32], sizes = [16, 32], strides = [1, 1]} : vector<16x64xf32> to vector<16x32xf32>
    %90 = arith.mulf %88, %58 : vector<16x32xf32>
    %91 = tpu.concatenate %65, %90 in 1 : vector<16x1xf32>, vector<16x32xf32> -> vector<16x33xf32>
    %92 = vector.extract_strided_slice %0 {offsets = [1, 0, 0], sizes = [1, 16, 16], strides = [1, 1, 1]} : vector<2x16x16xf32> to vector<1x16x16xf32>
    %93 = vector.shape_cast %92 : vector<1x16x16xf32> to vector<16x16xf32>
    %cst_35 = arith.constant dense<0.000000e+00> : vector<16x33xf32>
    %94 = tpu.matmul %93, %91, %cst_35 {dimension_numbers = #tpu.dot_dimension_numbers<[1], [0], [0], [1], [0, 0, 1, 1], [], []>} : vector<16x16xf32>, vector<16x33xf32>, vector<16x33xf32> -> vector<16x33xf32>
    %95 = tpu.concatenate %91, %94 in 1 : vector<16x33xf32>, vector<16x33xf32> -> vector<16x66xf32>
    %96 = vector.broadcast %3 : vector<16x1xf32> to vector<16x66xf32>
    %97 = arith.mulf %96, %95 : vector<16x66xf32>
    %98 = vector.broadcast %4 : vector<16x1xf32> to vector<16x66xf32>
    %99 = arith.mulf %98, %95 : vector<16x66xf32>
    %100 = vector.broadcast %5 : vector<16x1xf32> to vector<16x66xf32>
    %101 = arith.mulf %100, %95 : vector<16x66xf32>
    %102 = vector.broadcast %6 : vector<16x1xf32> to vector<16x66xf32>
    %103 = arith.mulf %102, %95 : vector<16x66xf32>
    %104 = tpu.concatenate %97, %99, %101, %103 in 1 : vector<16x66xf32>, vector<16x66xf32>, vector<16x66xf32>, vector<16x66xf32> -> vector<16x264xf32>
    %c0_36 = arith.constant 0 : index
    %c0_37 = arith.constant 0 : index
    %105 = vector.load %arg4[%c0_36, %c0_37] : memref<264x32xf32, #tpu.memory_space<vmem>>, vector<264x32xf32>
    %cst_38 = arith.constant dense<0.000000e+00> : vector<16x32xf32>
    %106 = tpu.matmul %104, %105, %cst_38 {dimension_numbers = #tpu.dot_dimension_numbers<[1], [0], [0], [1], [0, 0, 1, 1], [], []>} : vector<16x264xf32>, vector<264x32xf32>, vector<16x32xf32> -> vector<16x32xf32>
    %107 = arith.addf %106, %2 : vector<16x32xf32>
    %108 = math.tanh %107 : vector<16x32xf32>
    %109 = arith.mulf %89, %58 : vector<16x32xf32>
    %cst_39 = arith.constant 1.000000e+00 : f32
    %110 = vector.broadcast %cst_39 : f32 to vector<16x32xf32>
    %111 = arith.subf %110, %89 : vector<16x32xf32>
    %112 = arith.mulf %111, %108 : vector<16x32xf32>
    %113 = arith.addf %109, %112 : vector<16x32xf32>
    %c0_40 = arith.constant 0 : index
    %114 = arith.index_cast %c1_i32 : i32 to index
    %c0_41 = arith.constant 0 : index
    %c0_42 = arith.constant 0 : index
    %115 = vector.load %arg8[%c0_40, %114, %c0_41, %c0_42] : memref<1x8x16x32xf32, #tpu.memory_space<vmem>>, vector<1x1x16x32xf32>
    %116 = vector.shape_cast %115 : vector<1x1x16x32xf32> to vector<16x32xf32>
    %117 = vector.shape_cast %113 : vector<16x32xf32> to vector<1x1x16x32xf32>
    tpu.vector_store %arg8[%c0_40, %114, %c0_41, %c0_42], %117 {strides = array<i32>} : memref<1x8x16x32xf32, #tpu.memory_space<vmem>>, vector<1x1x16x32xf32>,
    %c2_i32 = arith.constant 2 : i32
    %c0_43 = arith.constant 0 : index
    %118 = arith.index_cast %c2_i32 : i32 to index
    %c0_44 = arith.constant 0 : index
    %c0_45 = arith.constant 0 : index
    %119 = vector.load %arg1[%c0_43, %118, %c0_44, %c0_45] : memref<1x8x16x1xf32, #tpu.memory_space<vmem>>, vector<1x1x16x1xf32>
    %120 = vector.shape_cast %119 : vector<1x1x16x1xf32> to vector<16x1xf32>
    %121 = tpu.concatenate %120, %113 in 1 : vector<16x1xf32>, vector<16x32xf32> -> vector<16x33xf32>
    %122 = vector.extract_strided_slice %0 {offsets = [1, 0, 0], sizes = [1, 16, 16], strides = [1, 1, 1]} : vector<2x16x16xf32> to vector<1x16x16xf32>
    %123 = vector.shape_cast %122 : vector<1x16x16xf32> to vector<16x16xf32>
    %cst_46 = arith.constant dense<0.000000e+00> : vector<16x33xf32>
    %124 = tpu.matmul %123, %121, %cst_46 {dimension_numbers = #tpu.dot_dimension_numbers<[1], [0], [0], [1], [0, 0, 1, 1], [], []>} : vector<16x16xf32>, vector<16x33xf32>, vector<16x33xf32> -> vector<16x33xf32>
    %125 = tpu.concatenate %121, %124 in 1 : vector<16x33xf32>, vector<16x33xf32> -> vector<16x66xf32>
    %126 = vector.broadcast %3 : vector<16x1xf32> to vector<16x66xf32>
    %127 = arith.mulf %126, %125 : vector<16x66xf32>
    %128 = vector.broadcast %4 : vector<16x1xf32> to vector<16x66xf32>
    %129 = arith.mulf %128, %125 : vector<16x66xf32>
    %130 = vector.broadcast %5 : vector<16x1xf32> to vector<16x66xf32>
    %131 = arith.mulf %130, %125 : vector<16x66xf32>
    %132 = vector.broadcast %6 : vector<16x1xf32> to vector<16x66xf32>
    %133 = arith.mulf %132, %125 : vector<16x66xf32>
    %134 = tpu.concatenate %127, %129, %131, %133 in 1 : vector<16x66xf32>, vector<16x66xf32>, vector<16x66xf32>, vector<16x66xf32> -> vector<16x264xf32>
    %c0_47 = arith.constant 0 : index
    %c0_48 = arith.constant 0 : index
    %135 = vector.load %arg3[%c0_47, %c0_48] : memref<264x64xf32, #tpu.memory_space<vmem>>, vector<264x64xf32>
    %cst_49 = arith.constant dense<0.000000e+00> : vector<16x64xf32>
    %136 = tpu.matmul %134, %135, %cst_49 {dimension_numbers = #tpu.dot_dimension_numbers<[1], [0], [0], [1], [0, 0, 1, 1], [], []>} : vector<16x264xf32>, vector<264x64xf32>, vector<16x64xf32> -> vector<16x64xf32>
    %137 = arith.addf %136, %1 : vector<16x64xf32>
    %138 = arith.negf %137 : vector<16x64xf32>
    %139 = math.exp %138 : vector<16x64xf32>
    %cst_50 = arith.constant 1.000000e+00 : f32
    %140 = vector.broadcast %cst_50 : f32 to vector<16x64xf32>
    %141 = arith.addf %140, %139 : vector<16x64xf32>
    %142 = arith.divf %140, %141 : vector<16x64xf32>
    %143 = vector.extract_strided_slice %142 {offsets = [0, 0], sizes = [16, 32], strides = [1, 1]} : vector<16x64xf32> to vector<16x32xf32>
    %144 = vector.extract_strided_slice %142 {offsets = [0, 32], sizes = [16, 32], strides = [1, 1]} : vector<16x64xf32> to vector<16x32xf32>
    %145 = arith.mulf %143, %113 : vector<16x32xf32>
    %146 = tpu.concatenate %120, %145 in 1 : vector<16x1xf32>, vector<16x32xf32> -> vector<16x33xf32>
    %147 = vector.extract_strided_slice %0 {offsets = [1, 0, 0], sizes = [1, 16, 16], strides = [1, 1, 1]} : vector<2x16x16xf32> to vector<1x16x16xf32>
    %148 = vector.shape_cast %147 : vector<1x16x16xf32> to vector<16x16xf32>
    %cst_51 = arith.constant dense<0.000000e+00> : vector<16x33xf32>
    %149 = tpu.matmul %148, %146, %cst_51 {dimension_numbers = #tpu.dot_dimension_numbers<[1], [0], [0], [1], [0, 0, 1, 1], [], []>} : vector<16x16xf32>, vector<16x33xf32>, vector<16x33xf32> -> vector<16x33xf32>
    %150 = tpu.concatenate %146, %149 in 1 : vector<16x33xf32>, vector<16x33xf32> -> vector<16x66xf32>
    %151 = vector.broadcast %3 : vector<16x1xf32> to vector<16x66xf32>
    %152 = arith.mulf %151, %150 : vector<16x66xf32>
    %153 = vector.broadcast %4 : vector<16x1xf32> to vector<16x66xf32>
    %154 = arith.mulf %153, %150 : vector<16x66xf32>
    %155 = vector.broadcast %5 : vector<16x1xf32> to vector<16x66xf32>
    %156 = arith.mulf %155, %150 : vector<16x66xf32>
    %157 = vector.broadcast %6 : vector<16x1xf32> to vector<16x66xf32>
    %158 = arith.mulf %157, %150 : vector<16x66xf32>
    %159 = tpu.concatenate %152, %154, %156, %158 in 1 : vector<16x66xf32>, vector<16x66xf32>, vector<16x66xf32>, vector<16x66xf32> -> vector<16x264xf32>
    %c0_52 = arith.constant 0 : index
    %c0_53 = arith.constant 0 : index
    %160 = vector.load %arg4[%c0_52, %c0_53] : memref<264x32xf32, #tpu.memory_space<vmem>>, vector<264x32xf32>
    %cst_54 = arith.constant dense<0.000000e+00> : vector<16x32xf32>
    %161 = tpu.matmul %159, %160, %cst_54 {dimension_numbers = #tpu.dot_dimension_numbers<[1], [0], [0], [1], [0, 0, 1, 1], [], []>} : vector<16x264xf32>, vector<264x32xf32>, vector<16x32xf32> -> vector<16x32xf32>
    %162 = arith.addf %161, %2 : vector<16x32xf32>
    %163 = math.tanh %162 : vector<16x32xf32>
    %164 = arith.mulf %144, %113 : vector<16x32xf32>
    %cst_55 = arith.constant 1.000000e+00 : f32
    %165 = vector.broadcast %cst_55 : f32 to vector<16x32xf32>
    %166 = arith.subf %165, %144 : vector<16x32xf32>
    %167 = arith.mulf %166, %163 : vector<16x32xf32>
    %168 = arith.addf %164, %167 : vector<16x32xf32>
    %c0_56 = arith.constant 0 : index
    %169 = arith.index_cast %c2_i32 : i32 to index
    %c0_57 = arith.constant 0 : index
    %c0_58 = arith.constant 0 : index
    %170 = vector.load %arg8[%c0_56, %169, %c0_57, %c0_58] : memref<1x8x16x32xf32, #tpu.memory_space<vmem>>, vector<1x1x16x32xf32>
    %171 = vector.shape_cast %170 : vector<1x1x16x32xf32> to vector<16x32xf32>
    %172 = vector.shape_cast %168 : vector<16x32xf32> to vector<1x1x16x32xf32>
    tpu.vector_store %arg8[%c0_56, %169, %c0_57, %c0_58], %172 {strides = array<i32>} : memref<1x8x16x32xf32, #tpu.memory_space<vmem>>, vector<1x1x16x32xf32>,
    %c3_i32 = arith.constant 3 : i32
    %c0_59 = arith.constant 0 : index
    %173 = arith.index_cast %c3_i32 : i32 to index
    %c0_60 = arith.constant 0 : index
    %c0_61 = arith.constant 0 : index
    %174 = vector.load %arg1[%c0_59, %173, %c0_60, %c0_61] : memref<1x8x16x1xf32, #tpu.memory_space<vmem>>, vector<1x1x16x1xf32>
    %175 = vector.shape_cast %174 : vector<1x1x16x1xf32> to vector<16x1xf32>
    %176 = tpu.concatenate %175, %168 in 1 : vector<16x1xf32>, vector<16x32xf32> -> vector<16x33xf32>
    %177 = vector.extract_strided_slice %0 {offsets = [1, 0, 0], sizes = [1, 16, 16], strides = [1, 1, 1]} : vector<2x16x16xf32> to vector<1x16x16xf32>
    %178 = vector.shape_cast %177 : vector<1x16x16xf32> to vector<16x16xf32>
    %cst_62 = arith.constant dense<0.000000e+00> : vector<16x33xf32>
    %179 = tpu.matmul %178, %176, %cst_62 {dimension_numbers = #tpu.dot_dimension_numbers<[1], [0], [0], [1], [0, 0, 1, 1], [], []>} : vector<16x16xf32>, vector<16x33xf32>, vector<16x33xf32> -> vector<16x33xf32>
    %180 = tpu.concatenate %176, %179 in 1 : vector<16x33xf32>, vector<16x33xf32> -> vector<16x66xf32>
    %181 = vector.broadcast %3 : vector<16x1xf32> to vector<16x66xf32>
    %182 = arith.mulf %181, %180 : vector<16x66xf32>
    %183 = vector.broadcast %4 : vector<16x1xf32> to vector<16x66xf32>
    %184 = arith.mulf %183, %180 : vector<16x66xf32>
    %185 = vector.broadcast %5 : vector<16x1xf32> to vector<16x66xf32>
    %186 = arith.mulf %185, %180 : vector<16x66xf32>
    %187 = vector.broadcast %6 : vector<16x1xf32> to vector<16x66xf32>
    %188 = arith.mulf %187, %180 : vector<16x66xf32>
    %189 = tpu.concatenate %182, %184, %186, %188 in 1 : vector<16x66xf32>, vector<16x66xf32>, vector<16x66xf32>, vector<16x66xf32> -> vector<16x264xf32>
    %c0_63 = arith.constant 0 : index
    %c0_64 = arith.constant 0 : index
    %190 = vector.load %arg3[%c0_63, %c0_64] : memref<264x64xf32, #tpu.memory_space<vmem>>, vector<264x64xf32>
    %cst_65 = arith.constant dense<0.000000e+00> : vector<16x64xf32>
    %191 = tpu.matmul %189, %190, %cst_65 {dimension_numbers = #tpu.dot_dimension_numbers<[1], [0], [0], [1], [0, 0, 1, 1], [], []>} : vector<16x264xf32>, vector<264x64xf32>, vector<16x64xf32> -> vector<16x64xf32>
    %192 = arith.addf %191, %1 : vector<16x64xf32>
    %193 = arith.negf %192 : vector<16x64xf32>
    %194 = math.exp %193 : vector<16x64xf32>
    %cst_66 = arith.constant 1.000000e+00 : f32
    %195 = vector.broadcast %cst_66 : f32 to vector<16x64xf32>
    %196 = arith.addf %195, %194 : vector<16x64xf32>
    %197 = arith.divf %195, %196 : vector<16x64xf32>
    %198 = vector.extract_strided_slice %197 {offsets = [0, 0], sizes = [16, 32], strides = [1, 1]} : vector<16x64xf32> to vector<16x32xf32>
    %199 = vector.extract_strided_slice %197 {offsets = [0, 32], sizes = [16, 32], strides = [1, 1]} : vector<16x64xf32> to vector<16x32xf32>
    %200 = arith.mulf %198, %168 : vector<16x32xf32>
    %201 = tpu.concatenate %175, %200 in 1 : vector<16x1xf32>, vector<16x32xf32> -> vector<16x33xf32>
    %202 = vector.extract_strided_slice %0 {offsets = [1, 0, 0], sizes = [1, 16, 16], strides = [1, 1, 1]} : vector<2x16x16xf32> to vector<1x16x16xf32>
    %203 = vector.shape_cast %202 : vector<1x16x16xf32> to vector<16x16xf32>
    %cst_67 = arith.constant dense<0.000000e+00> : vector<16x33xf32>
    %204 = tpu.matmul %203, %201, %cst_67 {dimension_numbers = #tpu.dot_dimension_numbers<[1], [0], [0], [1], [0, 0, 1, 1], [], []>} : vector<16x16xf32>, vector<16x33xf32>, vector<16x33xf32> -> vector<16x33xf32>
    %205 = tpu.concatenate %201, %204 in 1 : vector<16x33xf32>, vector<16x33xf32> -> vector<16x66xf32>
    %206 = vector.broadcast %3 : vector<16x1xf32> to vector<16x66xf32>
    %207 = arith.mulf %206, %205 : vector<16x66xf32>
    %208 = vector.broadcast %4 : vector<16x1xf32> to vector<16x66xf32>
    %209 = arith.mulf %208, %205 : vector<16x66xf32>
    %210 = vector.broadcast %5 : vector<16x1xf32> to vector<16x66xf32>
    %211 = arith.mulf %210, %205 : vector<16x66xf32>
    %212 = vector.broadcast %6 : vector<16x1xf32> to vector<16x66xf32>
    %213 = arith.mulf %212, %205 : vector<16x66xf32>
    %214 = tpu.concatenate %207, %209, %211, %213 in 1 : vector<16x66xf32>, vector<16x66xf32>, vector<16x66xf32>, vector<16x66xf32> -> vector<16x264xf32>
    %c0_68 = arith.constant 0 : index
    %c0_69 = arith.constant 0 : index
    %215 = vector.load %arg4[%c0_68, %c0_69] : memref<264x32xf32, #tpu.memory_space<vmem>>, vector<264x32xf32>
    %cst_70 = arith.constant dense<0.000000e+00> : vector<16x32xf32>
    %216 = tpu.matmul %214, %215, %cst_70 {dimension_numbers = #tpu.dot_dimension_numbers<[1], [0], [0], [1], [0, 0, 1, 1], [], []>} : vector<16x264xf32>, vector<264x32xf32>, vector<16x32xf32> -> vector<16x32xf32>
    %217 = arith.addf %216, %2 : vector<16x32xf32>
    %218 = math.tanh %217 : vector<16x32xf32>
    %219 = arith.mulf %199, %168 : vector<16x32xf32>
    %cst_71 = arith.constant 1.000000e+00 : f32
    %220 = vector.broadcast %cst_71 : f32 to vector<16x32xf32>
    %221 = arith.subf %220, %199 : vector<16x32xf32>
    %222 = arith.mulf %221, %218 : vector<16x32xf32>
    %223 = arith.addf %219, %222 : vector<16x32xf32>
    %c0_72 = arith.constant 0 : index
    %224 = arith.index_cast %c3_i32 : i32 to index
    %c0_73 = arith.constant 0 : index
    %c0_74 = arith.constant 0 : index
    %225 = vector.load %arg8[%c0_72, %224, %c0_73, %c0_74] : memref<1x8x16x32xf32, #tpu.memory_space<vmem>>, vector<1x1x16x32xf32>
    %226 = vector.shape_cast %225 : vector<1x1x16x32xf32> to vector<16x32xf32>
    %227 = vector.shape_cast %223 : vector<16x32xf32> to vector<1x1x16x32xf32>
    tpu.vector_store %arg8[%c0_72, %224, %c0_73, %c0_74], %227 {strides = array<i32>} : memref<1x8x16x32xf32, #tpu.memory_space<vmem>>, vector<1x1x16x32xf32>,
    %c4_i32 = arith.constant 4 : i32
    %c0_75 = arith.constant 0 : index
    %228 = arith.index_cast %c4_i32 : i32 to index
    %c0_76 = arith.constant 0 : index
    %c0_77 = arith.constant 0 : index
    %229 = vector.load %arg1[%c0_75, %228, %c0_76, %c0_77] : memref<1x8x16x1xf32, #tpu.memory_space<vmem>>, vector<1x1x16x1xf32>
    %230 = vector.shape_cast %229 : vector<1x1x16x1xf32> to vector<16x1xf32>
    %231 = tpu.concatenate %230, %223 in 1 : vector<16x1xf32>, vector<16x32xf32> -> vector<16x33xf32>
    %232 = vector.extract_strided_slice %0 {offsets = [1, 0, 0], sizes = [1, 16, 16], strides = [1, 1, 1]} : vector<2x16x16xf32> to vector<1x16x16xf32>
    %233 = vector.shape_cast %232 : vector<1x16x16xf32> to vector<16x16xf32>
    %cst_78 = arith.constant dense<0.000000e+00> : vector<16x33xf32>
    %234 = tpu.matmul %233, %231, %cst_78 {dimension_numbers = #tpu.dot_dimension_numbers<[1], [0], [0], [1], [0, 0, 1, 1], [], []>} : vector<16x16xf32>, vector<16x33xf32>, vector<16x33xf32> -> vector<16x33xf32>
    %235 = tpu.concatenate %231, %234 in 1 : vector<16x33xf32>, vector<16x33xf32> -> vector<16x66xf32>
    %236 = vector.broadcast %3 : vector<16x1xf32> to vector<16x66xf32>
    %237 = arith.mulf %236, %235 : vector<16x66xf32>
    %238 = vector.broadcast %4 : vector<16x1xf32> to vector<16x66xf32>
    %239 = arith.mulf %238, %235 : vector<16x66xf32>
    %240 = vector.broadcast %5 : vector<16x1xf32> to vector<16x66xf32>
    %241 = arith.mulf %240, %235 : vector<16x66xf32>
    %242 = vector.broadcast %6 : vector<16x1xf32> to vector<16x66xf32>
    %243 = arith.mulf %242, %235 : vector<16x66xf32>
    %244 = tpu.concatenate %237, %239, %241, %243 in 1 : vector<16x66xf32>, vector<16x66xf32>, vector<16x66xf32>, vector<16x66xf32> -> vector<16x264xf32>
    %c0_79 = arith.constant 0 : index
    %c0_80 = arith.constant 0 : index
    %245 = vector.load %arg3[%c0_79, %c0_80] : memref<264x64xf32, #tpu.memory_space<vmem>>, vector<264x64xf32>
    %cst_81 = arith.constant dense<0.000000e+00> : vector<16x64xf32>
    %246 = tpu.matmul %244, %245, %cst_81 {dimension_numbers = #tpu.dot_dimension_numbers<[1], [0], [0], [1], [0, 0, 1, 1], [], []>} : vector<16x264xf32>, vector<264x64xf32>, vector<16x64xf32> -> vector<16x64xf32>
    %247 = arith.addf %246, %1 : vector<16x64xf32>
    %248 = arith.negf %247 : vector<16x64xf32>
    %249 = math.exp %248 : vector<16x64xf32>
    %cst_82 = arith.constant 1.000000e+00 : f32
    %250 = vector.broadcast %cst_82 : f32 to vector<16x64xf32>
    %251 = arith.addf %250, %249 : vector<16x64xf32>
    %252 = arith.divf %250, %251 : vector<16x64xf32>
    %253 = vector.extract_strided_slice %252 {offsets = [0, 0], sizes = [16, 32], strides = [1, 1]} : vector<16x64xf32> to vector<16x32xf32>
    %254 = vector.extract_strided_slice %252 {offsets = [0, 32], sizes = [16, 32], strides = [1, 1]} : vector<16x64xf32> to vector<16x32xf32>
    %255 = arith.mulf %253, %223 : vector<16x32xf32>
    %256 = tpu.concatenate %230, %255 in 1 : vector<16x1xf32>, vector<16x32xf32> -> vector<16x33xf32>
    %257 = vector.extract_strided_slice %0 {offsets = [1, 0, 0], sizes = [1, 16, 16], strides = [1, 1, 1]} : vector<2x16x16xf32> to vector<1x16x16xf32>
    %258 = vector.shape_cast %257 : vector<1x16x16xf32> to vector<16x16xf32>
    %cst_83 = arith.constant dense<0.000000e+00> : vector<16x33xf32>
    %259 = tpu.matmul %258, %256, %cst_83 {dimension_numbers = #tpu.dot_dimension_numbers<[1], [0], [0], [1], [0, 0, 1, 1], [], []>} : vector<16x16xf32>, vector<16x33xf32>, vector<16x33xf32> -> vector<16x33xf32>
    %260 = tpu.concatenate %256, %259 in 1 : vector<16x33xf32>, vector<16x33xf32> -> vector<16x66xf32>
    %261 = vector.broadcast %3 : vector<16x1xf32> to vector<16x66xf32>
    %262 = arith.mulf %261, %260 : vector<16x66xf32>
    %263 = vector.broadcast %4 : vector<16x1xf32> to vector<16x66xf32>
    %264 = arith.mulf %263, %260 : vector<16x66xf32>
    %265 = vector.broadcast %5 : vector<16x1xf32> to vector<16x66xf32>
    %266 = arith.mulf %265, %260 : vector<16x66xf32>
    %267 = vector.broadcast %6 : vector<16x1xf32> to vector<16x66xf32>
    %268 = arith.mulf %267, %260 : vector<16x66xf32>
    %269 = tpu.concatenate %262, %264, %266, %268 in 1 : vector<16x66xf32>, vector<16x66xf32>, vector<16x66xf32>, vector<16x66xf32> -> vector<16x264xf32>
    %c0_84 = arith.constant 0 : index
    %c0_85 = arith.constant 0 : index
    %270 = vector.load %arg4[%c0_84, %c0_85] : memref<264x32xf32, #tpu.memory_space<vmem>>, vector<264x32xf32>
    %cst_86 = arith.constant dense<0.000000e+00> : vector<16x32xf32>
    %271 = tpu.matmul %269, %270, %cst_86 {dimension_numbers = #tpu.dot_dimension_numbers<[1], [0], [0], [1], [0, 0, 1, 1], [], []>} : vector<16x264xf32>, vector<264x32xf32>, vector<16x32xf32> -> vector<16x32xf32>
    %272 = arith.addf %271, %2 : vector<16x32xf32>
    %273 = math.tanh %272 : vector<16x32xf32>
    %274 = arith.mulf %254, %223 : vector<16x32xf32>
    %cst_87 = arith.constant 1.000000e+00 : f32
    %275 = vector.broadcast %cst_87 : f32 to vector<16x32xf32>
    %276 = arith.subf %275, %254 : vector<16x32xf32>
    %277 = arith.mulf %276, %273 : vector<16x32xf32>
    %278 = arith.addf %274, %277 : vector<16x32xf32>
    %c0_88 = arith.constant 0 : index
    %279 = arith.index_cast %c4_i32 : i32 to index
    %c0_89 = arith.constant 0 : index
    %c0_90 = arith.constant 0 : index
    %280 = vector.load %arg8[%c0_88, %279, %c0_89, %c0_90] : memref<1x8x16x32xf32, #tpu.memory_space<vmem>>, vector<1x1x16x32xf32>
    %281 = vector.shape_cast %280 : vector<1x1x16x32xf32> to vector<16x32xf32>
    %282 = vector.shape_cast %278 : vector<16x32xf32> to vector<1x1x16x32xf32>
    tpu.vector_store %arg8[%c0_88, %279, %c0_89, %c0_90], %282 {strides = array<i32>} : memref<1x8x16x32xf32, #tpu.memory_space<vmem>>, vector<1x1x16x32xf32>,
    %c5_i32 = arith.constant 5 : i32
    %c0_91 = arith.constant 0 : index
    %283 = arith.index_cast %c5_i32 : i32 to index
    %c0_92 = arith.constant 0 : index
    %c0_93 = arith.constant 0 : index
    %284 = vector.load %arg1[%c0_91, %283, %c0_92, %c0_93] : memref<1x8x16x1xf32, #tpu.memory_space<vmem>>, vector<1x1x16x1xf32>
    %285 = vector.shape_cast %284 : vector<1x1x16x1xf32> to vector<16x1xf32>
    %286 = tpu.concatenate %285, %278 in 1 : vector<16x1xf32>, vector<16x32xf32> -> vector<16x33xf32>
    %287 = vector.extract_strided_slice %0 {offsets = [1, 0, 0], sizes = [1, 16, 16], strides = [1, 1, 1]} : vector<2x16x16xf32> to vector<1x16x16xf32>
    %288 = vector.shape_cast %287 : vector<1x16x16xf32> to vector<16x16xf32>
    %cst_94 = arith.constant dense<0.000000e+00> : vector<16x33xf32>
    %289 = tpu.matmul %288, %286, %cst_94 {dimension_numbers = #tpu.dot_dimension_numbers<[1], [0], [0], [1], [0, 0, 1, 1], [], []>} : vector<16x16xf32>, vector<16x33xf32>, vector<16x33xf32> -> vector<16x33xf32>
    %290 = tpu.concatenate %286, %289 in 1 : vector<16x33xf32>, vector<16x33xf32> -> vector<16x66xf32>
    %291 = vector.broadcast %3 : vector<16x1xf32> to vector<16x66xf32>
    %292 = arith.mulf %291, %290 : vector<16x66xf32>
    %293 = vector.broadcast %4 : vector<16x1xf32> to vector<16x66xf32>
    %294 = arith.mulf %293, %290 : vector<16x66xf32>
    %295 = vector.broadcast %5 : vector<16x1xf32> to vector<16x66xf32>
    %296 = arith.mulf %295, %290 : vector<16x66xf32>
    %297 = vector.broadcast %6 : vector<16x1xf32> to vector<16x66xf32>
    %298 = arith.mulf %297, %290 : vector<16x66xf32>
    %299 = tpu.concatenate %292, %294, %296, %298 in 1 : vector<16x66xf32>, vector<16x66xf32>, vector<16x66xf32>, vector<16x66xf32> -> vector<16x264xf32>
    %c0_95 = arith.constant 0 : index
    %c0_96 = arith.constant 0 : index
    %300 = vector.load %arg3[%c0_95, %c0_96] : memref<264x64xf32, #tpu.memory_space<vmem>>, vector<264x64xf32>
    %cst_97 = arith.constant dense<0.000000e+00> : vector<16x64xf32>
    %301 = tpu.matmul %299, %300, %cst_97 {dimension_numbers = #tpu.dot_dimension_numbers<[1], [0], [0], [1], [0, 0, 1, 1], [], []>} : vector<16x264xf32>, vector<264x64xf32>, vector<16x64xf32> -> vector<16x64xf32>
    %302 = arith.addf %301, %1 : vector<16x64xf32>
    %303 = arith.negf %302 : vector<16x64xf32>
    %304 = math.exp %303 : vector<16x64xf32>
    %cst_98 = arith.constant 1.000000e+00 : f32
    %305 = vector.broadcast %cst_98 : f32 to vector<16x64xf32>
    %306 = arith.addf %305, %304 : vector<16x64xf32>
    %307 = arith.divf %305, %306 : vector<16x64xf32>
    %308 = vector.extract_strided_slice %307 {offsets = [0, 0], sizes = [16, 32], strides = [1, 1]} : vector<16x64xf32> to vector<16x32xf32>
    %309 = vector.extract_strided_slice %307 {offsets = [0, 32], sizes = [16, 32], strides = [1, 1]} : vector<16x64xf32> to vector<16x32xf32>
    %310 = arith.mulf %308, %278 : vector<16x32xf32>
    %311 = tpu.concatenate %285, %310 in 1 : vector<16x1xf32>, vector<16x32xf32> -> vector<16x33xf32>
    %312 = vector.extract_strided_slice %0 {offsets = [1, 0, 0], sizes = [1, 16, 16], strides = [1, 1, 1]} : vector<2x16x16xf32> to vector<1x16x16xf32>
    %313 = vector.shape_cast %312 : vector<1x16x16xf32> to vector<16x16xf32>
    %cst_99 = arith.constant dense<0.000000e+00> : vector<16x33xf32>
    %314 = tpu.matmul %313, %311, %cst_99 {dimension_numbers = #tpu.dot_dimension_numbers<[1], [0], [0], [1], [0, 0, 1, 1], [], []>} : vector<16x16xf32>, vector<16x33xf32>, vector<16x33xf32> -> vector<16x33xf32>
    %315 = tpu.concatenate %311, %314 in 1 : vector<16x33xf32>, vector<16x33xf32> -> vector<16x66xf32>
    %316 = vector.broadcast %3 : vector<16x1xf32> to vector<16x66xf32>
    %317 = arith.mulf %316, %315 : vector<16x66xf32>
    %318 = vector.broadcast %4 : vector<16x1xf32> to vector<16x66xf32>
    %319 = arith.mulf %318, %315 : vector<16x66xf32>
    %320 = vector.broadcast %5 : vector<16x1xf32> to vector<16x66xf32>
    %321 = arith.mulf %320, %315 : vector<16x66xf32>
    %322 = vector.broadcast %6 : vector<16x1xf32> to vector<16x66xf32>
    %323 = arith.mulf %322, %315 : vector<16x66xf32>
    %324 = tpu.concatenate %317, %319, %321, %323 in 1 : vector<16x66xf32>, vector<16x66xf32>, vector<16x66xf32>, vector<16x66xf32> -> vector<16x264xf32>
    %c0_100 = arith.constant 0 : index
    %c0_101 = arith.constant 0 : index
    %325 = vector.load %arg4[%c0_100, %c0_101] : memref<264x32xf32, #tpu.memory_space<vmem>>, vector<264x32xf32>
    %cst_102 = arith.constant dense<0.000000e+00> : vector<16x32xf32>
    %326 = tpu.matmul %324, %325, %cst_102 {dimension_numbers = #tpu.dot_dimension_numbers<[1], [0], [0], [1], [0, 0, 1, 1], [], []>} : vector<16x264xf32>, vector<264x32xf32>, vector<16x32xf32> -> vector<16x32xf32>
    %327 = arith.addf %326, %2 : vector<16x32xf32>
    %328 = math.tanh %327 : vector<16x32xf32>
    %329 = arith.mulf %309, %278 : vector<16x32xf32>
    %cst_103 = arith.constant 1.000000e+00 : f32
    %330 = vector.broadcast %cst_103 : f32 to vector<16x32xf32>
    %331 = arith.subf %330, %309 : vector<16x32xf32>
    %332 = arith.mulf %331, %328 : vector<16x32xf32>
    %333 = arith.addf %329, %332 : vector<16x32xf32>
    %c0_104 = arith.constant 0 : index
    %334 = arith.index_cast %c5_i32 : i32 to index
    %c0_105 = arith.constant 0 : index
    %c0_106 = arith.constant 0 : index
    %335 = vector.load %arg8[%c0_104, %334, %c0_105, %c0_106] : memref<1x8x16x32xf32, #tpu.memory_space<vmem>>, vector<1x1x16x32xf32>
    %336 = vector.shape_cast %335 : vector<1x1x16x32xf32> to vector<16x32xf32>
    %337 = vector.shape_cast %333 : vector<16x32xf32> to vector<1x1x16x32xf32>
    tpu.vector_store %arg8[%c0_104, %334, %c0_105, %c0_106], %337 {strides = array<i32>} : memref<1x8x16x32xf32, #tpu.memory_space<vmem>>, vector<1x1x16x32xf32>,
    %c6_i32 = arith.constant 6 : i32
    %c0_107 = arith.constant 0 : index
    %338 = arith.index_cast %c6_i32 : i32 to index
    %c0_108 = arith.constant 0 : index
    %c0_109 = arith.constant 0 : index
    %339 = vector.load %arg1[%c0_107, %338, %c0_108, %c0_109] : memref<1x8x16x1xf32, #tpu.memory_space<vmem>>, vector<1x1x16x1xf32>
    %340 = vector.shape_cast %339 : vector<1x1x16x1xf32> to vector<16x1xf32>
    %341 = tpu.concatenate %340, %333 in 1 : vector<16x1xf32>, vector<16x32xf32> -> vector<16x33xf32>
    %342 = vector.extract_strided_slice %0 {offsets = [1, 0, 0], sizes = [1, 16, 16], strides = [1, 1, 1]} : vector<2x16x16xf32> to vector<1x16x16xf32>
    %343 = vector.shape_cast %342 : vector<1x16x16xf32> to vector<16x16xf32>
    %cst_110 = arith.constant dense<0.000000e+00> : vector<16x33xf32>
    %344 = tpu.matmul %343, %341, %cst_110 {dimension_numbers = #tpu.dot_dimension_numbers<[1], [0], [0], [1], [0, 0, 1, 1], [], []>} : vector<16x16xf32>, vector<16x33xf32>, vector<16x33xf32> -> vector<16x33xf32>
    %345 = tpu.concatenate %341, %344 in 1 : vector<16x33xf32>, vector<16x33xf32> -> vector<16x66xf32>
    %346 = vector.broadcast %3 : vector<16x1xf32> to vector<16x66xf32>
    %347 = arith.mulf %346, %345 : vector<16x66xf32>
    %348 = vector.broadcast %4 : vector<16x1xf32> to vector<16x66xf32>
    %349 = arith.mulf %348, %345 : vector<16x66xf32>
    %350 = vector.broadcast %5 : vector<16x1xf32> to vector<16x66xf32>
    %351 = arith.mulf %350, %345 : vector<16x66xf32>
    %352 = vector.broadcast %6 : vector<16x1xf32> to vector<16x66xf32>
    %353 = arith.mulf %352, %345 : vector<16x66xf32>
    %354 = tpu.concatenate %347, %349, %351, %353 in 1 : vector<16x66xf32>, vector<16x66xf32>, vector<16x66xf32>, vector<16x66xf32> -> vector<16x264xf32>
    %c0_111 = arith.constant 0 : index
    %c0_112 = arith.constant 0 : index
    %355 = vector.load %arg3[%c0_111, %c0_112] : memref<264x64xf32, #tpu.memory_space<vmem>>, vector<264x64xf32>
    %cst_113 = arith.constant dense<0.000000e+00> : vector<16x64xf32>
    %356 = tpu.matmul %354, %355, %cst_113 {dimension_numbers = #tpu.dot_dimension_numbers<[1], [0], [0], [1], [0, 0, 1, 1], [], []>} : vector<16x264xf32>, vector<264x64xf32>, vector<16x64xf32> -> vector<16x64xf32>
    %357 = arith.addf %356, %1 : vector<16x64xf32>
    %358 = arith.negf %357 : vector<16x64xf32>
    %359 = math.exp %358 : vector<16x64xf32>
    %cst_114 = arith.constant 1.000000e+00 : f32
    %360 = vector.broadcast %cst_114 : f32 to vector<16x64xf32>
    %361 = arith.addf %360, %359 : vector<16x64xf32>
    %362 = arith.divf %360, %361 : vector<16x64xf32>
    %363 = vector.extract_strided_slice %362 {offsets = [0, 0], sizes = [16, 32], strides = [1, 1]} : vector<16x64xf32> to vector<16x32xf32>
    %364 = vector.extract_strided_slice %362 {offsets = [0, 32], sizes = [16, 32], strides = [1, 1]} : vector<16x64xf32> to vector<16x32xf32>
    %365 = arith.mulf %363, %333 : vector<16x32xf32>
    %366 = tpu.concatenate %340, %365 in 1 : vector<16x1xf32>, vector<16x32xf32> -> vector<16x33xf32>
    %367 = vector.extract_strided_slice %0 {offsets = [1, 0, 0], sizes = [1, 16, 16], strides = [1, 1, 1]} : vector<2x16x16xf32> to vector<1x16x16xf32>
    %368 = vector.shape_cast %367 : vector<1x16x16xf32> to vector<16x16xf32>
    %cst_115 = arith.constant dense<0.000000e+00> : vector<16x33xf32>
    %369 = tpu.matmul %368, %366, %cst_115 {dimension_numbers = #tpu.dot_dimension_numbers<[1], [0], [0], [1], [0, 0, 1, 1], [], []>} : vector<16x16xf32>, vector<16x33xf32>, vector<16x33xf32> -> vector<16x33xf32>
    %370 = tpu.concatenate %366, %369 in 1 : vector<16x33xf32>, vector<16x33xf32> -> vector<16x66xf32>
    %371 = vector.broadcast %3 : vector<16x1xf32> to vector<16x66xf32>
    %372 = arith.mulf %371, %370 : vector<16x66xf32>
    %373 = vector.broadcast %4 : vector<16x1xf32> to vector<16x66xf32>
    %374 = arith.mulf %373, %370 : vector<16x66xf32>
    %375 = vector.broadcast %5 : vector<16x1xf32> to vector<16x66xf32>
    %376 = arith.mulf %375, %370 : vector<16x66xf32>
    %377 = vector.broadcast %6 : vector<16x1xf32> to vector<16x66xf32>
    %378 = arith.mulf %377, %370 : vector<16x66xf32>
    %379 = tpu.concatenate %372, %374, %376, %378 in 1 : vector<16x66xf32>, vector<16x66xf32>, vector<16x66xf32>, vector<16x66xf32> -> vector<16x264xf32>
    %c0_116 = arith.constant 0 : index
    %c0_117 = arith.constant 0 : index
    %380 = vector.load %arg4[%c0_116, %c0_117] : memref<264x32xf32, #tpu.memory_space<vmem>>, vector<264x32xf32>
    %cst_118 = arith.constant dense<0.000000e+00> : vector<16x32xf32>
    %381 = tpu.matmul %379, %380, %cst_118 {dimension_numbers = #tpu.dot_dimension_numbers<[1], [0], [0], [1], [0, 0, 1, 1], [], []>} : vector<16x264xf32>, vector<264x32xf32>, vector<16x32xf32> -> vector<16x32xf32>
    %382 = arith.addf %381, %2 : vector<16x32xf32>
    %383 = math.tanh %382 : vector<16x32xf32>
    %384 = arith.mulf %364, %333 : vector<16x32xf32>
    %cst_119 = arith.constant 1.000000e+00 : f32
    %385 = vector.broadcast %cst_119 : f32 to vector<16x32xf32>
    %386 = arith.subf %385, %364 : vector<16x32xf32>
    %387 = arith.mulf %386, %383 : vector<16x32xf32>
    %388 = arith.addf %384, %387 : vector<16x32xf32>
    %c0_120 = arith.constant 0 : index
    %389 = arith.index_cast %c6_i32 : i32 to index
    %c0_121 = arith.constant 0 : index
    %c0_122 = arith.constant 0 : index
    %390 = vector.load %arg8[%c0_120, %389, %c0_121, %c0_122] : memref<1x8x16x32xf32, #tpu.memory_space<vmem>>, vector<1x1x16x32xf32>
    %391 = vector.shape_cast %390 : vector<1x1x16x32xf32> to vector<16x32xf32>
    %392 = vector.shape_cast %388 : vector<16x32xf32> to vector<1x1x16x32xf32>
    tpu.vector_store %arg8[%c0_120, %389, %c0_121, %c0_122], %392 {strides = array<i32>} : memref<1x8x16x32xf32, #tpu.memory_space<vmem>>, vector<1x1x16x32xf32>,
    %c7_i32 = arith.constant 7 : i32
    %c0_123 = arith.constant 0 : index
    %393 = arith.index_cast %c7_i32 : i32 to index
    %c0_124 = arith.constant 0 : index
    %c0_125 = arith.constant 0 : index
    %394 = vector.load %arg1[%c0_123, %393, %c0_124, %c0_125] : memref<1x8x16x1xf32, #tpu.memory_space<vmem>>, vector<1x1x16x1xf32>
    %395 = vector.shape_cast %394 : vector<1x1x16x1xf32> to vector<16x1xf32>
    %396 = tpu.concatenate %395, %388 in 1 : vector<16x1xf32>, vector<16x32xf32> -> vector<16x33xf32>
    %397 = vector.extract_strided_slice %0 {offsets = [1, 0, 0], sizes = [1, 16, 16], strides = [1, 1, 1]} : vector<2x16x16xf32> to vector<1x16x16xf32>
    %398 = vector.shape_cast %397 : vector<1x16x16xf32> to vector<16x16xf32>
    %cst_126 = arith.constant dense<0.000000e+00> : vector<16x33xf32>
    %399 = tpu.matmul %398, %396, %cst_126 {dimension_numbers = #tpu.dot_dimension_numbers<[1], [0], [0], [1], [0, 0, 1, 1], [], []>} : vector<16x16xf32>, vector<16x33xf32>, vector<16x33xf32> -> vector<16x33xf32>
    %400 = tpu.concatenate %396, %399 in 1 : vector<16x33xf32>, vector<16x33xf32> -> vector<16x66xf32>
    %401 = vector.broadcast %3 : vector<16x1xf32> to vector<16x66xf32>
    %402 = arith.mulf %401, %400 : vector<16x66xf32>
    %403 = vector.broadcast %4 : vector<16x1xf32> to vector<16x66xf32>
    %404 = arith.mulf %403, %400 : vector<16x66xf32>
    %405 = vector.broadcast %5 : vector<16x1xf32> to vector<16x66xf32>
    %406 = arith.mulf %405, %400 : vector<16x66xf32>
    %407 = vector.broadcast %6 : vector<16x1xf32> to vector<16x66xf32>
    %408 = arith.mulf %407, %400 : vector<16x66xf32>
    %409 = tpu.concatenate %402, %404, %406, %408 in 1 : vector<16x66xf32>, vector<16x66xf32>, vector<16x66xf32>, vector<16x66xf32> -> vector<16x264xf32>
    %c0_127 = arith.constant 0 : index
    %c0_128 = arith.constant 0 : index
    %410 = vector.load %arg3[%c0_127, %c0_128] : memref<264x64xf32, #tpu.memory_space<vmem>>, vector<264x64xf32>
    %cst_129 = arith.constant dense<0.000000e+00> : vector<16x64xf32>
    %411 = tpu.matmul %409, %410, %cst_129 {dimension_numbers = #tpu.dot_dimension_numbers<[1], [0], [0], [1], [0, 0, 1, 1], [], []>} : vector<16x264xf32>, vector<264x64xf32>, vector<16x64xf32> -> vector<16x64xf32>
    %412 = arith.addf %411, %1 : vector<16x64xf32>
    %413 = arith.negf %412 : vector<16x64xf32>
    %414 = math.exp %413 : vector<16x64xf32>
    %cst_130 = arith.constant 1.000000e+00 : f32
    %415 = vector.broadcast %cst_130 : f32 to vector<16x64xf32>
    %416 = arith.addf %415, %414 : vector<16x64xf32>
    %417 = arith.divf %415, %416 : vector<16x64xf32>
    %418 = vector.extract_strided_slice %417 {offsets = [0, 0], sizes = [16, 32], strides = [1, 1]} : vector<16x64xf32> to vector<16x32xf32>
    %419 = vector.extract_strided_slice %417 {offsets = [0, 32], sizes = [16, 32], strides = [1, 1]} : vector<16x64xf32> to vector<16x32xf32>
    %420 = arith.mulf %418, %388 : vector<16x32xf32>
    %421 = tpu.concatenate %395, %420 in 1 : vector<16x1xf32>, vector<16x32xf32> -> vector<16x33xf32>
    %422 = vector.extract_strided_slice %0 {offsets = [1, 0, 0], sizes = [1, 16, 16], strides = [1, 1, 1]} : vector<2x16x16xf32> to vector<1x16x16xf32>
    %423 = vector.shape_cast %422 : vector<1x16x16xf32> to vector<16x16xf32>
    %cst_131 = arith.constant dense<0.000000e+00> : vector<16x33xf32>
    %424 = tpu.matmul %423, %421, %cst_131 {dimension_numbers = #tpu.dot_dimension_numbers<[1], [0], [0], [1], [0, 0, 1, 1], [], []>} : vector<16x16xf32>, vector<16x33xf32>, vector<16x33xf32> -> vector<16x33xf32>
    %425 = tpu.concatenate %421, %424 in 1 : vector<16x33xf32>, vector<16x33xf32> -> vector<16x66xf32>
    %426 = vector.broadcast %3 : vector<16x1xf32> to vector<16x66xf32>
    %427 = arith.mulf %426, %425 : vector<16x66xf32>
    %428 = vector.broadcast %4 : vector<16x1xf32> to vector<16x66xf32>
    %429 = arith.mulf %428, %425 : vector<16x66xf32>
    %430 = vector.broadcast %5 : vector<16x1xf32> to vector<16x66xf32>
    %431 = arith.mulf %430, %425 : vector<16x66xf32>
    %432 = vector.broadcast %6 : vector<16x1xf32> to vector<16x66xf32>
    %433 = arith.mulf %432, %425 : vector<16x66xf32>
    %434 = tpu.concatenate %427, %429, %431, %433 in 1 : vector<16x66xf32>, vector<16x66xf32>, vector<16x66xf32>, vector<16x66xf32> -> vector<16x264xf32>
    %c0_132 = arith.constant 0 : index
    %c0_133 = arith.constant 0 : index
    %435 = vector.load %arg4[%c0_132, %c0_133] : memref<264x32xf32, #tpu.memory_space<vmem>>, vector<264x32xf32>
    %cst_134 = arith.constant dense<0.000000e+00> : vector<16x32xf32>
    %436 = tpu.matmul %434, %435, %cst_134 {dimension_numbers = #tpu.dot_dimension_numbers<[1], [0], [0], [1], [0, 0, 1, 1], [], []>} : vector<16x264xf32>, vector<264x32xf32>, vector<16x32xf32> -> vector<16x32xf32>
    %437 = arith.addf %436, %2 : vector<16x32xf32>
    %438 = math.tanh %437 : vector<16x32xf32>
    %439 = arith.mulf %419, %388 : vector<16x32xf32>
    %cst_135 = arith.constant 1.000000e+00 : f32
    %440 = vector.broadcast %cst_135 : f32 to vector<16x32xf32>
    %441 = arith.subf %440, %419 : vector<16x32xf32>
    %442 = arith.mulf %441, %438 : vector<16x32xf32>
    %443 = arith.addf %439, %442 : vector<16x32xf32>
    %c0_136 = arith.constant 0 : index
    %444 = arith.index_cast %c7_i32 : i32 to index
    %c0_137 = arith.constant 0 : index
    %c0_138 = arith.constant 0 : index
    %445 = vector.load %arg8[%c0_136, %444, %c0_137, %c0_138] : memref<1x8x16x32xf32, #tpu.memory_space<vmem>>, vector<1x1x16x32xf32>
    %446 = vector.shape_cast %445 : vector<1x1x16x32xf32> to vector<16x32xf32>
    %447 = vector.shape_cast %443 : vector<16x32xf32> to vector<1x1x16x32xf32>
    tpu.vector_store %arg8[%c0_136, %444, %c0_137, %c0_138], %447 {strides = array<i32>} : memref<1x8x16x32xf32, #tpu.memory_space<vmem>>, vector<1x1x16x32xf32>,
    %c8_i32 = arith.constant 8 : i32
    return
  }
  func.func @transform_0(%arg0: i32) -> (i32, i32, i32, i32) {
    %c0_i32 = arith.constant 0 : i32
    %c0_i32_0 = arith.constant 0 : i32
    %c0_i32_1 = arith.constant 0 : i32
    %c0_i32_2 = arith.constant 0 : i32
    return %arg0, %c0_i32, %c0_i32_0, %c0_i32_1 : i32, i32, i32, i32
  }
  func.func @transform_1(%arg0: i32) -> (i32, i32, i32) {
    %c0_i32 = arith.constant 0 : i32
    %c0_i32_0 = arith.constant 0 : i32
    %c0_i32_1 = arith.constant 0 : i32
    %c0_i32_2 = arith.constant 0 : i32
    return %c0_i32, %c0_i32_0, %c0_i32_1 : i32, i32, i32
  }
  func.func @transform_2(%arg0: i32) -> (i32, i32) {
    %c0_i32 = arith.constant 0 : i32
    %c0_i32_0 = arith.constant 0 : i32
    %c0_i32_1 = arith.constant 0 : i32
    return %c0_i32, %c0_i32_0 : i32, i32
  }
  func.func @transform_3(%arg0: i32) -> (i32, i32) {
    %c0_i32 = arith.constant 0 : i32
    %c0_i32_0 = arith.constant 0 : i32
    %c0_i32_1 = arith.constant 0 : i32
    return %c0_i32, %c0_i32_0 : i32, i32
  }
  func.func @transform_4(%arg0: i32) -> (i32, i32) {
    %c0_i32 = arith.constant 0 : i32
    %c0_i32_0 = arith.constant 0 : i32
    %c0_i32_1 = arith.constant 0 : i32
    return %c0_i32, %c0_i32_0 : i32, i32
  }
  func.func @transform_5(%arg0: i32) -> (i32, i32) {
    %c0_i32 = arith.constant 0 : i32
    %c0_i32_0 = arith.constant 0 : i32
    %c0_i32_1 = arith.constant 0 : i32
    return %c0_i32, %c0_i32_0 : i32, i32
  }
  func.func @transform_6(%arg0: i32) -> (i32, i32) {
    %c0_i32 = arith.constant 0 : i32
    %c0_i32_0 = arith.constant 0 : i32
    %c0_i32_1 = arith.constant 0 : i32
    return %c0_i32, %c0_i32_0 : i32, i32
  }
  func.func @transform_7(%arg0: i32) -> (i32, i32, i32, i32) {
    %c0_i32 = arith.constant 0 : i32
    %c0_i32_0 = arith.constant 0 : i32
    %c0_i32_1 = arith.constant 0 : i32
    %c0_i32_2 = arith.constant 0 : i32
    return %arg0, %c0_i32, %c0_i32_0, %c0_i32_1 : i32, i32, i32, i32
  }
}

</mosaic_0001>

<bundles_post_ra>
// kernel: _lambda_.2
= control target key start
LH: loop header
LB: loop body
LE: loop exit
PB: predicated region body
PF: predicated region fallthrough
CT: control target
= control target key end

     0   :  { %8 = vsyncpa [#allocation5], 0  ;;  %s249_s0 = inlined_call_operand.vmem [shape: f32[8,128], index: 0, kind: input, shape index: {}]   ;;  %s250_s1 = inlined_call_operand.vmem [shape: f32[6,3], index: 1, kind: input, shape index: {}]   ;;  %s251_s2 = inlined_call_operand.vmem [shape: f32[6], index: 2, kind: input, shape index: {}]   ;;  %s252_s3 = inlined_call_operand.vmem [shape: f32[8,128], index: 3, kind: output, shape index: {}]  }
   0x1   :  { %s18_s14 = sshll.u32 %s250_s1, 4  ;;  %s19_s14 = int_to_ptr.vmem [resolvable:$true] %s18_s14 }
   0x2   :  { %9 = vsyncpa [#allocation7], 0  ;;  %s28_s17 = sshll.u32 %s251_s2, 4  ;;  %s186_s18 = scalar_lea.vmem %s19_s14, 128  ;;  %s29_s17 = int_to_ptr.vmem [resolvable:$true] %s28_s17 }
   0x3   :  { %p187_p0 = scmp.ne.s32.totalorder %s19_s14, %s186_s18  ;;  %p191_p1 = scmp.lt.s32.totalorder %s19_s14, %s19_s14 }
   0x4   :  { %p192_p2 = scmp.lt.s32.totalorder %s186_s18, %s186_s18 }
   0x6   :  { %p193_p3 = por %p192_p2, %p191_p1 }
   0x8   :  { %p194_p4 = pnand %p193_p3, %p187_p0 }
   0xa   :  { %197 = shalt.err (!%p194_p4)
}
   0xb   :  { %s214_s19 = smov [#allocation4]   ;;  %s198_s20 = scalar_lea.vmem %s29_s17, 16 }
   0xc   :  { %21 = dma.vmem_to_smem %s19_s14, 128, %s214_s19, [#allocation5]  }
   0xd   :  { %p199_p5 = scmp.ne.s32.totalorder %s29_s17, %s198_s20  ;;  %p203_p6 = scmp.lt.s32.totalorder %s29_s17, %s29_s17 }
   0xe   :  { %p204_p7 = scmp.lt.s32.totalorder %s198_s20, %s198_s20 }
  0x10   :  { %p205_p8 = por %p204_p7, %p203_p6 }
  0x12   :  { %p206_p9 = pnand %p205_p8, %p199_p5 }
  0x14   :  { %209 = shalt.err (!%p206_p9)
}
  0x15   :  { %s215_s1 = smov [#allocation6]  }
  0x16   :  { %31 = dma.vmem_to_smem %s29_s17, 16, %s215_s1, [#allocation7]  }
  0x17   :  { %210 = dma.done.wait [#allocation5], 128  }
  0x18   :  { %211 = vsyncadd [#allocation5], 4294967168 }
  0x19   :  { %212 = dma.done.wait [#allocation7], 16  }
  0x1a   :  { %213 = vsyncadd [#allocation7], 4294967280 }
  0x1b   :  { %38 = sfence }
  0x1c   :  { %v41_v0 = vld [vmem:[%s249_s0] sm:$0xff]  ;;  %s44_s22 = sld [smem:[#allocation6]]  ;;  %v216_v1 = vmov 0.0   ;;  %s163_s24 = sld [smem:[#allocation4 + $0x1]] }
  0x1d   :  { %s46_s23 = sld [smem:[#allocation4]]  ;;  %39 = vst [vmem:[#allocation2] sm:$0xff] %v216_v1  ;;  %40 = vst [vmem:[#allocation3] sm:$0xff] %v216_v1  ;;  %s164_s25 = sld [smem:[#allocation4 + $0x2]] }
  0x1e   :  { %42 = vst [vmem:[#allocation2 + $0x8] sm:$0xff] %v41_v0  ;;  %s166_s0 = sld [smem:[#allocation4 + $0x80]]  ;;  %s165_s26 = sld [smem:[#allocation6 + $0x1]] }
  0x1f   :  { %s167_s27 = sld [smem:[#allocation4 + $0x81]]  ;;  %s168_s28 = sld [smem:[#allocation4 + $0x82]] }
  0x20   :  { %s170_s29 = sld [smem:[#allocation4 + $0x100]]  ;;  %s169_s30 = sld [smem:[#allocation6 + $0x2]] }
  0x21   :  { %s171_s4 = sld [smem:[#allocation4 + $0x101]]  ;;  %s172_s5 = sld [smem:[#allocation4 + $0x102]] }
  0x22   :  { %v45_v3 = vstv %s44_s22  ;;  %v53_v6 = vstv %s163_s24  ;;  %s174_s6 = sld [smem:[#allocation4 + $0x180]]  ;;  %s173_s7 = sld [smem:[#allocation6 + $0x3]] }
  0x23   :  { %v48_v2 = vstv %s46_s23  ;;  %v57_v7 = vstv %s164_s25  ;;  %s175_s8 = sld [smem:[#allocation4 + $0x181]]  ;;  %s176_s9 = sld [smem:[#allocation4 + $0x182]] }
  0x24   :  { %v58_v11 = vmul.f32 %v57_v7, %v41_v0  ;;  %v66_v15 = vstv %s166_s0  ;;  %v63_v16 = vstv %s165_s26  ;;  %s178_s10 = sld [smem:[#allocation4 + $0x201]]  ;;  %s177_s11 = sld [smem:[#allocation6 + $0x4]] }
  0x25   :  { %v47_v4 = vld [vmem:[#allocation2 + $0x6] sm:$0xff]  ;;  %v71_v19 = vstv %s167_s27  ;;  %v76_v21 = vstv %s168_s28  ;;  %s179_s12 = sld [smem:[#allocation4 + $0x202]]  ;;  %s181_s13 = sld [smem:[#allocation4 + $0x281]] }
  0x26   :  { %v52_v5 = vld [vmem:[#allocation2 + $0x7] sm:$0xff]  ;;  %v49_v8 = vmul.f32 %v48_v2, %v47_v4  ;;  %v89_v30 = vstv %s170_s29  ;;  %v86_v31 = vstv %s169_s30  ;;  %s182_s14 = sld [smem:[#allocation4 + $0x282]]  ;;  %s180_s15 = sld [smem:[#allocation6 + $0x5]] }
  0x27   :  { %v54_v10 = vmul.f32 %v53_v6, %v52_v5  ;;  %v94_v34 = vstv %s171_s4  ;;  %v98_v36 = vstv %s172_s5 }
  0x28   :  { %v50_v9 = vadd.f32 %v49_v8, %v45_v3  ;;  %v107_v43 = vstv %s174_s6  ;;  %v104_v44 = vstv %s173_s7 }
  0x29   :  { %v112_v47 = vstv %s175_s8  ;;  %v117_v49 = vstv %s176_s9 }
  0x2a   :  { %v55_v12 = vadd.f32 %v54_v10, %v50_v9  ;;  %v130_v58 = vstv %s178_s10  ;;  %v127_v59 = vstv %s177_s11 }
  0x2b   :  { %v134_v61 = vstv %s179_s12  ;;  %v143_v3 = vstv %s181_s13 }
  0x2c   :  { %v59_v13 = vadd.f32 %v58_v11, %v55_v12  ;;  %v148_v5 = vstv %s182_s14  ;;  %v140_v6 = vstv %s180_s15 }
  0x2e   :  { %v60_v14 = vmax.f32 %v59_v13, 0.0 }
  0x30   :  { %61 = vst [vmem:[#allocation3 + $0x8] sm:$0xff] %v60_v14  ;;  %v77_v25 = vmul.f32 %v76_v21, %v60_v14 }
  0x37   :  { %v65_v17 = vld [vmem:[#allocation3 + $0x6] sm:$0xff] }
  0x38   :  { %v70_v18 = vld [vmem:[#allocation3 + $0x7] sm:$0xff]  ;;  %v67_v20 = vmul.f32 %v66_v15, %v65_v17 }
  0x39   :  { %v72_v23 = vmul.f32 %v71_v19, %v70_v18 }
  0x3a   :  { %v68_v22 = vadd.f32 %v67_v20, %v63_v16 }
  0x3c   :  { %v73_v24 = vadd.f32 %v72_v23, %v68_v22 }
  0x3e   :  { %v78_v26 = vadd.f32 %v77_v25, %v73_v24 }
  0x40   :  { %v79_v27 = vmax.f32 %v78_v26, 0.0 }
  0x42   :  { %v81_v28 = vadd.f32 %v79_v27, %v41_v0 }
  0x44   :  { %v82_v29 = vmax.f32 %v81_v28, 0.0 }
  0x46   :  { %83 = vst [vmem:[#allocation2 + $0x8] sm:$0xff] %v82_v29  ;;  %v99_v40 = vmul.f32 %v98_v36, %v82_v29 }
  0x4d   :  { %v88_v32 = vld [vmem:[#allocation2 + $0x4] sm:$0xff] }
  0x4e   :  { %v93_v33 = vld [vmem:[#allocation2 + $0x6] sm:$0xff]  ;;  %v90_v35 = vmul.f32 %v89_v30, %v88_v32 }
  0x4f   :  { %v95_v38 = vmul.f32 %v94_v34, %v93_v33 }
  0x50   :  { %v91_v37 = vadd.f32 %v90_v35, %v86_v31 }
  0x52   :  { %v96_v39 = vadd.f32 %v95_v38, %v91_v37 }
  0x54   :  { %v100_v41 = vadd.f32 %v99_v40, %v96_v39 }
  0x56   :  { %v101_v42 = vmax.f32 %v100_v41, 0.0 }
  0x58   :  { %102 = vst [vmem:[#allocation3 + $0x8] sm:$0xff] %v101_v42  ;;  %v118_v53 = vmul.f32 %v117_v49, %v101_v42 }
  0x5f   :  { %v106_v45 = vld [vmem:[#allocation3 + $0x4] sm:$0xff] }
  0x60   :  { %v111_v46 = vld [vmem:[#allocation3 + $0x6] sm:$0xff]  ;;  %v108_v48 = vmul.f32 %v107_v43, %v106_v45 }
  0x61   :  { %v113_v51 = vmul.f32 %v112_v47, %v111_v46 }
  0x62   :  { %v109_v50 = vadd.f32 %v108_v48, %v104_v44 }
  0x64   :  { %v114_v52 = vadd.f32 %v113_v51, %v109_v50 }
  0x66   :  { %v119_v54 = vadd.f32 %v118_v53, %v114_v52 }
  0x68   :  { %v120_v55 = vmax.f32 %v119_v54, 0.0 }
  0x6a   :  { %v122_v56 = vadd.f32 %v120_v55, %v82_v29 }
  0x6c   :  { %v123_v57 = vmax.f32 %v122_v56, 0.0 }
  0x6e   :  { %124 = vst [vmem:[#allocation2 + $0x8] sm:$0xff] %v123_v57  ;;  %v135_v0 = vmul.f32 %v134_v61, %v123_v57 }
  0x75   :  { %v129_v60 = vld [vmem:[#allocation2 + $0x4] sm:$0xff] }
  0x76   :  { %v131_v62 = vmul.f32 %v130_v58, %v129_v60 }
  0x78   :  { %v132_v63 = vadd.f32 %v131_v62, %v127_v59 }
  0x7a   :  { %v136_v1 = vadd.f32 %v135_v0, %v132_v63 }
  0x7c   :  { %v137_v2 = vmax.f32 %v136_v1, 0.0 }
  0x7e   :  { %138 = vst [vmem:[#allocation3 + $0x8] sm:$0xff] %v137_v2  ;;  %v149_v8 = vmul.f32 %v148_v5, %v137_v2 }
  0x85   :  { %v142_v4 = vld [vmem:[#allocation3 + $0x4] sm:$0xff] }
  0x86   :  { %v144_v7 = vmul.f32 %v143_v3, %v142_v4 }
  0x88   :  { %v145_v9 = vadd.f32 %v144_v7, %v140_v6 }
  0x8a   :  { %v150_v10 = vadd.f32 %v149_v8, %v145_v9 }
  0x8c   :  { %v151_v11 = vmax.f32 %v150_v10, 0.0 }
  0x8e   :  { %v153_v12 = vadd.f32 %v151_v11, %v123_v57 }
  0x90   :  { %v154_v13 = vmax.f32 %v153_v12, 0.0 }
  0x92   :  { %155 = vst [vmem:[#allocation2 + $0x8] sm:$0xff] %v154_v13  ;;  %156 = vst [vmem:[%s252_s3] sm:$0xff] %v154_v13 }
  0x93   :  { %161 = vsyncpa [#allocation5], 1 }
  0x94   :  { %162 = vsyncpa [#allocation7], 1 }

// kernel: _lambda_.3
= control target key start
LH: loop header
LB: loop body
LE: loop exit
PB: predicated region body
PF: predicated region fallthrough
CT: control target
= control target key end

     0   :  { %s7744_s24 = smov 0   ;;  %s10164_s0 = inlined_call_operand.vmem [shape: f32[2,8,16,1], index: 0, kind: input, shape index: {}]   ;;  %s10165_s1 = inlined_call_operand.vmem [shape: f32[2,16,16], index: 1, kind: input, shape index: {}]   ;;  %s10166_s2 = inlined_call_operand.vmem [shape: f32[264,64], index: 2, kind: input, shape index: {}]   ;;  %s10167_s3 = inlined_call_operand.vmem [shape: f32[264,32], index: 3, kind: input, shape index: {}]   ;;  %s10168_s4 = inlined_call_operand.vmem [shape: f32[16,64], index: 4, kind: input, shape index: {}]   ;;  %s10169_s5 = inlined_call_operand.vmem [shape: f32[16,32], index: 5, kind: input, shape index: {}]   ;;  %s10170_s6 = inlined_call_operand.vmem [shape: f32[16,4], index: 6, kind: input, shape index: {}]   ;;  %s10171_s7 = inlined_call_operand.vmem [shape: f32[2,8,16,32], index: 7, kind: output, shape index: {}]  }
   0x1 LB: > { %s5852_s25 = sadd.s32 4294967295, %s7690_s24   ;;  %p5856_p0 = scmp.ge.s32.totalorder %s7690_s24, 1  ;;  %s7690_s24 = sphi %s7744_s24, %s17_s24  }
   0x2   : > { %p237_p1 = scmp.lt.s32.totalorder %s7690_s24, 3 }
   0x4   : > { %p238_p2 = pnand %p5856_p0, %p237_p1 }
   0x6   : > { %241 = sbr.rel (%p238_p2) target bundleno = 14072 (0x36f8), region = 48 }
   0xd   : > { %p269_p3 = scmp.lt.s32.totalorder %s5852_s25, 1  ;;  %v7755_v0 = vld [vmem:[%s10165_s1 + $0x10] sm:$0xff]  ;;  %vm292_vm0 = vcmask 130048   ;;  %v7692_v1 = vmov 3   ;;  %v285_v2 = vld [vmem:[%s10170_s6] sm:$0xff]  ;;  %v7693_v3 = vmov 1  }
   0xe   : > { %6699 = vmatprep.mubr.msk.f32.mxu0 %vm292_vm0, %v7755_v0  ;;  %7487 = vset.pattern.permute.xlu1 %v7692_v1  ;;  %vm289_vm1 = vcmask 7168   ;;  %v286_v4 = vld [vmem:[%s10170_s6 + $0x8] sm:$0xff]  ;;  %v7694_v8 = vmov 2   ;;  %v7788_v9 = vld [vmem:[%s10165_s1 + $0x18] sm:$0xff]  ;;  %v7695_v10 = vmov 0   ;;  %s7696_s15 = smov 33  }
   0xf   : > { %s10179_s25 = smov (!%p269_p3, %s5852_s25), 1  ;;  %7485 = vset.pattern.permute.xlu0 %v7693_v3  ;;  %418 = vperm.xlu1 %7487, %v285_v2   ;;  %vm6888_vm2 = vmpackc.low %vm289_vm1, %vm289_vm1  ;;  %v476_v13 = vld [vmem:[%s10166_s2 + $0x80] sm:$0xff]  ;;  %v477_v14 = vld [vmem:[%s10166_s2 + $0x88] sm:$0xff]  ;;  %vm382_vm3 = vcmask 269312   ;;  %s7697_s8 = smov 4   ;;  %vm454_vm4 = vcmask 31744  }
  0x10   : > { %398 = vperm.xlu0 %7485, %v285_v2   ;;  %s5973_s30 = sshll.u32 %s10179_s25, 7  ;;  %v460_v15 = vld [vmem:[%s10166_s2] sm:$0xff]  ;;  %v7803_v16 = vpack.c.bf16 %v477_v14, %v476_v13  ;;  %v461_v17 = vld [vmem:[%s10166_s2 + $0x8] sm:$0xff]  ;;  %v478_v18 = vld [vmem:[%s10166_s2 + $0x90] sm:$0xff]  ;;  %s7698_s9 = smov 66   ;;  %vm493_vm5 = vcmask 64512  }
  0x11   : > { %s7773_s12 = scalar_lea.vmem %s10164_s0, %s5973_s30  ;;  %v479_v19 = vld [vmem:[%s10166_s2 + $0x98] sm:$0xff]  ;;  %v7814_v20 = vpack.c.bf16 %v461_v17, %v460_v15  ;;  %v462_v22 = vld [vmem:[%s10166_s2 + $0x10] sm:$0xff]  ;;  %v480_v24 = vld [vmem:[%s10166_s2 + $0xa0] sm:$0xff]  ;;  %s7699_s10 = smov 70   ;;  %vm457_vm6 = vcmask 572416   ;;  %vm451_vm7 = vcmask 539648  }
  0x12   : > { %v7776_v5 = vld [vmem:[%s7773_s12] sm:$0xff]  ;;  %v7779_v6 = vld [vmem:[%s7773_s12 + $0x8] sm:$0xff]  ;;  %v7816_v21 = vpack.c.bf16 %v479_v19, %v478_v18  ;;  %v463_v23 = vld [vmem:[%s10166_s2 + $0x18] sm:$0xff]  ;;  %6894 = vmatprep.subr.bf16.mxu1 %v7803_v16  ;;  %s7700_s17 = smov 1   ;;  %s7701_s18 = smov 32   ;;  %vm1006_vm8 = vcmask 261120  }
  0x13   : > { %7488 = vset.pattern.permute.xlu1 %v7693_v3  ;;  %v6887_v7 = vpack.c.bf16 %v7779_v6, %v7776_v5  ;;  %v481_v25 = vld [vmem:[%s10166_s2 + $0xa8] sm:$0xff]  ;;  %6896 = vmatpush3.bf16.msra.mxu1 %v7814_v20  ;;  %v7832_v26 = vpack.c.bf16 %v463_v23, %v462_v22  ;;  %v464_v28 = vld [vmem:[%s10166_s2 + $0x20] sm:$0xff]  ;;  %v482_v30 = vld [vmem:[%s10166_s2 + $0xb0] sm:$0xff]  ;;  %s7702_s19 = smov 97   ;;  %s7703_s20 = smov 96  }
  0x14   : > { %7486 = vset.pattern.permute.xlu0 %v7694_v8  ;;  %402 = vperm.xlu1 %7488, %v286_v4   ;;  %v7835_v27 = vpack.c.bf16 %v481_v25, %v480_v24  ;;  %v465_v29 = vld [vmem:[%s10166_s2 + $0x28] sm:$0xff]  ;;  %v483_v31 = vld [vmem:[%s10166_s2 + $0xb8] sm:$0xff]  ;;  %v466_v34 = vld [vmem:[%s10166_s2 + $0x30] sm:$0xff]  ;;  %s8291_s23 = scalar_lea.vmem %s10171_s7, %s5973_s30 }
  0x15   : > { %408 = vperm.xlu0 %7486, %v285_v2   ;;  %6889 = vmatprep.subr.msk.bf16.mxu0 %vm6888_vm2, %v6887_v7  ;;  %v7850_v32 = vpack.c.bf16 %v465_v29, %v464_v28  ;;  %v7853_v33 = vpack.c.bf16 %v483_v31, %v482_v30  ;;  %v467_v35 = vld [vmem:[%s10166_s2 + $0x38] sm:$0xff]  ;;  %v484_v36 = vld [vmem:[%s10166_s2 + $0xc0] sm:$0xff]  ;;  %v485_v37 = vld [vmem:[%s10166_s2 + $0xc8] sm:$0xff] }
  0x16   : > { %6892 = vmatpush3.bf16.msk.msra.mxu0 %vm6888_vm2, %v6887_v7  ;;  %6898 = vmatprep.subr.bf16.mxu1 %v7816_v21  ;;  %v7868_v38 = vpack.c.bf16 %v467_v35, %v466_v34  ;;  %v7871_v39 = vpack.c.bf16 %v485_v37, %v484_v36  ;;  %v468_v40 = vld [vmem:[%s10166_s2 + $0x40] sm:$0xff]  ;;  %v469_v41 = vld [vmem:[%s10166_s2 + $0x48] sm:$0xff]  ;;  %v486_v45 = vld [vmem:[%s10166_s2 + $0xd0] sm:$0xff] }
  0x17   : > { %6900 = vmatpush3.bf16.msra.mxu1 %v7832_v26  ;;  %v7880_v42 = vpack.c.bf16 %v469_v41, %v468_v40  ;;  %v487_v46 = vld [vmem:[%s10166_s2 + $0xd8] sm:$0xff]  ;;  %v470_v48 = vld [vmem:[%s10166_s2 + $0x50] sm:$0xff]  ;;  %v488_v51 = vld [vmem:[%s10166_s2 + $0xe0] sm:$0xff] }
  0x18   : > { %7489 = vset.pattern.permute.xlu1 %v7694_v8  ;;  %6902 = vmatprep.subr.bf16.mxu1 %v7835_v27  ;;  %v7894_v47 = vpack.c.bf16 %v487_v46, %v486_v45  ;;  %v471_v49 = vld [vmem:[%s10166_s2 + $0x58] sm:$0xff]  ;;  %v489_v52 = vld [vmem:[%s10166_s2 + $0xe8] sm:$0xff]  ;;  %v472_v54 = vld [vmem:[%s10166_s2 + $0x60] sm:$0xff]  ;;  %v291_v8 = vsel %vm289_vm1, %v7779_v6, 0.0 }
  0x19   : > { %7490 = vset.pattern.permute.xlu0 %v7692_v1  ;;  %412 = vperm.xlu1 %7489, %v286_v4   ;;  %v7902_v50 = vpack.c.bf16 %v471_v49, %v470_v48  ;;  %v7912_v53 = vpack.c.bf16 %v489_v52, %v488_v51  ;;  %v473_v55 = vld [vmem:[%s10166_s2 + $0x68] sm:$0xff]  ;;  %v490_v59 = vld [vmem:[%s10166_s2 + $0xf0] sm:$0xff]  ;;  %v491_v60 = vld [vmem:[%s10166_s2 + $0xf8] sm:$0xff] }
  0x1a   : > { %6700 = vmatmul.mubr.msk.f32.vlgmr.msra.gmra.mrb[0].mxu0 %vm292_vm0, %v7788_v9  ;;  %422 = vperm.xlu0 %7490, %v286_v4   ;;  %v7922_v57 = vpack.c.bf16 %v473_v55, %v472_v54  ;;  %v7934_v61 = vpack.c.bf16 %v491_v60, %v490_v59  ;;  %v474_v62 = vld [vmem:[%s10166_s2 + $0x70] sm:$0xff]  ;;  %v475_v63 = vld [vmem:[%s10166_s2 + $0x78] sm:$0xff]  ;;  %v7993_v55 = vld [vmem:[%s10168_s4] sm:$0xff] }
  0x1b   : > { %6904 = vmatpush3.bf16.msra.mxu1 %v7850_v32 }
  0x1c   : > { %6906 = vmatprep.subr.bf16.mxu1 %v7853_v33 }
  0x1d   : > { %7492 = vset.pattern.permute.xlu1 %v7695_v10 }
  0x1e   : > { %7491 = vset.pattern.permute.xlu0 %v7695_v10 }
  0x1f   : > { %387 = vperm.xlu0 %7491, %v285_v2   ;;  %6908 = vmatpush3.bf16.msra.mxu1 %v7868_v38  ;;  %v7944_v2 = vpack.c.bf16 %v475_v63, %v474_v62 }
  0x20   : > { %6910 = vmatprep.subr.bf16.mxu1 %v7871_v39 }
  0x23   : > { %7573 = vset.pattern.permute.xlu0 %v7692_v1  ;;  %6912 = vmatpush3.bf16.msra.mxu1 %v7880_v42  ;;  %v290_v1 = vsel %vm289_vm1, %v7776_v5, 0.0 }
  0x24   : > { %6914 = vmatprep.subr.bf16.mxu1 %v7894_v47 }
  0x27   : > { %6916 = vmatpush3.bf16.msra.mxu1 %v7902_v50 }
  0x28   : > { %6918 = vmatprep.subr.bf16.mxu1 %v7912_v53 }
  0x2b   : > { %6920 = vmatpush3.bf16.msra.mxu1 %v7922_v57 }
  0x2c   : > { %6922 = vmatprep.subr.bf16.mxu1 %v7934_v61 }
  0x2f   : > { %6924 = vmatpush3.bf16.msra.mxu1 %v7944_v2 }
  0x8e   : > { %v7884_v43 = vpop.permute.xlu1 %418 }
  0x8f   : > { %v7924_v58 = vpop.permute.xlu0 %398 }
  0x93   : > { %v7886_v44 = vpop.permute.xlu1 %402 }
  0x98   : > { %v7920_v56 = vpop.permute.xlu1 %412 }
  0xed   : > { %v6701_v11 = vpop.f32.mrb[0].mxu0 }
  0xee   : > { %v365_v12 = vpop.f32.mrb[1].mxu0 }
  0xef   : > { %376 = vrot.lane.b32.xlu1 %v365_v12, %s7696_s15 }
  0xf3   : > { %378 = vrot.lane.b32.xlu1 %v6701_v11, %s7696_s15  ;;  %v7957_v11 = vld [vmem:[%s10166_s2 + $0x100] sm:$0xff] }
  0xf4   : > { %6702 = vmatprep.subr.mxu0 %v7957_v11 }
  0xf5   : > { %6703 = vmatpush3.msra.mxu0 %v7957_v11 }
  0xf7   : > { %392 = vperm.xlu1 %7492, %v286_v4   ;;  %v7948_v4 = vpop.permute.xlu0 %408 }
  0xfb   : > { %v7970_v22 = vpop.permute.xlu0 %422 }
  0xff   : > { %v7976_v25 = vpop.permute.xlu0 %387 }
 0x161   : > { %v377_v3 = vpop.permute.xlu1 %376 }
 0x162   : > { %v383_v7 = vsel %vm382_vm3, %v290_v1, %v377_v3  ;;  %v7999_v3 = vld [vmem:[%s10168_s4 + $0x8] sm:$0xff] }
 0x163   : > { %v415_v10 = vmul.f32 %v7948_v4, %v383_v7  ;;  %v405_v14 = vmul.f32 %v7924_v58, %v383_v7  ;;  %v425_v19 = vmul.f32 %v7884_v43, %v383_v7  ;;  %v395_v36 = vmul.f32 %v7976_v25, %v383_v7 }
 0x165   : > { %v379_v12 = vpop.permute.xlu1 %378  ;;  %437 = vrot.lane.b32.xlu0 %v415_v10, %s7697_s8 }
 0x166   : > { %v384_v13 = vsel %vm382_vm3, %v291_v8, %v379_v12 }
 0x167   : > { %v406_v15 = vmul.f32 %v7886_v44, %v384_v13  ;;  %v416_v17 = vmul.f32 %v7920_v56, %v384_v13  ;;  %v426_v23 = vmul.f32 %v7970_v22, %v384_v13 }
 0x169   : > { %439 = vrot.lane.b32.xlu0 %v416_v17, %s7697_s8  ;;  %v7493_v18 = vpack.i.bf16 %v406_v15, %v405_v14 }
 0x16b   : > { %7494 = vrot.lane.b32.xlu1 %v7493_v18, %s7698_s9 }
 0x16f   : > { %445 = vrot.lane.b32.xlu1 %v425_v19, %s7699_s10 }
 0x173   : > { %447 = vrot.lane.b32.xlu1 %v426_v23, %s7699_s10 }
 0x176   : > { %v7974_v24 = vpop.permute.xlu1 %392 }
 0x177   : > { %v396_v48 = vmul.f32 %v7974_v24, %v384_v13 }
 0x1d7   : > { %v438_v29 = vpop.permute.xlu0 %437 }
 0x1db   : > { %v440_v41 = vpop.permute.xlu0 %439 }
 0x1dd   : > { %v7495_v28 = vpop.permute.xlu1 %7494 }
 0x1de   : > { %v7496_v30 = vunpack.i.l.bf16 %v7495_v28  ;;  %v7497_v34 = vunpack.i.h.bf16 %v7495_v28 }
 0x1e0   : > { %v455_v31 = vsel %vm454_vm4, %v7496_v30, %v438_v29  ;;  %v452_v40 = vsel %vm451_vm7, %v395_v36, %v7496_v30  ;;  %v456_v46 = vsel %vm454_vm4, %v7497_v34, %v440_v41  ;;  %v453_v51 = vsel %vm451_vm7, %v396_v48, %v7497_v34 }
 0x1e1   : > { %v446_v35 = vpop.permute.xlu1 %445 }
 0x1e2   : > { %6704 = vmatprep.mubr.msk.f32.mxu0 %vm493_vm5, %v446_v35  ;;  %v458_v37 = vsel %vm457_vm6, %v455_v31, %v446_v35 }
 0x1e3   : > { %562 = vmatprep.mubr.f32.mxu1 %v458_v37 }
 0x1e4   : > { %563 = vmatmul.mubr.f32.vlgmr.msra.gmra.mrb[0].mxu1 %v452_v40 }
 0x1e5   : > { %v448_v45 = vpop.permute.xlu1 %447 }
 0x1e6   : > { %6705 = vmatmul.mubr.msk.f32.vlgmr.msra.gmra.mrb[2].mxu0 %vm493_vm5, %v448_v45  ;;  %v459_v49 = vsel %vm457_vm6, %v456_v46, %v448_v45  ;;  %v795_v46 = vld [vmem:[%s10167_s3] sm:$0xff] }
 0x1e7   : > { %567 = vmatprep.mubr.f32.mxu1 %v459_v49  ;;  %6711 = vmatprep.mubr.msk.f32.mxu0 %vm292_vm0, %v7755_v0  ;;  %v796_v49 = vld [vmem:[%s10167_s3 + $0x8] sm:$0xff] }
 0x1e8   : > { %568 = vmatmul.mubr.f32.gmra.mrb[2].mxu1 %v453_v51  ;;  %v813_v51 = vld [vmem:[%s10167_s3 + $0x90] sm:$0xff] }
 0x2b7   : > { %v6011_v52 = vpop.f32.mrb[0].mxu1 }
 0x2b8   : > { %v6012_v54 = vpop.f32.mrb[1].mxu1 }
 0x2b9   : > { %v6013_v59 = vadd.f32 %v6012_v54, %v6011_v52  ;;  %v6706_v60 = vpop.f32.mrb[2].mxu0  ;;  %v814_v52 = vld [vmem:[%s10167_s3 + $0x98] sm:$0xff]  ;;  %v8050_v54 = vpack.c.bf16 %v796_v49, %v795_v46 }
 0x2ba   : > { %v639_v62 = vpop.f32.mrb[3].mxu0 }
 0x2bb   : > { %v565_v63 = vadd.f32 %v6013_v59, %v7993_v55  ;;  %v6014_v1 = vpop.f32.mrb[2].mxu1  ;;  %v8052_v59 = vpack.c.bf16 %v814_v52, %v813_v51  ;;  %v805_v51 = vld [vmem:[%s10167_s3 + $0x50] sm:$0xff]  ;;  %v806_v52 = vld [vmem:[%s10167_s3 + $0x58] sm:$0xff] }
 0x2bc   : > { %v6015_v7 = vpop.f32.mrb[3].mxu1 }
 0x2bd   : > { %v640_v8 = vadd.f32 %v639_v62, %v565_v63  ;;  %v6016_v10 = vadd.f32 %v6015_v7, %v6014_v1  ;;  %v798_v62 = vld [vmem:[%s10167_s3 + $0x18] sm:$0xff]  ;;  %v815_v63 = vld [vmem:[%s10167_s3 + $0xa0] sm:$0xff]  ;;  %v816_v1 = vld [vmem:[%s10167_s3 + $0xa8] sm:$0xff] }
 0x2bf   : > { %v5867_v12 = vmul.f32 -1.442695, %v640_v8  ;;  %v570_v13 = vadd.f32 %v6016_v10, %v7999_v3  ;;  %v8071_v8 = vpack.c.bf16 %v816_v1, %v815_v63  ;;  %v799_v10 = vld [vmem:[%s10167_s3 + $0x20] sm:$0xff]  ;;  %v824_v63 = vld [vmem:[%s10167_s3 + $0xe8] sm:$0xff] }
 0x2c0   : > { %v807_v1 = vld [vmem:[%s10167_s3 + $0x60] sm:$0xff] }
 0x2c1   : > { %7574 = vpow2.f32 %v5867_v12  ;;  %v645_v14 = vadd.f32 %v6706_v60, %v570_v13  ;;  %v797_v60 = vld [vmem:[%s10167_s3 + $0x10] sm:$0xff]  ;;  %v800_v12 = vld [vmem:[%s10167_s3 + $0x28] sm:$0xff] }
 0x2c2   : > { %v8068_v7 = vpack.c.bf16 %v798_v62, %v797_v60  ;;  %v817_v13 = vld [vmem:[%s10167_s3 + $0xb0] sm:$0xff]  ;;  %v8134_v60 = vpack.c.bf16 %v806_v52, %v805_v51  ;;  %v823_v62 = vld [vmem:[%s10167_s3 + $0xe0] sm:$0xff] }
 0x2c3   : > { %v5868_v15 = vmul.f32 -1.442695, %v645_v14  ;;  %v818_v14 = vld [vmem:[%s10167_s3 + $0xb8] sm:$0xff] }
 0x2c5   : > { %7576 = vpow2.f32 %v5868_v15  ;;  %v8086_v15 = vpack.c.bf16 %v800_v12, %v799_v10  ;;  %v8147_v10 = vpack.c.bf16 %v824_v63, %v823_v62  ;;  %v808_v12 = vld [vmem:[%s10167_s3 + $0x68] sm:$0xff] }
 0x2cb   : > { %v7575_v17 = vpop.eup %7574 }
 0x2cc   : > { %v654_v18 = vadd.f32 1.0, %v7575_v17  ;;  %v8089_v17 = vpack.c.bf16 %v818_v14, %v817_v13  ;;  %v8152_v13 = vpack.c.bf16 %v808_v12, %v807_v1  ;;  %v825_v14 = vld [vmem:[%s10167_s3 + $0xf0] sm:$0xff] }
 0x2ce   : > { %7578 = vrcp.f32 %v654_v18  ;;  %v801_v18 = vld [vmem:[%s10167_s3 + $0x30] sm:$0xff] }
 0x2cf   : > { %v7577_v19 = vpop.eup %7576 }
 0x2d0   : > { %v655_v23 = vadd.f32 1.0, %v7577_v19  ;;  %v802_v19 = vld [vmem:[%s10167_s3 + $0x38] sm:$0xff] }
 0x2d2   : > { %7580 = vrcp.f32 %v655_v23  ;;  %v819_v23 = vld [vmem:[%s10167_s3 + $0xc0] sm:$0xff] }
 0x2d8   : > { %v8002_v28 = vpop.eup %7578 }
 0x2d9   : > { %v8005_v29 = vmul.f32 0.0, %v8002_v28 }
 0x2db   : > { %664 = vrot.lane.b32.xlu0 %v8005_v29, %s7700_s17 }
 0x2dc   : > { %v8009_v30 = vpop.eup %7580 }
 0x2dd   : > { %v8012_v31 = vmul.f32 0.0, %v8009_v30 }
 0x2df   : > { %666 = vrot.lane.b32.xlu1 %v8012_v31, %s7700_s17 }
 0x34d   : > { %v665_v34 = vpop.permute.xlu0 %664 }
 0x34e   : > { %v8018_v36 = vsel %vm289_vm1, %v7776_v5, %v665_v34  ;;  %v811_v5 = vld [vmem:[%s10167_s3 + $0x80] sm:$0xff]  ;;  %v820_v34 = vld [vmem:[%s10167_s3 + $0xc8] sm:$0xff] }
 0x351   : > { %v667_v35 = vpop.permute.xlu1 %666 }
 0x352   : > { %v8022_v37 = vsel %vm289_vm1, %v7779_v6, %v667_v35  ;;  %v812_v6 = vld [vmem:[%s10167_s3 + $0x88] sm:$0xff]  ;;  %v8104_v35 = vpack.c.bf16 %v802_v19, %v801_v18  ;;  %v826_v18 = vld [vmem:[%s10167_s3 + $0xf8] sm:$0xff] }
 0x353   : > { %v6925_v40 = vpack.c.bf16 %v8022_v37, %v8018_v36  ;;  %v8039_v48 = vpack.c.bf16 %v812_v6, %v811_v5  ;;  %v821_v5 = vld [vmem:[%s10167_s3 + $0xd0] sm:$0xff]  ;;  %v822_v6 = vld [vmem:[%s10167_s3 + $0xd8] sm:$0xff]  ;;  %v8162_v19 = vpack.c.bf16 %v826_v18, %v825_v14 }
 0x354   : > { %v8125_v49 = vpack.c.bf16 %v822_v6, %v821_v5  ;;  %v8177_v5 = vld [vmem:[%s10167_s3 + $0x100] sm:$0xff] }
 0x355   : > { %6926 = vmatprep.subr.bf16.mxu0 %v6925_v40  ;;  %6714 = vmatprep.subr.mxu1 %v8177_v5 }
 0x356   : > { %6928 = vmatpush3.bf16.msra.mxu0 %v6925_v40  ;;  %v8107_v40 = vpack.c.bf16 %v820_v34, %v819_v23  ;;  %v809_v23 = vld [vmem:[%s10167_s3 + $0x70] sm:$0xff]  ;;  %v810_v34 = vld [vmem:[%s10167_s3 + $0x78] sm:$0xff]  ;;  %6715 = vmatpush3.msra.mxu1 %v8177_v5 }
 0x357   : > { %6930 = vmatprep.subr.bf16.mxu0 %v8039_v48 }
 0x359   : > { %6712 = vmatmul.mubr.msk.f32.vlgmr.msra.gmra.mrb[4].mxu0 %vm292_vm0, %v7788_v9 }
 0x35a   : > { %6932 = vmatpush3.bf16.msra.mxu0 %v8050_v54 }
 0x35b   : > { %6934 = vmatprep.subr.bf16.mxu0 %v8052_v59 }
 0x35e   : > { %6936 = vmatpush3.bf16.msra.mxu0 %v8068_v7 }
 0x35f   : > { %6938 = vmatprep.subr.bf16.mxu0 %v8071_v8 }
 0x362   : > { %6940 = vmatpush3.bf16.msra.mxu0 %v8086_v15 }
 0x363   : > { %6942 = vmatprep.subr.bf16.mxu0 %v8089_v17 }
 0x366   : > { %6944 = vmatpush3.bf16.msra.mxu0 %v8104_v35 }
 0x367   : > { %6946 = vmatprep.subr.bf16.mxu0 %v8107_v40 }
 0x42c   : > { %v6713_v41 = vpop.f32.mrb[4].mxu0 }
 0x42d   : > { %751 = vrot.lane.b32.xlu1 %v6713_v41, %s7696_s15  ;;  %v738_v45 = vpop.f32.mrb[5].mxu0  ;;  %v803_v41 = vld [vmem:[%s10167_s3 + $0x40] sm:$0xff] }
 0x42e   : > { %749 = vrot.lane.b32.xlu0 %v738_v45, %s7696_s15  ;;  %v804_v45 = vld [vmem:[%s10167_s3 + $0x48] sm:$0xff] }
 0x42f   : > { %v8122_v46 = vpack.c.bf16 %v804_v45, %v803_v41  ;;  %v8170_v41 = vpack.c.bf16 %v810_v34, %v809_v23 }
 0x431   : > { %6948 = vmatpush3.bf16.msra.mxu0 %v8122_v46 }
 0x432   : > { %6950 = vmatprep.subr.bf16.mxu0 %v8125_v49 }
 0x435   : > { %6952 = vmatpush3.bf16.msra.mxu0 %v8134_v60 }
 0x436   : > { %6954 = vmatprep.subr.bf16.mxu0 %v8147_v10 }
 0x439   : > { %6956 = vmatpush3.bf16.msra.mxu0 %v8152_v13 }
 0x43a   : > { %6958 = vmatprep.subr.bf16.mxu0 %v8162_v19 }
 0x43d   : > { %6960 = vmatpush3.bf16.msra.mxu0 %v8170_v41 }
 0x43e   : > { %6966 = vmatprep.subr.bf16.mxu0 %v7803_v16 }
 0x49f   : > { %v752_v45 = vpop.permute.xlu1 %751 }
 0x4a0   : > { %v756_v6 = vsel %vm382_vm3, %v8022_v37, %v752_v45  ;;  %v750_v51 = vpop.permute.xlu0 %749 }
 0x4a1   : > { %v760_v52 = vmul.f32 %v756_v6, %v7886_v44  ;;  %v755_v62 = vsel %vm382_vm3, %v8018_v36, %v750_v51  ;;  %v762_v37 = vmul.f32 %v756_v6, %v7920_v56  ;;  %v764_v36 = vmul.f32 %v756_v6, %v7970_v22 }
 0x4a2   : > { %v759_v63 = vmul.f32 %v755_v62, %v7924_v58  ;;  %v761_v1 = vmul.f32 %v755_v62, %v7948_v4  ;;  %v763_v12 = vmul.f32 %v755_v62, %v7884_v43  ;;  %v757_v45 = vmul.f32 %v755_v62, %v7976_v25 }
 0x4a4   : > { %775 = vrot.lane.b32.xlu1 %v761_v1, %s7697_s8  ;;  %v7498_v16 = vpack.i.bf16 %v760_v52, %v759_v63 }
 0x4a6   : > { %7499 = vrot.lane.b32.xlu0 %v7498_v16, %s7698_s9 }
 0x4a8   : > { %777 = vrot.lane.b32.xlu1 %v762_v37, %s7697_s8  ;;  %v758_v37 = vmul.f32 %v756_v6, %v7974_v24 }
 0x4aa   : > { %783 = vrot.lane.b32.xlu0 %v763_v12, %s7699_s10 }
 0x4ae   : > { %785 = vrot.lane.b32.xlu0 %v764_v36, %s7699_s10 }
 0x516   : > { %v776_v14 = vpop.permute.xlu1 %775 }
 0x518   : > { %v7500_v18 = vpop.permute.xlu0 %7499 }
 0x519   : > { %v7501_v23 = vunpack.i.l.bf16 %v7500_v18  ;;  %v7502_v51 = vunpack.i.h.bf16 %v7500_v18  ;;  %v984_v18 = vsub.f32 1.0, %v8002_v28  ;;  %v8252_v28 = vld [vmem:[%s7773_s12 + $0x10] sm:$0xff] }
 0x51a   : > { %v778_v63 = vpop.permute.xlu1 %777 }
 0x51b   : > { %v791_v34 = vsel %vm454_vm4, %v7501_v23, %v776_v14  ;;  %v789_v16 = vsel %vm451_vm7, %v757_v45, %v7501_v23  ;;  %v792_v12 = vsel %vm454_vm4, %v7502_v51, %v778_v63  ;;  %v790_v14 = vsel %vm451_vm7, %v758_v37, %v7502_v51  ;;  %v8255_v37 = vld [vmem:[%s7773_s12 + $0x18] sm:$0xff] }
 0x51c   : > { %v784_v52 = vpop.permute.xlu0 %783  ;;  %v985_v51 = vsub.f32 1.0, %v8009_v30 }
 0x51d   : > { %6716 = vmatprep.mubr.msk.f32.mxu1 %vm493_vm5, %v784_v52  ;;  %v793_v1 = vsel %vm457_vm6, %v791_v34, %v784_v52 }
 0x51e   : > { %896 = vmatprep.mubr.f32.mxu0 %v793_v1 }
 0x51f   : > { %897 = vmatmul.mubr.f32.vlgmr.msra.gmra.mrb[6].mxu0 %v789_v16 }
 0x520   : > { %v786_v36 = vpop.permute.xlu0 %785  ;;  %6968 = vmatpush3.bf16.msra.mxu0 %v7814_v20 }
 0x521   : > { %6717 = vmatmul.mubr.msk.f32.vlgmr.msra.gmra.mrb[4].mxu1 %vm493_vm5, %v786_v36  ;;  %v794_v62 = vsel %vm457_vm6, %v792_v12, %v786_v36  ;;  %6970 = vmatprep.subr.bf16.mxu0 %v7816_v21 }
 0x522   : > { %901 = vmatprep.mubr.f32.mxu0 %v794_v62  ;;  %6723 = vmatprep.mubr.msk.f32.mxu1 %vm292_vm0, %v7755_v0 }
 0x523   : > { %902 = vmatmul.mubr.f32.gmra.mrb[8].mxu0 %v790_v14 }
 0x524   : > { %6972 = vmatpush3.bf16.msra.mxu0 %v7832_v26  ;;  %v8228_v26 = vld [vmem:[%s10169_s5] sm:$0xff] }
 0x525   : > { %6974 = vmatprep.subr.bf16.mxu0 %v7835_v27 }
 0x528   : > { %6976 = vmatpush3.bf16.msra.mxu0 %v7850_v32 }
 0x529   : > { %6978 = vmatprep.subr.bf16.mxu0 %v7853_v33 }
 0x52c   : > { %6980 = vmatpush3.bf16.msra.mxu0 %v7868_v38 }
 0x52d   : > { %6982 = vmatprep.subr.bf16.mxu0 %v7871_v39 }
 0x530   : > { %6984 = vmatpush3.bf16.msra.mxu0 %v7880_v42  ;;  %v8234_v42 = vld [vmem:[%s10169_s5 + $0x8] sm:$0xff] }
 0x531   : > { %6986 = vmatprep.subr.bf16.mxu0 %v7894_v47 }
 0x534   : > { %6988 = vmatpush3.bf16.msra.mxu0 %v7902_v50 }
 0x535   : > { %6990 = vmatprep.subr.bf16.mxu0 %v7912_v53 }
 0x538   : > { %6992 = vmatpush3.bf16.msra.mxu0 %v7922_v57 }
 0x539   : > { %6994 = vmatprep.subr.bf16.mxu0 %v7934_v61 }
 0x53c   : > { %6996 = vmatpush3.bf16.msra.mxu0 %v7944_v2 }
 0x53d   : > { %6738 = vmatprep.subr.mxu0 %v8177_v5 }
 0x5f2   : > { %v6056_v20 = vpop.f32.mrb[6].mxu0 }
 0x5f3   : > { %v6057_v21 = vpop.f32.mrb[7].mxu0 }
 0x5f4   : > { %v6058_v27 = vadd.f32 %v6057_v21, %v6056_v20  ;;  %v6718_v32 = vpop.f32.mrb[4].mxu1 }
 0x5f5   : > { %v973_v33 = vpop.f32.mrb[5].mxu1 }
 0x5f6   : > { %v899_v38 = vadd.f32 %v6058_v27, %v8228_v26  ;;  %v6059_v39 = vpop.f32.mrb[8].mxu0 }
 0x5f7   : > { %v6060_v47 = vpop.f32.mrb[9].mxu0 }
 0x5f8   : > { %v974_v50 = vadd.f32 %v973_v33, %v899_v38  ;;  %v6061_v53 = vadd.f32 %v6060_v47, %v6059_v39 }
 0x5fa   : > { %7582 = vtanh.f32 %v974_v50  ;;  %v904_v57 = vadd.f32 %v6061_v53, %v8234_v42 }
 0x5fc   : > { %v979_v61 = vadd.f32 %v6718_v32, %v904_v57 }
 0x5fe   : > { %7584 = vtanh.f32 %v979_v61 }
 0x604   : > { %v7583_v2 = vpop.eup %7582 }
 0x605   : > { %988 = vrot.lane.b32.xlu1 %v7583_v2, %s7701_s18 }
 0x608   : > { %v7585_v6 = vpop.eup %7584 }
 0x609   : > { %990 = vrot.lane.b32.xlu0 %v7585_v6, %s7701_s18 }
 0x677   : > { %v989_v23 = vpop.permute.xlu1 %988 }
 0x678   : > { %v994_v34 = vmul.f32 %v989_v23, %v984_v18 }
 0x67a   : > { %v8241_v45 = vadd.f32 %v994_v34, %v8005_v29 }
 0x67b   : > { %v991_v52 = vpop.permute.xlu0 %990 }
 0x67c   : > { %v995_v63 = vmul.f32 %v991_v52, %v985_v51  ;;  %1012 = vrot.lane.b32.xlu1 %v8241_v45, %s7702_s19 }
 0x67e   : > { %v8247_v1 = vadd.f32 %v995_v63, %v8012_v31 }
 0x680   : > { %1014 = vrot.lane.b32.xlu0 %v8247_v1, %s7702_s19 }
 0x6ee   : > { %v1013_v16 = vpop.permute.xlu1 %1012 }
 0x6ef   : > { %v1018_v30 = vsel %vm289_vm1, %v8252_v28, %v1013_v16 }
 0x6f2   : > { %v1015_v29 = vpop.permute.xlu0 %1014 }
 0x6f3   : > { %v1019_v12 = vsel %vm289_vm1, %v8255_v37, %v1015_v29 }
 0x6f4   : > { %v6961_v36 = vpack.c.bf16 %v1019_v12, %v1018_v30 }
 0x6f6   : > { %6962 = vmatprep.subr.bf16.mxu1 %v6961_v36 }
 0x6f7   : > { %6964 = vmatpush3.bf16.msra.mxu1 %v6961_v36 }
 0x6f8   : > { %6726 = vmatprep.subr.mxu1 %v7957_v11 }
 0x6fa   : > { %6724 = vmatmul.mubr.msk.f32.vlgmr.msra.gmra.mrb[6].mxu1 %vm292_vm0, %v7788_v9 }
 0x6fb   : > { %6727 = vmatpush3.msra.mxu1 %v7957_v11 }
 0x7cd   : > { %v6725_v31 = vpop.f32.mrb[6].mxu1 }
 0x7ce   : > { %1099 = vrot.lane.b32.xlu0 %v6725_v31, %s7696_s15  ;;  %v1086_v62 = vpop.f32.mrb[7].mxu1 }
 0x7cf   : > { %1097 = vrot.lane.b32.xlu1 %v1086_v62, %s7696_s15 }
 0x840   : > { %v1100_v14 = vpop.permute.xlu0 %1099 }
 0x841   : > { %v1104_v20 = vsel %vm382_vm3, %v1019_v12, %v1100_v14  ;;  %v1098_v21 = vpop.permute.xlu1 %1097 }
 0x842   : > { %v1108_v27 = vmul.f32 %v1104_v20, %v7886_v44  ;;  %v1103_v32 = vsel %vm382_vm3, %v1018_v30, %v1098_v21  ;;  %v1110_v39 = vmul.f32 %v1104_v20, %v7920_v56  ;;  %v1112_v50 = vmul.f32 %v1104_v20, %v7970_v22 }
 0x843   : > { %v1107_v33 = vmul.f32 %v1103_v32, %v7924_v58  ;;  %v1109_v38 = vmul.f32 %v1103_v32, %v7948_v4  ;;  %v1111_v47 = vmul.f32 %v1103_v32, %v7884_v43  ;;  %v1105_v18 = vmul.f32 %v1103_v32, %v7976_v25 }
 0x844   : > { %v1106_v16 = vmul.f32 %v1104_v20, %v7974_v24 }
 0x845   : > { %1123 = vrot.lane.b32.xlu0 %v1109_v38, %s7697_s8  ;;  %v7503_v11 = vpack.i.bf16 %v1108_v27, %v1107_v33 }
 0x847   : > { %7504 = vrot.lane.b32.xlu1 %v7503_v11, %s7698_s9 }
 0x849   : > { %1125 = vrot.lane.b32.xlu0 %v1110_v39, %s7697_s8 }
 0x84b   : > { %1131 = vrot.lane.b32.xlu1 %v1111_v47, %s7699_s10 }
 0x84d   : > { %1000 = vrot.lane.b32.xlu0 %v8241_v45, %s7703_s20 }
 0x84f   : > { %1133 = vrot.lane.b32.xlu1 %v1112_v50, %s7699_s10 }
 0x853   : > { %1002 = vrot.lane.b32.xlu1 %v8247_v1, %s7703_s20 }
 0x8b7   : > { %v1124_v53 = vpop.permute.xlu0 %1123 }
 0x8b9   : > { %v7505_v57 = vpop.permute.xlu1 %7504 }
 0x8ba   : > { %v7506_v61 = vunpack.i.l.bf16 %v7505_v57  ;;  %v7507_v23 = vunpack.i.h.bf16 %v7505_v57 }
 0x8bb   : > { %v1126_v2 = vpop.permute.xlu0 %1125 }
 0x8bc   : > { %v1139_v6 = vsel %vm454_vm4, %v7506_v61, %v1124_v53  ;;  %v1137_v63 = vsel %vm451_vm7, %v1105_v18, %v7506_v61  ;;  %v1140_v29 = vsel %vm454_vm4, %v7507_v23, %v1126_v2  ;;  %v1138_v36 = vsel %vm451_vm7, %v1106_v16, %v7507_v23 }
 0x8bd   : > { %v1132_v34 = vpop.permute.xlu1 %1131 }
 0x8be   : > { %6728 = vmatprep.mubr.msk.f32.mxu1 %vm493_vm5, %v1132_v34  ;;  %v1141_v51 = vsel %vm457_vm6, %v1139_v6, %v1132_v34 }
 0x8bf   : > { %v1001_v52 = vpop.permute.xlu0 %1000  ;;  %1244 = vmatprep.mubr.f32.mxu0 %v1141_v51 }
 0x8c0   : > { %1007 = vst.msk [vmem:[%s8291_s23] sm:$0xff] %vm1006_vm8, %v1001_v52  ;;  %1245 = vmatmul.mubr.f32.vlgmr.msra.gmra.mrb[10].mxu0 %v1137_v63 }
 0x8c1   : > { %v1134_v30 = vpop.permute.xlu1 %1133  ;;  %6739 = vmatpush3.msra.mxu0 %v8177_v5 }
 0x8c2   : > { %6729 = vmatmul.mubr.msk.f32.vlgmr.msra.gmra.mrb[8].mxu1 %vm493_vm5, %v1134_v30  ;;  %v1142_v12 = vsel %vm457_vm6, %v1140_v29, %v1134_v30 }
 0x8c3   : > { %1249 = vmatprep.mubr.f32.mxu0 %v1142_v12  ;;  %6735 = vmatprep.mubr.msk.f32.mxu1 %vm292_vm0, %v7755_v0 }
 0x8c4   : > { %1250 = vmatmul.mubr.f32.gmra.mrb[12].mxu0 %v1138_v36 }
 0x8c5   : > { %v1003_v31 = vpop.permute.xlu1 %1002 }
 0x8c6   : > { %1008 = vst.msk [vmem:[%s8291_s23 + $0x8] sm:$0xff] %vm1006_vm8, %v1003_v31 }
 0x993   : > { %v6101_v62 = vpop.f32.mrb[10].mxu0 }
 0x994   : > { %v6102_v14 = vpop.f32.mrb[11].mxu0 }
 0x995   : > { %v6103_v20 = vadd.f32 %v6102_v14, %v6101_v62  ;;  %v6730_v21 = vpop.f32.mrb[8].mxu1 }
 0x996   : > { %v1321_v27 = vpop.f32.mrb[9].mxu1 }
 0x997   : > { %v1247_v5 = vadd.f32 %v6103_v20, %v7993_v55  ;;  %v6104_v32 = vpop.f32.mrb[12].mxu0 }
 0x998   : > { %v6105_v33 = vpop.f32.mrb[13].mxu0 }
 0x999   : > { %v1322_v38 = vadd.f32 %v1321_v27, %v1247_v5  ;;  %v6106_v11 = vadd.f32 %v6105_v33, %v6104_v32 }
 0x99b   : > { %v5879_v39 = vmul.f32 -1.442695, %v1322_v38  ;;  %v1252_v47 = vadd.f32 %v6106_v11, %v7999_v3 }
 0x99d   : > { %7586 = vpow2.f32 %v5879_v39  ;;  %v1327_v0 = vadd.f32 %v6730_v21, %v1252_v47  ;;  %v8368_v21 = vld [vmem:[%s10165_s1 + $0x10] sm:$0xff] }
 0x99f   : > { %v5880_v50 = vmul.f32 -1.442695, %v1327_v0 }
 0x9a1   : > { %7588 = vpow2.f32 %v5880_v50 }
 0x9a7   : > { %v7587_v53 = vpop.eup %7586 }
 0x9a8   : > { %v1336_v57 = vadd.f32 1.0, %v7587_v53 }
 0x9aa   : > { %7590 = vrcp.f32 %v1336_v57 }
 0x9ab   : > { %v7589_v61 = vpop.eup %7588 }
 0x9ac   : > { %v1337_v2 = vadd.f32 1.0, %v7589_v61 }
 0x9ae   : > { %7592 = vrcp.f32 %v1337_v2 }
 0x9b4   : > { %v8310_v6 = vpop.eup %7590 }
 0x9b5   : > { %v1342_v55 = vmul.f32 %v8310_v6, %v1001_v52 }
 0x9b7   : > { %1346 = vrot.lane.b32.xlu0 %v1342_v55, %s7700_s17  ;;  %v1668_v55 = vsub.f32 1.0, %v8310_v6 }
 0x9b8   : > { %v8314_v18 = vpop.eup %7592 }
 0x9b9   : > { %v1343_v3 = vmul.f32 %v8314_v18, %v1003_v31 }
 0x9bb   : > { %1348 = vrot.lane.b32.xlu1 %v1343_v3, %s7700_s17 }
 0xa29   : > { %v1347_v23 = vpop.permute.xlu0 %1346 }
 0xa2a   : > { %v1352_v51 = vsel %vm289_vm1, %v8252_v28, %v1347_v23  ;;  %v1666_v23 = vmul.f32 %v8310_v6, %v8241_v45  ;;  %v8394_v6 = vld [vmem:[%s7773_s12 + $0x28] sm:$0xff] }
 0xa2d   : > { %v1349_v34 = vpop.permute.xlu1 %1348 }
 0xa2e   : > { %v1353_v63 = vsel %vm289_vm1, %v8255_v37, %v1349_v34 }
 0xa2f   : > { %v6997_v16 = vpack.c.bf16 %v1353_v63, %v1352_v51 }
 0xa31   : > { %6998 = vmatprep.subr.bf16.mxu1 %v6997_v16 }
 0xa32   : > { %7000 = vmatpush3.bf16.msra.mxu1 %v6997_v16 }
 0xa33   : > { %7002 = vmatprep.subr.bf16.mxu1 %v8039_v48 }
 0xa35   : > { %6736 = vmatmul.mubr.msk.f32.vlgmr.msra.gmra.mrb[10].mxu1 %vm292_vm0, %v7788_v9 }
 0xa36   : > { %7004 = vmatpush3.bf16.msra.mxu1 %v8050_v54 }
 0xa37   : > { %7006 = vmatprep.subr.bf16.mxu1 %v8052_v59 }
 0xa3a   : > { %7008 = vmatpush3.bf16.msra.mxu1 %v8068_v7 }
 0xa3b   : > { %7010 = vmatprep.subr.bf16.mxu1 %v8071_v8 }
 0xa3e   : > { %7012 = vmatpush3.bf16.msra.mxu1 %v8086_v15 }
 0xa3f   : > { %7014 = vmatprep.subr.bf16.mxu1 %v8089_v17 }
 0xa42   : > { %7016 = vmatpush3.bf16.msra.mxu1 %v8104_v35 }
 0xa43   : > { %7018 = vmatprep.subr.bf16.mxu1 %v8107_v40 }
 0xa46   : > { %7020 = vmatpush3.bf16.msra.mxu1 %v8122_v46 }
 0xa47   : > { %7022 = vmatprep.subr.bf16.mxu1 %v8125_v49 }
 0xa4a   : > { %7024 = vmatpush3.bf16.msra.mxu1 %v8134_v60 }
 0xa4b   : > { %7026 = vmatprep.subr.bf16.mxu1 %v8147_v10 }
 0xa4e   : > { %7028 = vmatpush3.bf16.msra.mxu1 %v8152_v13 }
 0xa4f   : > { %7030 = vmatprep.subr.bf16.mxu1 %v8162_v19 }
 0xa52   : > { %7032 = vmatpush3.bf16.msra.mxu1 %v8170_v41 }
 0xb08   : > { %v6737_v9 = vpop.f32.mrb[10].mxu1 }
 0xb09   : > { %1433 = vrot.lane.b32.xlu1 %v6737_v9, %s7696_s15  ;;  %v1420_v48 = vpop.f32.mrb[11].mxu1  ;;  %v1667_v9 = vmul.f32 %v8314_v18, %v8247_v1 }
 0xb0a   : > { %1431 = vrot.lane.b32.xlu0 %v1420_v48, %s7696_s15 }
 0xb7b   : > { %v1434_v54 = vpop.permute.xlu1 %1433 }
 0xb7c   : > { %v1438_v59 = vsel %vm382_vm3, %v1353_v63, %v1434_v54  ;;  %v1432_v7 = vpop.permute.xlu0 %1431  ;;  %v1669_v63 = vsub.f32 1.0, %v8314_v18 }
 0xb7d   : > { %v1442_v8 = vmul.f32 %v1438_v59, %v7886_v44  ;;  %v1437_v15 = vsel %vm382_vm3, %v1352_v51, %v1432_v7  ;;  %v1444_v46 = vmul.f32 %v1438_v59, %v7920_v56  ;;  %v1446_v60 = vmul.f32 %v1438_v59, %v7970_v22 }
 0xb7e   : > { %v1441_v17 = vmul.f32 %v1437_v15, %v7924_v58  ;;  %v1443_v35 = vmul.f32 %v1437_v15, %v7948_v4  ;;  %v1445_v49 = vmul.f32 %v1437_v15, %v7884_v43  ;;  %v1439_v28 = vmul.f32 %v1437_v15, %v7976_v25  ;;  %v8409_v15 = vld [vmem:[%s10165_s1 + $0x18] sm:$0xff] }
 0xb7f   : > { %v1440_v36 = vmul.f32 %v1438_v59, %v7974_v24  ;;  %v8391_v59 = vld [vmem:[%s7773_s12 + $0x20] sm:$0xff] }
 0xb80   : > { %1457 = vrot.lane.b32.xlu1 %v1443_v35, %s7697_s8  ;;  %v7508_v40 = vpack.i.bf16 %v1442_v8, %v1441_v17 }
 0xb82   : > { %7509 = vrot.lane.b32.xlu0 %v7508_v40, %s7698_s9  ;;  %v1843_v40 = vld [vmem:[%s10166_s2 + $0x80] sm:$0xff] }
 0xb84   : > { %1459 = vrot.lane.b32.xlu1 %v1444_v46, %s7697_s8  ;;  %v1844_v46 = vld [vmem:[%s10166_s2 + $0x88] sm:$0xff] }
 0xb86   : > { %1465 = vrot.lane.b32.xlu0 %v1445_v49, %s7699_s10  ;;  %v1827_v49 = vld [vmem:[%s10166_s2] sm:$0xff] }
 0xb8a   : > { %1467 = vrot.lane.b32.xlu0 %v1446_v60, %s7699_s10  ;;  %v8424_v60 = vpack.c.bf16 %v1844_v46, %v1843_v40  ;;  %v1842_v40 = vld [vmem:[%s10166_s2 + $0x78] sm:$0xff] }
 0xb8c   : > { %7038 = vmatprep.subr.bf16.mxu1 %v8424_v60 }
 0xbf2   : > { %v1458_v10 = vpop.permute.xlu1 %1457 }
 0xbf4   : > { %v7510_v13 = vpop.permute.xlu0 %7509 }
 0xbf5   : > { %v7511_v19 = vunpack.i.l.bf16 %v7510_v13  ;;  %v7512_v37 = vunpack.i.h.bf16 %v7510_v13  ;;  %v1845_v13 = vld [vmem:[%s10166_s2 + $0x90] sm:$0xff] }
 0xbf6   : > { %v1460_v29 = vpop.permute.xlu1 %1459 }
 0xbf7   : > { %v1473_v41 = vsel %vm454_vm4, %v7511_v19, %v1458_v10  ;;  %v1471_v12 = vsel %vm451_vm7, %v1439_v28, %v7511_v19  ;;  %v1474_v31 = vsel %vm454_vm4, %v7512_v37, %v1460_v29  ;;  %v1472_v20 = vsel %vm451_vm7, %v1440_v36, %v7512_v37  ;;  %v1828_v10 = vld [vmem:[%s10166_s2 + $0x8] sm:$0xff]  ;;  %v1846_v19 = vld [vmem:[%s10166_s2 + $0x98] sm:$0xff]  ;;  %v1829_v37 = vld [vmem:[%s10166_s2 + $0x10] sm:$0xff] }
 0xbf8   : > { %v1466_v52 = vpop.permute.xlu0 %1465  ;;  %v8437_v28 = vpack.c.bf16 %v1846_v19, %v1845_v13  ;;  %v1847_v29 = vld [vmem:[%s10166_s2 + $0xa0] sm:$0xff] }
 0xbf9   : > { %6740 = vmatprep.mubr.msk.f32.mxu0 %vm493_vm5, %v1466_v52  ;;  %v1475_v30 = vsel %vm457_vm6, %v1473_v41, %v1466_v52  ;;  %v8435_v41 = vpack.c.bf16 %v1828_v10, %v1827_v49  ;;  %v1830_v52 = vld [vmem:[%s10166_s2 + $0x18] sm:$0xff]  ;;  %v8562_v10 = vld [vmem:[%s10166_s2 + $0x100] sm:$0xff] }
 0xbfa   : > { %1578 = vmatprep.mubr.f32.mxu1 %v1475_v30  ;;  %v1848_v30 = vld [vmem:[%s10166_s2 + $0xa8] sm:$0xff] }
 0xbfb   : > { %1579 = vmatmul.mubr.f32.vlgmr.msra.gmra.mrb[12].mxu1 %v1471_v12  ;;  %v8453_v12 = vpack.c.bf16 %v1830_v52, %v1829_v37  ;;  %v8456_v36 = vpack.c.bf16 %v1848_v30, %v1847_v29 }
 0xbfc   : > { %v1468_v62 = vpop.permute.xlu0 %1467  ;;  %7040 = vmatpush3.bf16.msra.mxu1 %v8435_v41 }
 0xbfd   : > { %6741 = vmatmul.mubr.msk.f32.vlgmr.msra.gmra.mrb[14].mxu0 %vm493_vm5, %v1468_v62  ;;  %v1476_v14 = vsel %vm457_vm6, %v1474_v31, %v1468_v62  ;;  %7042 = vmatprep.subr.bf16.mxu1 %v8437_v28  ;;  %v1831_v31 = vld [vmem:[%s10166_s2 + $0x20] sm:$0xff]  ;;  %v1832_v62 = vld [vmem:[%s10166_s2 + $0x28] sm:$0xff] }
 0xbfe   : > { %1583 = vmatprep.mubr.f32.mxu1 %v1476_v14  ;;  %6747 = vmatprep.mubr.msk.f32.mxu0 %vm292_vm0, %v8368_v21  ;;  %v1849_v14 = vld [vmem:[%s10166_s2 + $0xb0] sm:$0xff] }
 0xbff   : > { %1584 = vmatmul.mubr.f32.gmra.mrb[14].mxu1 %v1472_v20  ;;  %v1850_v20 = vld [vmem:[%s10166_s2 + $0xb8] sm:$0xff] }
 0xc00   : > { %7044 = vmatpush3.bf16.msra.mxu1 %v8453_v12 }
 0xc01   : > { %7046 = vmatprep.subr.bf16.mxu1 %v8456_v36 }
 0xcce   : > { %v6146_v27 = vpop.f32.mrb[12].mxu1 }
 0xccf   : > { %v6147_v5 = vpop.f32.mrb[13].mxu1 }
 0xcd0   : > { %v6148_v32 = vadd.f32 %v6147_v5, %v6146_v27  ;;  %v6742_v33 = vpop.f32.mrb[14].mxu0  ;;  %v8471_v27 = vpack.c.bf16 %v1832_v62, %v1831_v31  ;;  %v8474_v5 = vpack.c.bf16 %v1850_v20, %v1849_v14 }
 0xcd1   : > { %v1655_v38 = vpop.f32.mrb[15].mxu0 }
 0xcd2   : > { %v1581_v11 = vadd.f32 %v6148_v32, %v8228_v26  ;;  %v6149_v39 = vpop.f32.mrb[14].mxu1  ;;  %v1833_v32 = vld [vmem:[%s10166_s2 + $0x30] sm:$0xff]  ;;  %7048 = vmatpush3.bf16.msra.mxu1 %v8471_v27 }
 0xcd3   : > { %v6150_v47 = vpop.f32.mrb[15].mxu1  ;;  %7050 = vmatprep.subr.bf16.mxu1 %v8474_v5 }
 0xcd4   : > { %v1656_v0 = vadd.f32 %v1655_v38, %v1581_v11  ;;  %v6151_v50 = vadd.f32 %v6150_v47, %v6149_v39  ;;  %v1851_v38 = vld [vmem:[%s10166_s2 + $0xc0] sm:$0xff]  ;;  %v1852_v11 = vld [vmem:[%s10166_s2 + $0xc8] sm:$0xff] }
 0xcd5   : > { %v8492_v47 = vpack.c.bf16 %v1852_v11, %v1851_v38 }
 0xcd6   : > { %7594 = vtanh.f32 %v1656_v0  ;;  %v1586_v53 = vadd.f32 %v6151_v50, %v8234_v42  ;;  %v1835_v0 = vld [vmem:[%s10166_s2 + $0x40] sm:$0xff]  ;;  %v1836_v50 = vld [vmem:[%s10166_s2 + $0x48] sm:$0xff] }
 0xcd8   : > { %v1661_v57 = vadd.f32 %v6742_v33, %v1586_v53  ;;  %v1834_v33 = vld [vmem:[%s10166_s2 + $0x38] sm:$0xff]  ;;  %v1853_v53 = vld [vmem:[%s10166_s2 + $0xd0] sm:$0xff] }
 0xcd9   : > { %v8489_v39 = vpack.c.bf16 %v1834_v33, %v1833_v32 }
 0xcda   : > { %7596 = vtanh.f32 %v1661_v57  ;;  %v1854_v57 = vld [vmem:[%s10166_s2 + $0xd8] sm:$0xff] }
 0xcdb   : > { %7052 = vmatpush3.bf16.msra.mxu1 %v8489_v39 }
 0xcdc   : > { %7054 = vmatprep.subr.bf16.mxu1 %v8492_v47 }
 0xce0   : > { %v7595_v61 = vpop.eup %7594 }
 0xce1   : > { %1672 = vrot.lane.b32.xlu1 %v7595_v61, %s7701_s18  ;;  %v8507_v61 = vpack.c.bf16 %v1836_v50, %v1835_v0 }
 0xce3   : > { %7056 = vmatpush3.bf16.msra.mxu1 %v8507_v61 }
 0xce4   : > { %v7597_v2 = vpop.eup %7596 }
 0xce5   : > { %1674 = vrot.lane.b32.xlu0 %v7597_v2, %s7701_s18  ;;  %v8510_v2 = vpack.c.bf16 %v1854_v57, %v1853_v53 }
 0xce7   : > { %7058 = vmatprep.subr.bf16.mxu1 %v8510_v2 }
 0xd53   : > { %v1673_v3 = vpop.permute.xlu1 %1672 }
 0xd54   : > { %v1678_v34 = vmul.f32 %v1673_v3, %v1668_v55  ;;  %v1837_v55 = vld [vmem:[%s10166_s2 + $0x50] sm:$0xff]  ;;  %v1838_v3 = vld [vmem:[%s10166_s2 + $0x58] sm:$0xff] }
 0xd56   : > { %v8379_v51 = vadd.f32 %v1678_v34, %v1666_v23  ;;  %v8519_v23 = vpack.c.bf16 %v1838_v3, %v1837_v55  ;;  %v1855_v34 = vld [vmem:[%s10166_s2 + $0xe0] sm:$0xff] }
 0xd57   : > { %v1675_v16 = vpop.permute.xlu0 %1674 }
 0xd58   : > { %v1679_v48 = vmul.f32 %v1675_v16, %v1669_v63  ;;  %1696 = vrot.lane.b32.xlu1 %v8379_v51, %s7702_s19  ;;  %7060 = vmatpush3.bf16.msra.mxu1 %v8519_v23  ;;  %v1856_v63 = vld [vmem:[%s10166_s2 + $0xe8] sm:$0xff]  ;;  %v1839_v16 = vld [vmem:[%s10166_s2 + $0x60] sm:$0xff] }
 0xd5a   : > { %v8386_v54 = vadd.f32 %v1679_v48, %v1667_v9  ;;  %v8532_v9 = vpack.c.bf16 %v1856_v63, %v1855_v34  ;;  %v1840_v48 = vld [vmem:[%s10166_s2 + $0x68] sm:$0xff] }
 0xd5c   : > { %1698 = vrot.lane.b32.xlu0 %v8386_v54, %s7702_s19  ;;  %7062 = vmatprep.subr.bf16.mxu1 %v8532_v9 }
 0xdca   : > { %v1697_v45 = vpop.permute.xlu1 %1696 }
 0xdcb   : > { %v8398_v8 = vsel %vm289_vm1, %v8391_v59, %v1697_v45  ;;  %v8537_v45 = vpack.c.bf16 %v1840_v48, %v1839_v16 }
 0xdcd   : > { %7064 = vmatpush3.bf16.msra.mxu1 %v8537_v45 }
 0xdce   : > { %v1699_v7 = vpop.permute.xlu0 %1698 }
 0xdcf   : > { %v8402_v1 = vsel %vm289_vm1, %v8394_v6, %v1699_v7  ;;  %v1857_v7 = vld [vmem:[%s10166_s2 + $0xf0] sm:$0xff] }
 0xdd0   : > { %v7033_v18 = vpack.c.bf16 %v8402_v1, %v8398_v8 }
 0xdd2   : > { %7034 = vmatprep.subr.bf16.mxu0 %v7033_v18 }
 0xdd3   : > { %7036 = vmatpush3.bf16.msra.mxu0 %v7033_v18  ;;  %v1858_v18 = vld [vmem:[%s10166_s2 + $0xf8] sm:$0xff] }
 0xdd4   : > { %6750 = vmatprep.subr.mxu0 %v8562_v10 }
 0xdd6   : > { %6748 = vmatmul.mubr.msk.f32.vlgmr.msra.gmra.mrb[16].mxu0 %vm292_vm0, %v8409_v15 }
 0xdd7   : > { %6751 = vmatpush3.msra.mxu0 %v8562_v10 }
 0xea9   : > { %v6749_v17 = vpop.f32.mrb[16].mxu0 }
 0xeaa   : > { %1783 = vrot.lane.b32.xlu0 %v6749_v17, %s7696_s15  ;;  %v1770_v35 = vpop.f32.mrb[17].mxu0  ;;  %v8547_v17 = vpack.c.bf16 %v1858_v18, %v1857_v7 }
 0xeab   : > { %1781 = vrot.lane.b32.xlu1 %v1770_v35, %s7696_s15  ;;  %v1841_v35 = vld [vmem:[%s10166_s2 + $0x70] sm:$0xff] }
 0xeac   : > { %v8555_v46 = vpack.c.bf16 %v1842_v40, %v1841_v35  ;;  %7066 = vmatprep.subr.bf16.mxu1 %v8547_v17 }
 0xeae   : > { %7068 = vmatpush3.bf16.msra.mxu1 %v8555_v46 }
 0xf1c   : > { %v1784_v49 = vpop.permute.xlu0 %1783 }
 0xf1d   : > { %v1788_v13 = vsel %vm382_vm3, %v8402_v1, %v1784_v49  ;;  %v1782_v19 = vpop.permute.xlu1 %1781 }
 0xf1e   : > { %v1792_v37 = vmul.f32 %v1788_v13, %v7886_v44  ;;  %v1787_v52 = vsel %vm382_vm3, %v8398_v8, %v1782_v19  ;;  %v1794_v1 = vmul.f32 %v1788_v13, %v7920_v56  ;;  %v1796_v8 = vmul.f32 %v1788_v13, %v7970_v22  ;;  %v8604_v19 = vld [vmem:[%s10168_s4] sm:$0xff] }
 0xf1f   : > { %v1791_v29 = vmul.f32 %v1787_v52, %v7924_v58  ;;  %v1793_v30 = vmul.f32 %v1787_v52, %v7948_v4  ;;  %v1795_v62 = vmul.f32 %v1787_v52, %v7884_v43  ;;  %v1789_v11 = vmul.f32 %v1787_v52, %v7976_v25 }
 0xf20   : > { %v1790_v3 = vmul.f32 %v1788_v13, %v7974_v24 }
 0xf21   : > { %1807 = vrot.lane.b32.xlu0 %v1793_v30, %s7697_s8  ;;  %v7513_v31 = vpack.i.bf16 %v1792_v37, %v1791_v29 }
 0xf23   : > { %7514 = vrot.lane.b32.xlu1 %v7513_v31, %s7698_s9 }
 0xf25   : > { %1809 = vrot.lane.b32.xlu0 %v1794_v1, %s7697_s8 }
 0xf27   : > { %1815 = vrot.lane.b32.xlu1 %v1795_v62, %s7699_s10  ;;  %v8610_v62 = vld [vmem:[%s10168_s4 + $0x8] sm:$0xff] }
 0xf29   : > { %1684 = vrot.lane.b32.xlu0 %v8379_v51, %s7703_s20 }
 0xf2b   : > { %1817 = vrot.lane.b32.xlu1 %v1796_v8, %s7699_s10 }
 0xf2f   : > { %1686 = vrot.lane.b32.xlu1 %v8386_v54, %s7703_s20 }
 0xf93   : > { %v1808_v14 = vpop.permute.xlu0 %1807 }
 0xf95   : > { %v7515_v20 = vpop.permute.xlu1 %7514 }
 0xf96   : > { %v7516_v32 = vunpack.i.l.bf16 %v7515_v20  ;;  %v7517_v0 = vunpack.i.h.bf16 %v7515_v20 }
 0xf97   : > { %v1810_v33 = vpop.permute.xlu0 %1809 }
 0xf98   : > { %v1823_v38 = vsel %vm454_vm4, %v7516_v32, %v1808_v14  ;;  %v1821_v55 = vsel %vm451_vm7, %v1789_v11, %v7516_v32  ;;  %v1824_v34 = vsel %vm454_vm4, %v7517_v0, %v1810_v33  ;;  %v1822_v48 = vsel %vm451_vm7, %v1790_v3, %v7517_v0 }
 0xf99   : > { %v1816_v50 = vpop.permute.xlu1 %1815 }
 0xf9a   : > { %6752 = vmatprep.mubr.msk.f32.mxu0 %vm493_vm5, %v1816_v50  ;;  %v1825_v53 = vsel %vm457_vm6, %v1823_v38, %v1816_v50 }
 0xf9b   : > { %v1685_v57 = vpop.permute.xlu0 %1684  ;;  %1928 = vmatprep.mubr.f32.mxu1 %v1825_v53 }
 0xf9c   : > { %5885 = vst.msk [vmem:[%s8291_s23 + $0x10] sm:$0xff] %vm1006_vm8, %v1685_v57  ;;  %1929 = vmatmul.mubr.f32.vlgmr.msra.gmra.mrb[16].mxu1 %v1821_v55 }
 0xf9d   : > { %v1818_v63 = vpop.permute.xlu1 %1817 }
 0xf9e   : > { %6753 = vmatmul.mubr.msk.f32.vlgmr.msra.gmra.mrb[18].mxu0 %vm493_vm5, %v1818_v63  ;;  %v1826_v16 = vsel %vm457_vm6, %v1824_v34, %v1818_v63 }
 0xf9f   : > { %1933 = vmatprep.mubr.f32.mxu1 %v1826_v16  ;;  %6759 = vmatprep.mubr.msk.f32.mxu0 %vm292_vm0, %v8368_v21 }
 0xfa0   : > { %1934 = vmatmul.mubr.f32.gmra.mrb[18].mxu1 %v1822_v48 }
 0xfa1   : > { %v1687_v7 = vpop.permute.xlu1 %1686 }
 0xfa2   : > { %5886 = vst.msk [vmem:[%s8291_s23 + $0x18] sm:$0xff] %vm1006_vm8, %v1687_v7 }
0x106f   : > { %v6191_v18 = vpop.f32.mrb[16].mxu1 }
0x1070   : > { %v6192_v35 = vpop.f32.mrb[17].mxu1 }
0x1071   : > { %v6193_v40 = vadd.f32 %v6192_v35, %v6191_v18  ;;  %v6754_v49 = vpop.f32.mrb[18].mxu0  ;;  %v2161_v18 = vld [vmem:[%s10167_s3] sm:$0xff] }
0x1072   : > { %v2005_v13 = vpop.f32.mrb[19].mxu0 }
0x1073   : > { %v1931_v37 = vadd.f32 %v8604_v19, %v6193_v40  ;;  %v6194_v52 = vpop.f32.mrb[18].mxu1  ;;  %v2162_v40 = vld [vmem:[%s10167_s3 + $0x8] sm:$0xff] }
0x1074   : > { %v6195_v29 = vpop.f32.mrb[19].mxu1 }
0x1075   : > { %v2006_v30 = vadd.f32 %v2005_v13, %v1931_v37  ;;  %v6196_v31 = vadd.f32 %v6195_v29, %v6194_v52  ;;  %v2180_v13 = vld [vmem:[%s10167_s3 + $0x98] sm:$0xff]  ;;  %v8655_v37 = vpack.c.bf16 %v2162_v40, %v2161_v18  ;;  %v2163_v29 = vld [vmem:[%s10167_s3 + $0x10] sm:$0xff] }
0x1076   : > { %v2187_v18 = vld [vmem:[%s10167_s3 + $0xd0] sm:$0xff]  ;;  %v2188_v40 = vld [vmem:[%s10167_s3 + $0xd8] sm:$0xff] }
0x1077   : > { %v5893_v1 = vmul.f32 -1.442695, %v2006_v30  ;;  %v1936_v8 = vadd.f32 %v8610_v62, %v6196_v31  ;;  %v2164_v30 = vld [vmem:[%s10167_s3 + $0x18] sm:$0xff]  ;;  %v2181_v31 = vld [vmem:[%s10167_s3 + $0xa0] sm:$0xff] }
0x1079   : > { %7598 = vpow2.f32 %v5893_v1  ;;  %v2011_v14 = vadd.f32 %v6754_v49, %v1936_v8  ;;  %v2179_v49 = vld [vmem:[%s10167_s3 + $0x90] sm:$0xff]  ;;  %v2182_v1 = vld [vmem:[%s10167_s3 + $0xa8] sm:$0xff]  ;;  %v8673_v8 = vpack.c.bf16 %v2164_v30, %v2163_v29  ;;  %v2172_v30 = vld [vmem:[%s10167_s3 + $0x58] sm:$0xff] }
0x107a   : > { %v8657_v52 = vpack.c.bf16 %v2180_v13, %v2179_v49  ;;  %v8730_v13 = vpack.c.bf16 %v2188_v40, %v2187_v18  ;;  %v2171_v29 = vld [vmem:[%s10167_s3 + $0x50] sm:$0xff] }
0x107b   : > { %v5894_v20 = vmul.f32 -1.442695, %v2011_v14  ;;  %v8676_v14 = vpack.c.bf16 %v2182_v1, %v2181_v31  ;;  %v8739_v31 = vpack.c.bf16 %v2172_v30, %v2171_v29  ;;  %v2189_v1 = vld [vmem:[%s10167_s3 + $0xe0] sm:$0xff] }
0x107c   : > { %v8782_v29 = vld [vmem:[%s10167_s3 + $0x100] sm:$0xff] }
0x107d   : > { %7600 = vpow2.f32 %v5894_v20  ;;  %v2165_v20 = vld [vmem:[%s10167_s3 + $0x20] sm:$0xff]  ;;  %6762 = vmatprep.subr.mxu1 %v8782_v29 }
0x107e   : > { %6763 = vmatpush3.msra.mxu1 %v8782_v29 }
0x1083   : > { %v7599_v32 = vpop.eup %7598 }
0x1084   : > { %v2020_v33 = vadd.f32 1.0, %v7599_v32  ;;  %v2166_v32 = vld [vmem:[%s10167_s3 + $0x28] sm:$0xff] }
0x1086   : > { %7602 = vrcp.f32 %v2020_v33  ;;  %v2183_v33 = vld [vmem:[%s10167_s3 + $0xb0] sm:$0xff] }
0x1087   : > { %v7601_v38 = vpop.eup %7600 }
0x1088   : > { %v2021_v11 = vadd.f32 1.0, %v7601_v38  ;;  %v2184_v38 = vld [vmem:[%s10167_s3 + $0xb8] sm:$0xff] }
0x108a   : > { %7604 = vrcp.f32 %v2021_v11  ;;  %v8691_v11 = vpack.c.bf16 %v2166_v32, %v2165_v20  ;;  %v2190_v20 = vld [vmem:[%s10167_s3 + $0xe8] sm:$0xff]  ;;  %v2173_v32 = vld [vmem:[%s10167_s3 + $0x60] sm:$0xff] }
0x1090   : > { %v8613_v0 = vpop.eup %7602 }
0x1091   : > { %v2026_v50 = vmul.f32 %v8613_v0, %v1685_v57 }
0x1093   : > { %2030 = vrot.lane.b32.xlu0 %v2026_v50, %s7700_s17  ;;  %v8694_v50 = vpack.c.bf16 %v2184_v38, %v2183_v33  ;;  %v8752_v33 = vpack.c.bf16 %v2190_v20, %v2189_v1  ;;  %v2174_v38 = vld [vmem:[%s10167_s3 + $0x68] sm:$0xff] }
0x1094   : > { %v8617_v53 = vpop.eup %7604 }
0x1095   : > { %v2027_v55 = vmul.f32 %v8617_v53, %v1687_v7 }
0x1097   : > { %2032 = vrot.lane.b32.xlu1 %v2027_v55, %s7700_s17  ;;  %v2167_v55 = vld [vmem:[%s10167_s3 + $0x30] sm:$0xff] }
0x1105   : > { %v2031_v3 = vpop.permute.xlu0 %2030 }
0x1106   : > { %v8623_v63 = vsel %vm289_vm1, %v8391_v59, %v2031_v3  ;;  %v2177_v59 = vld [vmem:[%s10167_s3 + $0x80] sm:$0xff]  ;;  %v2168_v3 = vld [vmem:[%s10167_s3 + $0x38] sm:$0xff] }
0x1109   : > { %v2033_v34 = vpop.permute.xlu1 %2032 }
0x110a   : > { %v8627_v16 = vsel %vm289_vm1, %v8394_v6, %v2033_v34  ;;  %v2178_v6 = vld [vmem:[%s10167_s3 + $0x88] sm:$0xff]  ;;  %v2185_v34 = vld [vmem:[%s10167_s3 + $0xc0] sm:$0xff] }
0x110b   : > { %v7069_v57 = vpack.c.bf16 %v8627_v16, %v8623_v63  ;;  %v8644_v35 = vpack.c.bf16 %v2178_v6, %v2177_v59  ;;  %v2169_v59 = vld [vmem:[%s10167_s3 + $0x40] sm:$0xff]  ;;  %v2170_v6 = vld [vmem:[%s10167_s3 + $0x48] sm:$0xff] }
0x110c   : > { %v8727_v49 = vpack.c.bf16 %v2170_v6, %v2169_v59  ;;  %v2175_v59 = vld [vmem:[%s10167_s3 + $0x70] sm:$0xff]  ;;  %v2176_v6 = vld [vmem:[%s10167_s3 + $0x78] sm:$0xff] }
0x110d   : > { %7070 = vmatprep.subr.bf16.mxu0 %v7069_v57  ;;  %v8775_v18 = vpack.c.bf16 %v2176_v6, %v2175_v59 }
0x110e   : > { %7072 = vmatpush3.bf16.msra.mxu0 %v7069_v57  ;;  %v2186_v57 = vld [vmem:[%s10167_s3 + $0xc8] sm:$0xff] }
0x110f   : > { %7074 = vmatprep.subr.bf16.mxu0 %v8644_v35  ;;  %10175 = vst [vmem:[#allocation3_spill] sm:$0xff] %v8775_v18 }
0x1111   : > { %6760 = vmatmul.mubr.msk.f32.vlgmr.msra.gmra.mrb[20].mxu0 %vm292_vm0, %v8409_v15 }
0x1112   : > { %7076 = vmatpush3.bf16.msra.mxu0 %v8655_v37 }
0x1113   : > { %7078 = vmatprep.subr.bf16.mxu0 %v8657_v52 }
0x1116   : > { %7080 = vmatpush3.bf16.msra.mxu0 %v8673_v8 }
0x1117   : > { %7082 = vmatprep.subr.bf16.mxu0 %v8676_v14 }
0x111a   : > { %7084 = vmatpush3.bf16.msra.mxu0 %v8691_v11 }
0x111b   : > { %7086 = vmatprep.subr.bf16.mxu0 %v8694_v50 }
0x11e4   : > { %v6761_v48 = vpop.f32.mrb[20].mxu0 }
0x11e5   : > { %2117 = vrot.lane.b32.xlu1 %v6761_v48, %s7696_s15  ;;  %v2104_v7 = vpop.f32.mrb[21].mxu0  ;;  %v8709_v48 = vpack.c.bf16 %v2168_v3, %v2167_v55  ;;  %v8757_v55 = vpack.c.bf16 %v2174_v38, %v2173_v32  ;;  %v2191_v3 = vld [vmem:[%s10167_s3 + $0xf0] sm:$0xff] }
0x11e6   : > { %2115 = vrot.lane.b32.xlu0 %v2104_v7, %s7696_s15  ;;  %v8712_v7 = vpack.c.bf16 %v2186_v57, %v2185_v34  ;;  %v2192_v34 = vld [vmem:[%s10167_s3 + $0xf8] sm:$0xff] }
0x11e7   : > { %7088 = vmatpush3.bf16.msra.mxu0 %v8709_v48  ;;  %v8767_v57 = vpack.c.bf16 %v2192_v34, %v2191_v3 }
0x11e8   : > { %7090 = vmatprep.subr.bf16.mxu0 %v8712_v7 }
0x11e9   : > { %10174 = vst [vmem:[#allocation2_spill] sm:$0xff] %v8767_v57 }
0x11eb   : > { %7092 = vmatpush3.bf16.msra.mxu0 %v8727_v49 }
0x11ec   : > { %7094 = vmatprep.subr.bf16.mxu0 %v8730_v13 }
0x11ef   : > { %7096 = vmatpush3.bf16.msra.mxu0 %v8739_v31 }
0x11f0   : > { %7098 = vmatprep.subr.bf16.mxu0 %v8752_v33 }
0x11f3   : > { %7100 = vmatpush3.bf16.msra.mxu0 %v8757_v55 }
0x11f4   : > { %7102 = vmatprep.subr.bf16.mxu0 %v8767_v57 }
0x11f7   : > { %7104 = vmatpush3.bf16.msra.mxu0 %v8775_v18 }
0x11f8   : > { %7110 = vmatprep.subr.bf16.mxu0 %v8424_v60 }
0x1257   : > { %v2118_v40 = vpop.permute.xlu1 %2117 }
0x1258   : > { %v2122_v30 = vsel %vm382_vm3, %v8627_v16, %v2118_v40  ;;  %v2116_v1 = vpop.permute.xlu0 %2115 }
0x1259   : > { %v2126_v20 = vmul.f32 %v2122_v30, %v7886_v44  ;;  %v2121_v32 = vsel %vm382_vm3, %v8623_v63, %v2116_v1  ;;  %v2128_v16 = vmul.f32 %v2122_v30, %v7920_v56  ;;  %v2130_v63 = vmul.f32 %v2122_v30, %v7970_v22 }
0x125a   : > { %v2125_v38 = vmul.f32 %v2121_v32, %v7924_v58  ;;  %v2127_v3 = vmul.f32 %v2121_v32, %v7948_v4  ;;  %v2129_v34 = vmul.f32 %v2121_v32, %v7884_v43 }
0x125c   : > { %2141 = vrot.lane.b32.xlu1 %v2127_v3, %s7697_s8  ;;  %v7518_v60 = vpack.i.bf16 %v2126_v20, %v2125_v38  ;;  %v2123_v20 = vmul.f32 %v2121_v32, %v7976_v25 }
0x125e   : > { %7519 = vrot.lane.b32.xlu0 %v7518_v60, %s7698_s9 }
0x1260   : > { %2143 = vrot.lane.b32.xlu1 %v2128_v16, %s7697_s8 }
0x1262   : > { %2149 = vrot.lane.b32.xlu0 %v2129_v34, %s7699_s10 }
0x1266   : > { %2151 = vrot.lane.b32.xlu0 %v2130_v63, %s7699_s10  ;;  %v2124_v63 = vmul.f32 %v2122_v30, %v7974_v24 }
0x12ce   : > { %v2142_v59 = vpop.permute.xlu1 %2141 }
0x12d0   : > { %v7520_v6 = vpop.permute.xlu0 %7519 }
0x12d1   : > { %v7521_v40 = vunpack.i.l.bf16 %v7520_v6  ;;  %v7522_v38 = vunpack.i.h.bf16 %v7520_v6 }
0x12d2   : > { %v2144_v60 = vpop.permute.xlu1 %2143 }
0x12d3   : > { %v2157_v1 = vsel %vm454_vm4, %v7521_v40, %v2142_v59  ;;  %v2155_v34 = vsel %vm451_vm7, %v2123_v20, %v7521_v40  ;;  %v2158_v18 = vsel %vm454_vm4, %v7522_v38, %v2144_v60  ;;  %v2156_v59 = vsel %vm451_vm7, %v2124_v63, %v7522_v38  ;;  %v8849_v38 = vld [vmem:[%s7773_s12 + $0x30] sm:$0xff] }
0x12d4   : > { %v2150_v3 = vpop.permute.xlu0 %2149  ;;  %v2351_v40 = vmul.f32 %v8617_v53, %v8386_v54 }
0x12d5   : > { %6764 = vmatprep.mubr.msk.f32.mxu1 %vm493_vm5, %v2150_v3  ;;  %v2159_v16 = vsel %vm457_vm6, %v2157_v1, %v2150_v3 }
0x12d6   : > { %2262 = vmatprep.mubr.f32.mxu0 %v2159_v16 }
0x12d7   : > { %2263 = vmatmul.mubr.f32.vlgmr.msra.gmra.mrb[22].mxu0 %v2155_v34 }
0x12d8   : > { %v2152_v57 = vpop.permute.xlu0 %2151  ;;  %7112 = vmatpush3.bf16.msra.mxu0 %v8435_v41 }
0x12d9   : > { %6765 = vmatmul.mubr.msk.f32.vlgmr.msra.gmra.mrb[20].mxu1 %vm493_vm5, %v2152_v57  ;;  %v2160_v32 = vsel %vm457_vm6, %v2158_v18, %v2152_v57  ;;  %7114 = vmatprep.subr.bf16.mxu0 %v8437_v28  ;;  %v2350_v57 = vmul.f32 %v8613_v0, %v8379_v51 }
0x12da   : > { %2267 = vmatprep.mubr.f32.mxu0 %v2160_v32  ;;  %6771 = vmatprep.mubr.msk.f32.mxu1 %vm292_vm0, %v8368_v21 }
0x12db   : > { %2268 = vmatmul.mubr.f32.gmra.mrb[24].mxu0 %v2156_v59 }
0x12dc   : > { %7116 = vmatpush3.bf16.msra.mxu0 %v8453_v12 }
0x12dd   : > { %7118 = vmatprep.subr.bf16.mxu0 %v8456_v36 }
0x12e0   : > { %7120 = vmatpush3.bf16.msra.mxu0 %v8471_v27 }
0x12e1   : > { %7122 = vmatprep.subr.bf16.mxu0 %v8474_v5 }
0x12e4   : > { %7124 = vmatpush3.bf16.msra.mxu0 %v8489_v39 }
0x12e5   : > { %7126 = vmatprep.subr.bf16.mxu0 %v8492_v47 }
0x12e8   : > { %7128 = vmatpush3.bf16.msra.mxu0 %v8507_v61 }
0x12e9   : > { %7130 = vmatprep.subr.bf16.mxu0 %v8510_v2 }
0x12ec   : > { %7132 = vmatpush3.bf16.msra.mxu0 %v8519_v23 }
0x12ed   : > { %7134 = vmatprep.subr.bf16.mxu0 %v8532_v9 }
0x12f0   : > { %7136 = vmatpush3.bf16.msra.mxu0 %v8537_v45 }
0x12f1   : > { %7138 = vmatprep.subr.bf16.mxu0 %v8547_v17 }
0x12f4   : > { %7140 = vmatpush3.bf16.msra.mxu0 %v8555_v46  ;;  %v2352_v46 = vsub.f32 1.0, %v8613_v0  ;;  %v8852_v0 = vld [vmem:[%s7773_s12 + $0x38] sm:$0xff] }
0x12f5   : > { %6786 = vmatprep.subr.mxu0 %v8782_v29 }
0x13aa   : > { %v6236_v41 = vpop.f32.mrb[22].mxu0 }
0x13ab   : > { %v6237_v28 = vpop.f32.mrb[23].mxu0 }
0x13ac   : > { %v6238_v12 = vadd.f32 %v6237_v28, %v6236_v41  ;;  %v6766_v36 = vpop.f32.mrb[20].mxu1 }
0x13ad   : > { %v2339_v27 = vpop.f32.mrb[21].mxu1 }
0x13ae   : > { %v2265_v5 = vadd.f32 %v6238_v12, %v8228_v26  ;;  %v6239_v39 = vpop.f32.mrb[24].mxu0 }
0x13af   : > { %v6240_v47 = vpop.f32.mrb[25].mxu0 }
0x13b0   : > { %v2340_v61 = vadd.f32 %v2339_v27, %v2265_v5  ;;  %v6241_v2 = vadd.f32 %v6240_v47, %v6239_v39 }
0x13b2   : > { %7606 = vtanh.f32 %v2340_v61  ;;  %v2270_v23 = vadd.f32 %v6241_v2, %v8234_v42  ;;  %v2353_v42 = vsub.f32 1.0, %v8617_v53 }
0x13b4   : > { %v2345_v9 = vadd.f32 %v6766_v36, %v2270_v23 }
0x13b6   : > { %7608 = vtanh.f32 %v2345_v9 }
0x13bc   : > { %v7607_v45 = vpop.eup %7606 }
0x13bd   : > { %2356 = vrot.lane.b32.xlu1 %v7607_v45, %s7701_s18 }
0x13c0   : > { %v7609_v17 = vpop.eup %7608 }
0x13c1   : > { %2358 = vrot.lane.b32.xlu0 %v7609_v17, %s7701_s18 }
0x142f   : > { %v2357_v26 = vpop.permute.xlu1 %2356 }
0x1430   : > { %v2362_v18 = vmul.f32 %v2357_v26, %v2352_v46 }
0x1432   : > { %v8837_v30 = vadd.f32 %v2362_v18, %v2350_v57 }
0x1433   : > { %v2359_v6 = vpop.permute.xlu0 %2358 }
0x1434   : > { %v2363_v1 = vmul.f32 %v2359_v6, %v2353_v42  ;;  %2380 = vrot.lane.b32.xlu1 %v8837_v30, %s7702_s19 }
0x1436   : > { %v8844_v20 = vadd.f32 %v2363_v1, %v2351_v40 }
0x1438   : > { %2382 = vrot.lane.b32.xlu0 %v8844_v20, %s7702_s19 }
0x14a6   : > { %v2381_v51 = vpop.permute.xlu1 %2380 }
0x14a7   : > { %v2386_v60 = vsel %vm289_vm1, %v8849_v38, %v2381_v51 }
0x14aa   : > { %v2383_v3 = vpop.permute.xlu0 %2382 }
0x14ab   : > { %v2387_v54 = vsel %vm289_vm1, %v8852_v0, %v2383_v3 }
0x14ac   : > { %v7105_v53 = vpack.c.bf16 %v2387_v54, %v2386_v60 }
0x14ae   : > { %7106 = vmatprep.subr.bf16.mxu1 %v7105_v53 }
0x14af   : > { %7108 = vmatpush3.bf16.msra.mxu1 %v7105_v53 }
0x14b0   : > { %6774 = vmatprep.subr.mxu1 %v8562_v10 }
0x14b2   : > { %6772 = vmatmul.mubr.msk.f32.vlgmr.msra.gmra.mrb[22].mxu1 %vm292_vm0, %v8409_v15 }
0x14b3   : > { %6775 = vmatpush3.msra.mxu1 %v8562_v10 }
0x1585   : > { %v6773_v16 = vpop.f32.mrb[22].mxu1 }
0x1586   : > { %2467 = vrot.lane.b32.xlu0 %v6773_v16, %s7696_s15  ;;  %v2454_v34 = vpop.f32.mrb[23].mxu1 }
0x1587   : > { %2465 = vrot.lane.b32.xlu1 %v2454_v34, %s7696_s15 }
0x15f8   : > { %v2468_v63 = vpop.permute.xlu0 %2467 }
0x15f9   : > { %v2472_v32 = vsel %vm382_vm3, %v2387_v54, %v2468_v63  ;;  %v2466_v59 = vpop.permute.xlu1 %2465 }
0x15fa   : > { %v2476_v41 = vmul.f32 %v2472_v32, %v7886_v44  ;;  %v2471_v28 = vsel %vm382_vm3, %v2386_v60, %v2466_v59  ;;  %v2478_v27 = vmul.f32 %v2472_v32, %v7920_v56  ;;  %v2480_v39 = vmul.f32 %v2472_v32, %v7970_v22 }
0x15fb   : > { %v2475_v12 = vmul.f32 %v2471_v28, %v7924_v58  ;;  %v2477_v36 = vmul.f32 %v2471_v28, %v7948_v4  ;;  %v2479_v5 = vmul.f32 %v2471_v28, %v7884_v43  ;;  %v2473_v45 = vmul.f32 %v2471_v28, %v7976_v25 }
0x15fc   : > { %v2474_v42 = vmul.f32 %v2472_v32, %v7974_v24 }
0x15fd   : > { %2491 = vrot.lane.b32.xlu0 %v2477_v36, %s7697_s8  ;;  %v7523_v10 = vpack.i.bf16 %v2476_v41, %v2475_v12 }
0x15ff   : > { %7524 = vrot.lane.b32.xlu1 %v7523_v10, %s7698_s9 }
0x1601   : > { %2493 = vrot.lane.b32.xlu0 %v2478_v27, %s7697_s8 }
0x1603   : > { %2499 = vrot.lane.b32.xlu1 %v2479_v5, %s7699_s10 }
0x1605   : > { %2368 = vrot.lane.b32.xlu0 %v8837_v30, %s7703_s20 }
0x1607   : > { %2501 = vrot.lane.b32.xlu1 %v2480_v39, %s7699_s10 }
0x160b   : > { %2370 = vrot.lane.b32.xlu1 %v8844_v20, %s7703_s20 }
0x166f   : > { %v2492_v47 = vpop.permute.xlu0 %2491 }
0x1671   : > { %v7525_v61 = vpop.permute.xlu1 %7524 }
0x1672   : > { %v7526_v2 = vunpack.i.l.bf16 %v7525_v61  ;;  %v7527_v17 = vunpack.i.h.bf16 %v7525_v61 }
0x1673   : > { %v2494_v23 = vpop.permute.xlu0 %2493 }
0x1674   : > { %v2507_v9 = vsel %vm454_vm4, %v7526_v2, %v2492_v47  ;;  %v2505_v18 = vsel %vm451_vm7, %v2473_v45, %v7526_v2  ;;  %v2508_v6 = vsel %vm454_vm4, %v7527_v17, %v2494_v23  ;;  %v2506_v51 = vsel %vm451_vm7, %v2474_v42, %v7527_v17 }
0x1675   : > { %v2500_v46 = vpop.permute.xlu1 %2499 }
0x1676   : > { %6776 = vmatprep.mubr.msk.f32.mxu1 %vm493_vm5, %v2500_v46  ;;  %v2509_v26 = vsel %vm457_vm6, %v2507_v9, %v2500_v46 }
0x1677   : > { %v2369_v57 = vpop.permute.xlu0 %2368  ;;  %2612 = vmatprep.mubr.f32.mxu0 %v2509_v26 }
0x1678   : > { %5899 = vst.msk [vmem:[%s8291_s23 + $0x20] sm:$0xff] %vm1006_vm8, %v2369_v57  ;;  %2613 = vmatmul.mubr.f32.vlgmr.msra.gmra.mrb[26].mxu0 %v2505_v18 }
0x1679   : > { %v2502_v40 = vpop.permute.xlu1 %2501  ;;  %6787 = vmatpush3.msra.mxu0 %v8782_v29 }
0x167a   : > { %6777 = vmatmul.mubr.msk.f32.vlgmr.msra.gmra.mrb[24].mxu1 %vm493_vm5, %v2502_v40  ;;  %v2510_v1 = vsel %vm457_vm6, %v2508_v6, %v2502_v40 }
0x167b   : > { %2617 = vmatprep.mubr.f32.mxu0 %v2510_v1  ;;  %6783 = vmatprep.mubr.msk.f32.mxu1 %vm292_vm0, %v8368_v21 }
0x167c   : > { %2618 = vmatmul.mubr.f32.gmra.mrb[28].mxu0 %v2506_v51 }
0x167d   : > { %v2371_v3 = vpop.permute.xlu1 %2370 }
0x167e   : > { %5900 = vst.msk [vmem:[%s8291_s23 + $0x28] sm:$0xff] %vm1006_vm8, %v2371_v3 }
0x174b   : > { %v6281_v60 = vpop.f32.mrb[26].mxu0 }
0x174c   : > { %v6282_v54 = vpop.f32.mrb[27].mxu0 }
0x174d   : > { %v6283_v53 = vadd.f32 %v6282_v54, %v6281_v60  ;;  %v6778_v16 = vpop.f32.mrb[24].mxu1 }
0x174e   : > { %v2689_v34 = vpop.f32.mrb[25].mxu1 }
0x174f   : > { %v2615_v29 = vadd.f32 %v8604_v19, %v6283_v53  ;;  %v6284_v63 = vpop.f32.mrb[28].mxu0 }
0x1750   : > { %v6285_v32 = vpop.f32.mrb[29].mxu0 }
0x1751   : > { %v2690_v59 = vadd.f32 %v2689_v34, %v2615_v29  ;;  %v6286_v41 = vadd.f32 %v6285_v32, %v6284_v63 }
0x1753   : > { %v5907_v28 = vmul.f32 -1.442695, %v2690_v59  ;;  %v2620_v12 = vadd.f32 %v8610_v62, %v6286_v41 }
0x1755   : > { %7610 = vpow2.f32 %v5907_v28  ;;  %v2695_v36 = vadd.f32 %v6778_v16, %v2620_v12 }
0x1757   : > { %v5908_v10 = vmul.f32 -1.442695, %v2695_v36  ;;  %v8960_v36 = vld [vmem:[%s10169_s5] sm:$0xff] }
0x1759   : > { %7612 = vpow2.f32 %v5908_v10 }
0x175f   : > { %v7611_v27 = vpop.eup %7610 }
0x1760   : > { %v2704_v5 = vadd.f32 1.0, %v7611_v27 }
0x1762   : > { %7614 = vrcp.f32 %v2704_v5 }
0x1763   : > { %v7613_v39 = vpop.eup %7612 }
0x1764   : > { %v2705_v47 = vadd.f32 1.0, %v7613_v39 }
0x1766   : > { %7616 = vrcp.f32 %v2705_v47 }
0x176c   : > { %v8900_v61 = vpop.eup %7614 }
0x176d   : > { %v2710_v2 = vmul.f32 %v8900_v61, %v2369_v57 }
0x176f   : > { %2714 = vrot.lane.b32.xlu0 %v2710_v2, %s7700_s17 }
0x1770   : > { %v8904_v23 = vpop.eup %7616 }
0x1771   : > { %v2711_v9 = vmul.f32 %v8904_v23, %v2371_v3 }
0x1773   : > { %2716 = vrot.lane.b32.xlu1 %v2711_v9, %s7700_s17 }
0x17e1   : > { %v2715_v45 = vpop.permute.xlu0 %2714 }
0x17e2   : > { %v2720_v46 = vsel %vm289_vm1, %v8849_v38, %v2715_v45 }
0x17e5   : > { %v2717_v17 = vpop.permute.xlu1 %2716 }
0x17e6   : > { %v2721_v26 = vsel %vm289_vm1, %v8852_v0, %v2717_v17 }
0x17e7   : > { %v7141_v18 = vpack.c.bf16 %v2721_v26, %v2720_v46 }
0x17e9   : > { %7142 = vmatprep.subr.bf16.mxu1 %v7141_v18 }
0x17ea   : > { %7144 = vmatpush3.bf16.msra.mxu1 %v7141_v18  ;;  %v3034_v18 = vmul.f32 %v8900_v61, %v8837_v30 }
0x17eb   : > { %7146 = vmatprep.subr.bf16.mxu1 %v8644_v35  ;;  %v10176_v35 = vld [vmem:[#allocation2_spill] sm:$0xff] }
0x17ed   : > { %6784 = vmatmul.mubr.msk.f32.vlgmr.msra.gmra.mrb[26].mxu1 %vm292_vm0, %v8409_v15 }
0x17ee   : > { %7148 = vmatpush3.bf16.msra.mxu1 %v8655_v37  ;;  %v10177_v37 = vld [vmem:[#allocation3_spill] sm:$0xff] }
0x17ef   : > { %7150 = vmatprep.subr.bf16.mxu1 %v8657_v52 }
0x17f2   : > { %7152 = vmatpush3.bf16.msra.mxu1 %v8673_v8 }
0x17f3   : > { %7154 = vmatprep.subr.bf16.mxu1 %v8676_v14 }
0x17f6   : > { %7156 = vmatpush3.bf16.msra.mxu1 %v8691_v11 }
0x17f7   : > { %7158 = vmatprep.subr.bf16.mxu1 %v8694_v50 }
0x17fa   : > { %7160 = vmatpush3.bf16.msra.mxu1 %v8709_v48 }
0x17fb   : > { %7162 = vmatprep.subr.bf16.mxu1 %v8712_v7 }
0x17fe   : > { %7164 = vmatpush3.bf16.msra.mxu1 %v8727_v49 }
0x17ff   : > { %7166 = vmatprep.subr.bf16.mxu1 %v8730_v13 }
0x1802   : > { %7168 = vmatpush3.bf16.msra.mxu1 %v8739_v31 }
0x1803   : > { %7170 = vmatprep.subr.bf16.mxu1 %v8752_v33 }
0x1806   : > { %7172 = vmatpush3.bf16.msra.mxu1 %v8757_v55 }
0x1807   : > { %7174 = vmatprep.subr.bf16.mxu1 %v10176_v35 }
0x180a   : > { %7176 = vmatpush3.bf16.msra.mxu1 %v10177_v37 }
0x18c0   : > { %v6785_v52 = vpop.f32.mrb[26].mxu1 }
0x18c1   : > { %2801 = vrot.lane.b32.xlu1 %v6785_v52, %s7696_s15  ;;  %v2788_v8 = vpop.f32.mrb[27].mxu1  ;;  %v3037_v52 = vsub.f32 1.0, %v8904_v23 }
0x18c2   : > { %2799 = vrot.lane.b32.xlu0 %v2788_v8, %s7696_s15 }
0x1933   : > { %v2802_v14 = vpop.permute.xlu1 %2801 }
0x1934   : > { %v2806_v11 = vsel %vm382_vm3, %v2721_v26, %v2802_v14  ;;  %v2800_v50 = vpop.permute.xlu0 %2799  ;;  %v3035_v14 = vmul.f32 %v8904_v23, %v8844_v20 }
0x1935   : > { %v2810_v48 = vmul.f32 %v2806_v11, %v7886_v44  ;;  %v2805_v7 = vsel %vm382_vm3, %v2720_v46, %v2800_v50  ;;  %v2812_v33 = vmul.f32 %v2806_v11, %v7920_v56  ;;  %v2814_v38 = vmul.f32 %v2806_v11, %v7970_v22 }
0x1936   : > { %v2809_v49 = vmul.f32 %v2805_v7, %v7924_v58  ;;  %v2811_v13 = vmul.f32 %v2805_v7, %v7948_v4  ;;  %v2813_v55 = vmul.f32 %v2805_v7, %v7884_v43  ;;  %v2807_v40 = vmul.f32 %v2805_v7, %v7976_v25 }
0x1937   : > { %v2808_v53 = vmul.f32 %v2806_v11, %v7974_v24  ;;  %v3036_v46 = vsub.f32 1.0, %v8900_v61  ;;  %v8989_v61 = vld [vmem:[%s7773_s12 + $0x48] sm:$0xff] }
0x1938   : > { %2825 = vrot.lane.b32.xlu1 %v2811_v13, %s7697_s8  ;;  %v7528_v31 = vpack.i.bf16 %v2810_v48, %v2809_v49  ;;  %v8986_v48 = vld [vmem:[%s7773_s12 + $0x40] sm:$0xff] }
0x193a   : > { %7529 = vrot.lane.b32.xlu0 %v7528_v31, %s7698_s9 }
0x193c   : > { %2827 = vrot.lane.b32.xlu1 %v2812_v33, %s7697_s8  ;;  %v3211_v33 = vld [vmem:[%s10166_s2 + $0x80] sm:$0xff] }
0x193e   : > { %2833 = vrot.lane.b32.xlu0 %v2813_v55, %s7699_s10  ;;  %v3212_v55 = vld [vmem:[%s10166_s2 + $0x88] sm:$0xff] }
0x1942   : > { %2835 = vrot.lane.b32.xlu0 %v2814_v38, %s7699_s10  ;;  %v3195_v38 = vld [vmem:[%s10166_s2] sm:$0xff] }
0x19aa   : > { %v2826_v0 = vpop.permute.xlu1 %2825 }
0x19ac   : > { %v7530_v57 = vpop.permute.xlu0 %7529 }
0x19ad   : > { %v7531_v42 = vunpack.i.l.bf16 %v7530_v57  ;;  %v7532_v1 = vunpack.i.h.bf16 %v7530_v57  ;;  %v3213_v57 = vld [vmem:[%s10166_s2 + $0x90] sm:$0xff] }
0x19ae   : > { %v2828_v3 = vpop.permute.xlu1 %2827 }
0x19af   : > { %v2841_v6 = vsel %vm454_vm4, %v7531_v42, %v2826_v0  ;;  %v2839_v54 = vsel %vm451_vm7, %v2807_v40, %v7531_v42  ;;  %v2842_v16 = vsel %vm454_vm4, %v7532_v1, %v2828_v3  ;;  %v2840_v63 = vsel %vm451_vm7, %v2808_v53, %v7532_v1  ;;  %v3214_v42 = vld [vmem:[%s10166_s2 + $0x98] sm:$0xff]  ;;  %v3197_v1 = vld [vmem:[%s10166_s2 + $0x10] sm:$0xff]  ;;  %v3215_v3 = vld [vmem:[%s10166_s2 + $0xa0] sm:$0xff] }
0x19b0   : > { %v2834_v51 = vpop.permute.xlu0 %2833  ;;  %v9014_v0 = vpack.c.bf16 %v3212_v55, %v3211_v33  ;;  %v9027_v40 = vpack.c.bf16 %v3214_v42, %v3213_v57  ;;  %v3210_v33 = vld [vmem:[%s10166_s2 + $0x78] sm:$0xff] }
0x19b1   : > { %6788 = vmatprep.mubr.msk.f32.mxu0 %vm493_vm5, %v2834_v51  ;;  %v2843_v60 = vsel %vm457_vm6, %v2841_v6, %v2834_v51  ;;  %v3198_v51 = vld [vmem:[%s10166_s2 + $0x18] sm:$0xff] }
0x19b2   : > { %2946 = vmatprep.mubr.f32.mxu1 %v2843_v60  ;;  %7182 = vmatprep.subr.bf16.mxu1 %v9014_v0  ;;  %v3216_v60 = vld [vmem:[%s10166_s2 + $0xa8] sm:$0xff] }
0x19b3   : > { %2947 = vmatmul.mubr.f32.vlgmr.msra.gmra.mrb[28].mxu1 %v2839_v54  ;;  %v9043_v54 = vpack.c.bf16 %v3198_v51, %v3197_v1  ;;  %v9046_v53 = vpack.c.bf16 %v3216_v60, %v3215_v3 }
0x19b4   : > { %v2836_v34 = vpop.permute.xlu0 %2835 }
0x19b5   : > { %6789 = vmatmul.mubr.msk.f32.vlgmr.msra.gmra.mrb[30].mxu0 %vm493_vm5, %v2836_v34  ;;  %v2844_v29 = vsel %vm457_vm6, %v2842_v16, %v2836_v34  ;;  %v3199_v16 = vld [vmem:[%s10166_s2 + $0x20] sm:$0xff]  ;;  %v3200_v34 = vld [vmem:[%s10166_s2 + $0x28] sm:$0xff] }
0x19b6   : > { %2951 = vmatprep.mubr.f32.mxu1 %v2844_v29  ;;  %6795 = vmatprep.mubr.msk.f32.mxu0 %vm292_vm0, %v8368_v21  ;;  %v8966_v21 = vld [vmem:[%s10169_s5 + $0x8] sm:$0xff]  ;;  %v3217_v29 = vld [vmem:[%s10166_s2 + $0xb0] sm:$0xff] }
0x19b7   : > { %2952 = vmatmul.mubr.f32.gmra.mrb[30].mxu1 %v2840_v63  ;;  %v3218_v63 = vld [vmem:[%s10166_s2 + $0xb8] sm:$0xff] }
0x1a86   : > { %v6326_v32 = vpop.f32.mrb[28].mxu1 }
0x1a87   : > { %v6327_v59 = vpop.f32.mrb[29].mxu1 }
0x1a88   : > { %v6328_v41 = vadd.f32 %v6327_v59, %v6326_v32  ;;  %v6790_v28 = vpop.f32.mrb[30].mxu0  ;;  %v9061_v32 = vpack.c.bf16 %v3200_v34, %v3199_v16  ;;  %v9064_v59 = vpack.c.bf16 %v3218_v63, %v3217_v29 }
0x1a89   : > { %v3023_v12 = vpop.f32.mrb[31].mxu0 }
0x1a8a   : > { %v2949_v10 = vadd.f32 %v8960_v36, %v6328_v41  ;;  %v6329_v27 = vpop.f32.mrb[30].mxu1  ;;  %v3201_v41 = vld [vmem:[%s10166_s2 + $0x30] sm:$0xff] }
0x1a8b   : > { %v6330_v5 = vpop.f32.mrb[31].mxu1 }
0x1a8c   : > { %v3024_v39 = vadd.f32 %v3023_v12, %v2949_v10  ;;  %v6331_v47 = vadd.f32 %v6330_v5, %v6329_v27  ;;  %v3219_v12 = vld [vmem:[%s10166_s2 + $0xc0] sm:$0xff]  ;;  %v3220_v10 = vld [vmem:[%s10166_s2 + $0xc8] sm:$0xff] }
0x1a8d   : > { %v9082_v5 = vpack.c.bf16 %v3220_v10, %v3219_v12 }
0x1a8e   : > { %7618 = vtanh.f32 %v3024_v39  ;;  %v2954_v2 = vadd.f32 %v8966_v21, %v6331_v47  ;;  %v3203_v39 = vld [vmem:[%s10166_s2 + $0x40] sm:$0xff]  ;;  %v3204_v47 = vld [vmem:[%s10166_s2 + $0x48] sm:$0xff] }
0x1a90   : > { %v3029_v9 = vadd.f32 %v6790_v28, %v2954_v2  ;;  %v3202_v28 = vld [vmem:[%s10166_s2 + $0x38] sm:$0xff]  ;;  %v3221_v2 = vld [vmem:[%s10166_s2 + $0xd0] sm:$0xff] }
0x1a91   : > { %v9079_v27 = vpack.c.bf16 %v3202_v28, %v3201_v41 }
0x1a92   : > { %7620 = vtanh.f32 %v3029_v9  ;;  %v3222_v9 = vld [vmem:[%s10166_s2 + $0xd8] sm:$0xff] }
0x1a98   : > { %v7619_v45 = vpop.eup %7618 }
0x1a99   : > { %3040 = vrot.lane.b32.xlu1 %v7619_v45, %s7701_s18  ;;  %v9097_v45 = vpack.c.bf16 %v3204_v47, %v3203_v39 }
0x1a9c   : > { %v7621_v17 = vpop.eup %7620 }
0x1a9d   : > { %3042 = vrot.lane.b32.xlu0 %v7621_v17, %s7701_s18  ;;  %v9100_v17 = vpack.c.bf16 %v3222_v9, %v3221_v2 }
0x1b0b   : > { %v3041_v26 = vpop.permute.xlu1 %3040 }
0x1b0c   : > { %v3046_v35 = vmul.f32 %v3041_v26, %v3036_v46  ;;  %v3205_v46 = vld [vmem:[%s10166_s2 + $0x50] sm:$0xff]  ;;  %v3206_v26 = vld [vmem:[%s10166_s2 + $0x58] sm:$0xff] }
0x1b0e   : > { %v8974_v37 = vadd.f32 %v3046_v35, %v3034_v18  ;;  %v9109_v18 = vpack.c.bf16 %v3206_v26, %v3205_v46  ;;  %v3223_v35 = vld [vmem:[%s10166_s2 + $0xe0] sm:$0xff] }
0x1b0f   : > { %v3043_v8 = vpop.permute.xlu0 %3042 }
0x1b10   : > { %v3047_v11 = vmul.f32 %v3043_v8, %v3037_v52  ;;  %3064 = vrot.lane.b32.xlu1 %v8974_v37, %s7702_s19  ;;  %v3224_v52 = vld [vmem:[%s10166_s2 + $0xe8] sm:$0xff]  ;;  %v3207_v8 = vld [vmem:[%s10166_s2 + $0x60] sm:$0xff] }
0x1b12   : > { %v8981_v50 = vadd.f32 %v3047_v11, %v3035_v14  ;;  %v9122_v14 = vpack.c.bf16 %v3224_v52, %v3223_v35  ;;  %v3208_v11 = vld [vmem:[%s10166_s2 + $0x68] sm:$0xff] }
0x1b14   : > { %3066 = vrot.lane.b32.xlu0 %v8981_v50, %s7702_s19 }
0x1b82   : > { %v3065_v30 = vpop.permute.xlu1 %3064 }
0x1b83   : > { %v8993_v49 = vsel %vm289_vm1, %v8986_v48, %v3065_v30  ;;  %v9127_v30 = vpack.c.bf16 %v3208_v11, %v3207_v8 }
0x1b86   : > { %v3067_v7 = vpop.permute.xlu0 %3066 }
0x1b87   : > { %v8997_v20 = vsel %vm289_vm1, %v8989_v61, %v3067_v7  ;;  %v3225_v7 = vld [vmem:[%s10166_s2 + $0xf0] sm:$0xff] }
0x1b88   : > { %v7177_v23 = vpack.c.bf16 %v8997_v20, %v8993_v49 }
0x1b8a   : > { %7178 = vmatprep.subr.bf16.mxu0 %v7177_v23 }
0x1b8b   : > { %7180 = vmatpush3.bf16.msra.mxu0 %v7177_v23  ;;  %v3226_v23 = vld [vmem:[%s10166_s2 + $0xf8] sm:$0xff] }
0x1b8e   : > { %6796 = vmatmul.mubr.msk.f32.vlgmr.msra.gmra.mrb[32].mxu0 %vm292_vm0, %v8409_v15  ;;  %v3196_v15 = vld [vmem:[%s10166_s2 + $0x8] sm:$0xff] }
0x1b8f   : > { %v9025_v6 = vpack.c.bf16 %v3196_v15, %v3195_v38  ;;  %v9152_v15 = vld [vmem:[%s10166_s2 + $0x100] sm:$0xff] }
0x1b90   : > { %6798 = vmatprep.subr.mxu0 %v9152_v15 }
0x1b91   : > { %7184 = vmatpush3.bf16.msra.mxu1 %v9025_v6  ;;  %6799 = vmatpush3.msra.mxu0 %v9152_v15 }
0x1b92   : > { %7186 = vmatprep.subr.bf16.mxu1 %v9027_v40 }
0x1b95   : > { %7188 = vmatpush3.bf16.msra.mxu1 %v9043_v54 }
0x1b96   : > { %7190 = vmatprep.subr.bf16.mxu1 %v9046_v53 }
0x1b99   : > { %7192 = vmatpush3.bf16.msra.mxu1 %v9061_v32 }
0x1b9a   : > { %7194 = vmatprep.subr.bf16.mxu1 %v9064_v59 }
0x1b9d   : > { %7196 = vmatpush3.bf16.msra.mxu1 %v9079_v27 }
0x1b9e   : > { %7198 = vmatprep.subr.bf16.mxu1 %v9082_v5 }
0x1ba1   : > { %7200 = vmatpush3.bf16.msra.mxu1 %v9097_v45 }
0x1ba2   : > { %7202 = vmatprep.subr.bf16.mxu1 %v9100_v17 }
0x1ba5   : > { %7204 = vmatpush3.bf16.msra.mxu1 %v9109_v18 }
0x1ba6   : > { %7206 = vmatprep.subr.bf16.mxu1 %v9122_v14 }
0x1ba9   : > { %7208 = vmatpush3.bf16.msra.mxu1 %v9127_v30 }
0x1c61   : > { %v6797_v13 = vpop.f32.mrb[32].mxu0 }
0x1c62   : > { %3151 = vrot.lane.b32.xlu0 %v6797_v13, %s7696_s15  ;;  %v3138_v31 = vpop.f32.mrb[33].mxu0  ;;  %v9137_v13 = vpack.c.bf16 %v3226_v23, %v3225_v7  ;;  %v9190_v7 = vld [vmem:[%s10165_s1 + $0x10] sm:$0xff] }
0x1c63   : > { %3149 = vrot.lane.b32.xlu1 %v3138_v31, %s7696_s15  ;;  %v3209_v31 = vld [vmem:[%s10166_s2 + $0x70] sm:$0xff] }
0x1c64   : > { %v9145_v55 = vpack.c.bf16 %v3210_v33, %v3209_v31  ;;  %7210 = vmatprep.subr.bf16.mxu1 %v9137_v13 }
0x1c66   : > { %7212 = vmatpush3.bf16.msra.mxu1 %v9145_v55 }
0x1cd4   : > { %v3152_v38 = vpop.permute.xlu0 %3151 }
0x1cd5   : > { %v3156_v57 = vsel %vm382_vm3, %v8997_v20, %v3152_v38  ;;  %v3150_v42 = vpop.permute.xlu1 %3149 }
0x1cd6   : > { %v3160_v1 = vmul.f32 %v3156_v57, %v7886_v44  ;;  %v3155_v51 = vsel %vm382_vm3, %v8993_v49, %v3150_v42  ;;  %v3162_v20 = vmul.f32 %v3156_v57, %v7920_v56  ;;  %v3164_v49 = vmul.f32 %v3156_v57, %v7970_v22 }
0x1cd7   : > { %v3159_v3 = vmul.f32 %v3155_v51, %v7924_v58  ;;  %v3161_v60 = vmul.f32 %v3155_v51, %v7948_v4  ;;  %v3163_v34 = vmul.f32 %v3155_v51, %v7884_v43  ;;  %v3157_v10 = vmul.f32 %v3155_v51, %v7976_v25 }
0x1cd8   : > { %v3158_v26 = vmul.f32 %v3156_v57, %v7974_v24 }
0x1cd9   : > { %3175 = vrot.lane.b32.xlu0 %v3161_v60, %s7697_s8  ;;  %v7533_v16 = vpack.i.bf16 %v3160_v1, %v3159_v3 }
0x1cdb   : > { %7534 = vrot.lane.b32.xlu1 %v7533_v16, %s7698_s9 }
0x1cdd   : > { %3177 = vrot.lane.b32.xlu0 %v3162_v20, %s7697_s8 }
0x1cdf   : > { %3183 = vrot.lane.b32.xlu1 %v3163_v34, %s7699_s10 }
0x1ce1   : > { %3052 = vrot.lane.b32.xlu0 %v8974_v37, %s7703_s20 }
0x1ce3   : > { %3185 = vrot.lane.b32.xlu1 %v3164_v49, %s7699_s10 }
0x1ce7   : > { %3054 = vrot.lane.b32.xlu1 %v8981_v50, %s7703_s20 }
0x1d4b   : > { %v3176_v29 = vpop.permute.xlu0 %3175 }
0x1d4d   : > { %v7535_v63 = vpop.permute.xlu1 %7534 }
0x1d4e   : > { %v7536_v41 = vunpack.i.l.bf16 %v7535_v63  ;;  %v7537_v39 = vunpack.i.h.bf16 %v7535_v63 }
0x1d4f   : > { %v3178_v28 = vpop.permute.xlu0 %3177 }
0x1d50   : > { %v3191_v12 = vsel %vm454_vm4, %v7536_v41, %v3176_v29  ;;  %v3189_v46 = vsel %vm451_vm7, %v3157_v10, %v7536_v41  ;;  %v3192_v35 = vsel %vm454_vm4, %v7537_v39, %v3178_v28  ;;  %v3190_v11 = vsel %vm451_vm7, %v3158_v26, %v7537_v39 }
0x1d51   : > { %v3184_v47 = vpop.permute.xlu1 %3183 }
0x1d52   : > { %6800 = vmatprep.mubr.msk.f32.mxu0 %vm493_vm5, %v3184_v47  ;;  %v3193_v2 = vsel %vm457_vm6, %v3191_v12, %v3184_v47 }
0x1d53   : > { %v3053_v9 = vpop.permute.xlu0 %3052  ;;  %3296 = vmatprep.mubr.f32.mxu1 %v3193_v2 }
0x1d54   : > { %5913 = vst.msk [vmem:[%s8291_s23 + $0x30] sm:$0xff] %vm1006_vm8, %v3053_v9  ;;  %3297 = vmatmul.mubr.f32.vlgmr.msra.gmra.mrb[32].mxu1 %v3189_v46 }
0x1d55   : > { %v3186_v52 = vpop.permute.xlu1 %3185 }
0x1d56   : > { %6801 = vmatmul.mubr.msk.f32.vlgmr.msra.gmra.mrb[34].mxu0 %vm493_vm5, %v3186_v52  ;;  %v3194_v8 = vsel %vm457_vm6, %v3192_v35, %v3186_v52  ;;  %v9219_v35 = vld [vmem:[%s10165_s1 + $0x18] sm:$0xff] }
0x1d57   : > { %3301 = vmatprep.mubr.f32.mxu1 %v3194_v8  ;;  %6807 = vmatprep.mubr.msk.f32.mxu0 %vm292_vm0, %v9190_v7  ;;  %v3546_v8 = vld [vmem:[%s10167_s3 + $0x88] sm:$0xff] }
0x1d58   : > { %3302 = vmatmul.mubr.f32.gmra.mrb[34].mxu1 %v3190_v11  ;;  %v3529_v11 = vld [vmem:[%s10167_s3] sm:$0xff] }
0x1d59   : > { %v3055_v23 = vpop.permute.xlu1 %3054 }
0x1d5a   : > { %5914 = vst.msk [vmem:[%s8291_s23 + $0x38] sm:$0xff] %vm1006_vm8, %v3055_v23 }
0x1e27   : > { %v6371_v31 = vpop.f32.mrb[32].mxu1 }
0x1e28   : > { %v6372_v33 = vpop.f32.mrb[33].mxu1 }
0x1e29   : > { %v6373_v38 = vadd.f32 %v6372_v33, %v6371_v31  ;;  %v6802_v57 = vpop.f32.mrb[34].mxu0  ;;  %v3530_v31 = vld [vmem:[%s10167_s3 + $0x8] sm:$0xff]  ;;  %v3547_v33 = vld [vmem:[%s10167_s3 + $0x90] sm:$0xff] }
0x1e2a   : > { %v3373_v42 = vpop.f32.mrb[35].mxu0 }
0x1e2b   : > { %v3299_v1 = vadd.f32 %v8604_v19, %v6373_v38  ;;  %v6374_v51 = vpop.f32.mrb[34].mxu1  ;;  %v3548_v38 = vld [vmem:[%s10167_s3 + $0x98] sm:$0xff] }
0x1e2c   : > { %v6375_v3 = vpop.f32.mrb[35].mxu1 }
0x1e2d   : > { %v3374_v60 = vadd.f32 %v3373_v42, %v3299_v1  ;;  %v6376_v16 = vadd.f32 %v6375_v3, %v6374_v51  ;;  %v9247_v42 = vpack.c.bf16 %v3548_v38, %v3547_v33  ;;  %v3531_v1 = vld [vmem:[%s10167_s3 + $0x10] sm:$0xff]  ;;  %v3532_v51 = vld [vmem:[%s10167_s3 + $0x18] sm:$0xff]  ;;  %v3549_v3 = vld [vmem:[%s10167_s3 + $0xa0] sm:$0xff] }
0x1e2e   : > { %v3539_v33 = vld [vmem:[%s10167_s3 + $0x50] sm:$0xff]  ;;  %v3540_v38 = vld [vmem:[%s10167_s3 + $0x58] sm:$0xff] }
0x1e2f   : > { %v5921_v20 = vmul.f32 -1.442695, %v3374_v60  ;;  %v3304_v34 = vadd.f32 %v8610_v62, %v6376_v16  ;;  %v3550_v60 = vld [vmem:[%s10167_s3 + $0xa8] sm:$0xff]  ;;  %v9263_v16 = vpack.c.bf16 %v3532_v51, %v3531_v1  ;;  %v9329_v1 = vpack.c.bf16 %v3540_v38, %v3539_v33  ;;  %v3557_v51 = vld [vmem:[%s10167_s3 + $0xe0] sm:$0xff] }
0x1e30   : > { %v9375_v33 = vld [vmem:[%s10167_s3 + $0x100] sm:$0xff] }
0x1e31   : > { %7622 = vpow2.f32 %v5921_v20  ;;  %v3379_v49 = vadd.f32 %v6802_v57, %v3304_v34  ;;  %v9245_v57 = vpack.c.bf16 %v3530_v31, %v3529_v11  ;;  %v9266_v20 = vpack.c.bf16 %v3550_v60, %v3549_v3  ;;  %v3533_v34 = vld [vmem:[%s10167_s3 + $0x20] sm:$0xff]  ;;  %v3558_v3 = vld [vmem:[%s10167_s3 + $0xe8] sm:$0xff]  ;;  %6810 = vmatprep.subr.mxu1 %v9375_v33 }
0x1e32   : > { %v9339_v60 = vpack.c.bf16 %v3558_v3, %v3557_v51  ;;  %6811 = vmatpush3.msra.mxu1 %v9375_v33 }
0x1e33   : > { %v5922_v29 = vmul.f32 -1.442695, %v3379_v49  ;;  %v3534_v49 = vld [vmem:[%s10167_s3 + $0x28] sm:$0xff] }
0x1e35   : > { %7624 = vpow2.f32 %v5922_v29  ;;  %v3551_v29 = vld [vmem:[%s10167_s3 + $0xb0] sm:$0xff] }
0x1e3b   : > { %v7623_v63 = vpop.eup %7622 }
0x1e3c   : > { %v3388_v41 = vadd.f32 1.0, %v7623_v63  ;;  %v3552_v63 = vld [vmem:[%s10167_s3 + $0xb8] sm:$0xff] }
0x1e3e   : > { %7626 = vrcp.f32 %v3388_v41  ;;  %v9281_v41 = vpack.c.bf16 %v3534_v49, %v3533_v34  ;;  %v3541_v34 = vld [vmem:[%s10167_s3 + $0x60] sm:$0xff]  ;;  %v3542_v49 = vld [vmem:[%s10167_s3 + $0x68] sm:$0xff] }
0x1e3f   : > { %v7625_v28 = vpop.eup %7624 }
0x1e40   : > { %v3389_v12 = vadd.f32 1.0, %v7625_v28  ;;  %v9284_v28 = vpack.c.bf16 %v3552_v63, %v3551_v29  ;;  %v9347_v29 = vpack.c.bf16 %v3542_v49, %v3541_v34  ;;  %v3559_v63 = vld [vmem:[%s10167_s3 + $0xf0] sm:$0xff] }
0x1e42   : > { %7628 = vrcp.f32 %v3389_v12  ;;  %v3535_v12 = vld [vmem:[%s10167_s3 + $0x30] sm:$0xff] }
0x1e48   : > { %v9198_v10 = vpop.eup %7626 }
0x1e49   : > { %v3394_v19 = vmul.f32 %v9198_v10, %v3053_v9 }
0x1e4b   : > { %3398 = vrot.lane.b32.xlu0 %v3394_v19, %s7700_s17  ;;  %v3536_v19 = vld [vmem:[%s10167_s3 + $0x38] sm:$0xff] }
0x1e4c   : > { %v9202_v39 = vpop.eup %7628 }
0x1e4d   : > { %v3395_v62 = vmul.f32 %v9202_v39, %v3055_v23 }
0x1e4f   : > { %3400 = vrot.lane.b32.xlu1 %v3395_v62, %s7700_s17  ;;  %v3553_v62 = vld [vmem:[%s10167_s3 + $0xc0] sm:$0xff] }
0x1ebd   : > { %v3399_v47 = vpop.permute.xlu0 %3398 }
0x1ebe   : > { %v9208_v46 = vsel %vm289_vm1, %v8986_v48, %v3399_v47  ;;  %v3554_v47 = vld [vmem:[%s10167_s3 + $0xc8] sm:$0xff] }
0x1ec1   : > { %v3401_v2 = vpop.permute.xlu1 %3400 }
0x1ec2   : > { %v9212_v26 = vsel %vm289_vm1, %v8989_v61, %v3401_v2  ;;  %v3545_v61 = vld [vmem:[%s10167_s3 + $0x80] sm:$0xff]  ;;  %v9299_v2 = vpack.c.bf16 %v3536_v19, %v3535_v12  ;;  %v3560_v12 = vld [vmem:[%s10167_s3 + $0xf8] sm:$0xff] }
0x1ec3   : > { %v7213_v9 = vpack.c.bf16 %v9212_v26, %v9208_v46  ;;  %v9234_v23 = vpack.c.bf16 %v3546_v8, %v3545_v61  ;;  %v3555_v61 = vld [vmem:[%s10167_s3 + $0xd0] sm:$0xff]  ;;  %v3556_v8 = vld [vmem:[%s10167_s3 + $0xd8] sm:$0xff]  ;;  %v9357_v19 = vpack.c.bf16 %v3560_v12, %v3559_v63 }
0x1ec4   : > { %v9320_v31 = vpack.c.bf16 %v3556_v8, %v3555_v61 }
0x1ec5   : > { %7214 = vmatprep.subr.bf16.mxu0 %v7213_v9 }
0x1ec6   : > { %7216 = vmatpush3.bf16.msra.mxu0 %v7213_v9  ;;  %v9302_v9 = vpack.c.bf16 %v3554_v47, %v3553_v62  ;;  %v3543_v62 = vld [vmem:[%s10167_s3 + $0x70] sm:$0xff]  ;;  %v3544_v47 = vld [vmem:[%s10167_s3 + $0x78] sm:$0xff] }
0x1ec7   : > { %7218 = vmatprep.subr.bf16.mxu0 %v9234_v23 }
0x1ec9   : > { %6808 = vmatmul.mubr.msk.f32.vlgmr.msra.gmra.mrb[36].mxu0 %vm292_vm0, %v9219_v35 }
0x1eca   : > { %7220 = vmatpush3.bf16.msra.mxu0 %v9245_v57 }
0x1ecb   : > { %7222 = vmatprep.subr.bf16.mxu0 %v9247_v42 }
0x1ece   : > { %7224 = vmatpush3.bf16.msra.mxu0 %v9263_v16 }
0x1ecf   : > { %7226 = vmatprep.subr.bf16.mxu0 %v9266_v20 }
0x1ed2   : > { %7228 = vmatpush3.bf16.msra.mxu0 %v9281_v41 }
0x1ed3   : > { %7230 = vmatprep.subr.bf16.mxu0 %v9284_v28 }
0x1ed6   : > { %7232 = vmatpush3.bf16.msra.mxu0 %v9299_v2 }
0x1ed7   : > { %7234 = vmatprep.subr.bf16.mxu0 %v9302_v9 }
0x1f9c   : > { %v6809_v52 = vpop.f32.mrb[36].mxu0 }
0x1f9d   : > { %3485 = vrot.lane.b32.xlu1 %v6809_v52, %s7696_s15  ;;  %v3472_v48 = vpop.f32.mrb[37].mxu0  ;;  %v3537_v52 = vld [vmem:[%s10167_s3 + $0x40] sm:$0xff] }
0x1f9e   : > { %3483 = vrot.lane.b32.xlu0 %v3472_v48, %s7696_s15  ;;  %v3538_v48 = vld [vmem:[%s10167_s3 + $0x48] sm:$0xff] }
0x1f9f   : > { %v9317_v11 = vpack.c.bf16 %v3538_v48, %v3537_v52  ;;  %v9365_v52 = vpack.c.bf16 %v3544_v47, %v3543_v62 }
0x1fa1   : > { %7236 = vmatpush3.bf16.msra.mxu0 %v9317_v11 }
0x1fa2   : > { %7238 = vmatprep.subr.bf16.mxu0 %v9320_v31 }
0x1fa5   : > { %7240 = vmatpush3.bf16.msra.mxu0 %v9329_v1 }
0x1fa6   : > { %7242 = vmatprep.subr.bf16.mxu0 %v9339_v60 }
0x1fa9   : > { %7244 = vmatpush3.bf16.msra.mxu0 %v9347_v29 }
0x1faa   : > { %7246 = vmatprep.subr.bf16.mxu0 %v9357_v19 }
0x1fad   : > { %7248 = vmatpush3.bf16.msra.mxu0 %v9365_v52 }
0x1fae   : > { %7254 = vmatprep.subr.bf16.mxu0 %v9014_v0 }
0x200f   : > { %v3486_v48 = vpop.permute.xlu1 %3485 }
0x2010   : > { %v3490_v61 = vsel %vm382_vm3, %v9212_v26, %v3486_v48  ;;  %v3484_v8 = vpop.permute.xlu0 %3483 }
0x2011   : > { %v3494_v38 = vmul.f32 %v3490_v61, %v7886_v44  ;;  %v3489_v51 = vsel %vm382_vm3, %v9208_v46, %v3484_v8  ;;  %v3496_v34 = vmul.f32 %v3490_v61, %v7920_v56  ;;  %v3498_v46 = vmul.f32 %v3490_v61, %v7970_v22 }
0x2012   : > { %v3493_v0 = vmul.f32 %v3489_v51, %v7924_v58  ;;  %v3495_v3 = vmul.f32 %v3489_v51, %v7948_v4  ;;  %v3497_v49 = vmul.f32 %v3489_v51, %v7884_v43  ;;  %v3491_v48 = vmul.f32 %v3489_v51, %v7976_v25 }
0x2014   : > { %3509 = vrot.lane.b32.xlu1 %v3495_v3, %s7697_s8  ;;  %v7538_v26 = vpack.i.bf16 %v3494_v38, %v3493_v0 }
0x2016   : > { %7539 = vrot.lane.b32.xlu0 %v7538_v26, %s7698_s9 }
0x2018   : > { %3511 = vrot.lane.b32.xlu1 %v3496_v34, %s7697_s8  ;;  %v3492_v34 = vmul.f32 %v3490_v61, %v7974_v24 }
0x201a   : > { %3517 = vrot.lane.b32.xlu0 %v3497_v49, %s7699_s10 }
0x201e   : > { %3519 = vrot.lane.b32.xlu0 %v3498_v46, %s7699_s10 }
0x2086   : > { %v3510_v63 = vpop.permute.xlu1 %3509 }
0x2088   : > { %v7540_v12 = vpop.permute.xlu0 %7539 }
0x2089   : > { %v7541_v62 = vunpack.i.l.bf16 %v7540_v12  ;;  %v7542_v8 = vunpack.i.h.bf16 %v7540_v12  ;;  %v3718_v12 = vmul.f32 %v9198_v10, %v8974_v37 }
0x208a   : > { %v3512_v0 = vpop.permute.xlu1 %3511 }
0x208b   : > { %v3525_v47 = vsel %vm454_vm4, %v7541_v62, %v3510_v63  ;;  %v3523_v26 = vsel %vm451_vm7, %v3491_v48, %v7541_v62  ;;  %v3526_v49 = vsel %vm454_vm4, %v7542_v8, %v3512_v0  ;;  %v3524_v63 = vsel %vm451_vm7, %v3492_v34, %v7542_v8 }
0x208c   : > { %v3518_v38 = vpop.permute.xlu0 %3517  ;;  %v3721_v48 = vsub.f32 1.0, %v9202_v39 }
0x208d   : > { %6812 = vmatprep.mubr.msk.f32.mxu1 %vm493_vm5, %v3518_v38  ;;  %v3527_v3 = vsel %vm457_vm6, %v3525_v47, %v3518_v38  ;;  %v3719_v38 = vmul.f32 %v9202_v39, %v8981_v50 }
0x208e   : > { %3630 = vmatprep.mubr.f32.mxu0 %v3527_v3 }
0x208f   : > { %3631 = vmatmul.mubr.f32.vlgmr.msra.gmra.mrb[38].mxu0 %v3523_v26  ;;  %v9439_v26 = vld [vmem:[%s7773_s12 + $0x50] sm:$0xff] }
0x2090   : > { %v3520_v46 = vpop.permute.xlu0 %3519  ;;  %7256 = vmatpush3.bf16.msra.mxu0 %v9025_v6 }
0x2091   : > { %6813 = vmatmul.mubr.msk.f32.vlgmr.msra.gmra.mrb[36].mxu1 %vm493_vm5, %v3520_v46  ;;  %v3528_v51 = vsel %vm457_vm6, %v3526_v49, %v3520_v46  ;;  %7258 = vmatprep.subr.bf16.mxu0 %v9027_v40 }
0x2092   : > { %3635 = vmatprep.mubr.f32.mxu0 %v3528_v51  ;;  %6819 = vmatprep.mubr.msk.f32.mxu1 %vm292_vm0, %v9190_v7 }
0x2093   : > { %3636 = vmatmul.mubr.f32.gmra.mrb[40].mxu0 %v3524_v63 }
0x2094   : > { %7260 = vmatpush3.bf16.msra.mxu0 %v9043_v54 }
0x2095   : > { %7262 = vmatprep.subr.bf16.mxu0 %v9046_v53 }
0x2098   : > { %7264 = vmatpush3.bf16.msra.mxu0 %v9061_v32 }
0x2099   : > { %7266 = vmatprep.subr.bf16.mxu0 %v9064_v59 }
0x209c   : > { %7268 = vmatpush3.bf16.msra.mxu0 %v9079_v27 }
0x209d   : > { %7270 = vmatprep.subr.bf16.mxu0 %v9082_v5 }
0x20a0   : > { %7272 = vmatpush3.bf16.msra.mxu0 %v9097_v45 }
0x20a1   : > { %7274 = vmatprep.subr.bf16.mxu0 %v9100_v17 }
0x20a4   : > { %7276 = vmatpush3.bf16.msra.mxu0 %v9109_v18 }
0x20a5   : > { %7278 = vmatprep.subr.bf16.mxu0 %v9122_v14 }
0x20a8   : > { %7280 = vmatpush3.bf16.msra.mxu0 %v9127_v30 }
0x20a9   : > { %7282 = vmatprep.subr.bf16.mxu0 %v9137_v13 }
0x20ac   : > { %7284 = vmatpush3.bf16.msra.mxu0 %v9145_v55  ;;  %v3720_v55 = vsub.f32 1.0, %v9198_v10  ;;  %v9442_v10 = vld [vmem:[%s7773_s12 + $0x58] sm:$0xff] }
0x20ad   : > { %6834 = vmatprep.subr.mxu0 %v9375_v33 }
0x2162   : > { %v6416_v6 = vpop.f32.mrb[38].mxu0 }
0x2163   : > { %v6417_v40 = vpop.f32.mrb[39].mxu0 }
0x2164   : > { %v6418_v54 = vadd.f32 %v6417_v40, %v6416_v6  ;;  %v6814_v53 = vpop.f32.mrb[36].mxu1 }
0x2165   : > { %v3707_v32 = vpop.f32.mrb[37].mxu1 }
0x2166   : > { %v3633_v59 = vadd.f32 %v8960_v36, %v6418_v54  ;;  %v6419_v27 = vpop.f32.mrb[40].mxu0 }
0x2167   : > { %v6420_v5 = vpop.f32.mrb[41].mxu0 }
0x2168   : > { %v3708_v45 = vadd.f32 %v3707_v32, %v3633_v59  ;;  %v6421_v17 = vadd.f32 %v6420_v5, %v6419_v27 }
0x216a   : > { %7630 = vtanh.f32 %v3708_v45  ;;  %v3638_v18 = vadd.f32 %v8966_v21, %v6421_v17 }
0x216c   : > { %v3713_v14 = vadd.f32 %v6814_v53, %v3638_v18 }
0x216e   : > { %7632 = vtanh.f32 %v3713_v14 }
0x2174   : > { %v7631_v30 = vpop.eup %7630 }
0x2175   : > { %3724 = vrot.lane.b32.xlu1 %v7631_v30, %s7701_s18 }
0x2178   : > { %v7633_v13 = vpop.eup %7632 }
0x2179   : > { %3726 = vrot.lane.b32.xlu0 %v7633_v13, %s7701_s18 }
0x21e7   : > { %v3725_v61 = vpop.permute.xlu1 %3724 }
0x21e8   : > { %v3730_v62 = vmul.f32 %v3725_v61, %v3720_v55 }
0x21ea   : > { %v9427_v47 = vadd.f32 %v3730_v62, %v3718_v12 }
0x21eb   : > { %v3727_v8 = vpop.permute.xlu0 %3726 }
0x21ec   : > { %v3731_v0 = vmul.f32 %v3727_v8, %v3721_v48  ;;  %3748 = vrot.lane.b32.xlu1 %v9427_v47, %s7702_s19 }
0x21ee   : > { %v9434_v3 = vadd.f32 %v3731_v0, %v3719_v38 }
0x21f0   : > { %3750 = vrot.lane.b32.xlu0 %v9434_v3, %s7702_s19 }
0x225e   : > { %v3749_v37 = vpop.permute.xlu1 %3748 }
0x225f   : > { %v3754_v49 = vsel %vm289_vm1, %v9439_v26, %v3749_v37 }
0x2262   : > { %v3751_v34 = vpop.permute.xlu0 %3750 }
0x2263   : > { %v3755_v50 = vsel %vm289_vm1, %v9442_v10, %v3751_v34 }
0x2264   : > { %v7249_v39 = vpack.c.bf16 %v3755_v50, %v3754_v49 }
0x2266   : > { %7250 = vmatprep.subr.bf16.mxu1 %v7249_v39 }
0x2267   : > { %7252 = vmatpush3.bf16.msra.mxu1 %v7249_v39 }
0x2268   : > { %6822 = vmatprep.subr.mxu1 %v9152_v15 }
0x226a   : > { %6820 = vmatmul.mubr.msk.f32.vlgmr.msra.gmra.mrb[38].mxu1 %vm292_vm0, %v9219_v35 }
0x226b   : > { %6823 = vmatpush3.msra.mxu1 %v9152_v15 }
0x233d   : > { %v6821_v46 = vpop.f32.mrb[38].mxu1 }
0x233e   : > { %3835 = vrot.lane.b32.xlu0 %v6821_v46, %s7696_s15  ;;  %v3822_v51 = vpop.f32.mrb[39].mxu1 }
0x233f   : > { %3833 = vrot.lane.b32.xlu1 %v3822_v51, %s7696_s15 }
0x23b0   : > { %v3836_v63 = vpop.permute.xlu0 %3835 }
0x23b1   : > { %v3840_v6 = vsel %vm382_vm3, %v3755_v50, %v3836_v63  ;;  %v3834_v40 = vpop.permute.xlu1 %3833 }
0x23b2   : > { %v3844_v54 = vmul.f32 %v3840_v6, %v7886_v44  ;;  %v3839_v53 = vsel %vm382_vm3, %v3754_v49, %v3834_v40  ;;  %v3846_v27 = vmul.f32 %v3840_v6, %v7920_v56  ;;  %v3848_v45 = vmul.f32 %v3840_v6, %v7970_v22 }
0x23b3   : > { %v3843_v32 = vmul.f32 %v3839_v53, %v7924_v58  ;;  %v3845_v59 = vmul.f32 %v3839_v53, %v7948_v4  ;;  %v3847_v5 = vmul.f32 %v3839_v53, %v7884_v43  ;;  %v3841_v55 = vmul.f32 %v3839_v53, %v7976_v25 }
0x23b4   : > { %v3842_v38 = vmul.f32 %v3840_v6, %v7974_v24 }
0x23b5   : > { %3859 = vrot.lane.b32.xlu0 %v3845_v59, %s7697_s8  ;;  %v7543_v15 = vpack.i.bf16 %v3844_v54, %v3843_v32 }
0x23b7   : > { %7544 = vrot.lane.b32.xlu1 %v7543_v15, %s7698_s9 }
0x23b9   : > { %3861 = vrot.lane.b32.xlu0 %v3846_v27, %s7697_s8  ;;  %v9497_v27 = vld [vmem:[%s10168_s4 + $0x8] sm:$0xff] }
0x23bb   : > { %3867 = vrot.lane.b32.xlu1 %v3847_v5, %s7699_s10 }
0x23bd   : > { %3736 = vrot.lane.b32.xlu0 %v9427_v47, %s7703_s20 }
0x23bf   : > { %3869 = vrot.lane.b32.xlu1 %v3848_v45, %s7699_s10 }
0x23c3   : > { %3738 = vrot.lane.b32.xlu1 %v9434_v3, %s7703_s20 }
0x2427   : > { %v3860_v17 = vpop.permute.xlu0 %3859 }
0x2429   : > { %v7545_v18 = vpop.permute.xlu1 %7544 }
0x242a   : > { %v7546_v14 = vunpack.i.l.bf16 %v7545_v18  ;;  %v7547_v61 = vunpack.i.h.bf16 %v7545_v18 }
0x242b   : > { %v3862_v30 = vpop.permute.xlu0 %3861 }
0x242c   : > { %v3875_v13 = vsel %vm454_vm4, %v7546_v14, %v3860_v17  ;;  %v3873_v8 = vsel %vm451_vm7, %v3841_v55, %v7546_v14  ;;  %v3876_v0 = vsel %vm454_vm4, %v7547_v61, %v3862_v30  ;;  %v3874_v49 = vsel %vm451_vm7, %v3842_v38, %v7547_v61 }
0x242d   : > { %v3868_v12 = vpop.permute.xlu1 %3867 }
0x242e   : > { %6824 = vmatprep.mubr.msk.f32.mxu1 %vm493_vm5, %v3868_v12  ;;  %v3877_v62 = vsel %vm457_vm6, %v3875_v13, %v3868_v12 }
0x242f   : > { %v3737_v48 = vpop.permute.xlu0 %3736  ;;  %3980 = vmatprep.mubr.f32.mxu0 %v3877_v62 }
0x2430   : > { %5927 = vst.msk [vmem:[%s8291_s23 + $0x40] sm:$0xff] %vm1006_vm8, %v3737_v48  ;;  %3981 = vmatmul.mubr.f32.vlgmr.msra.gmra.mrb[42].mxu0 %v3873_v8 }
0x2431   : > { %v3870_v37 = vpop.permute.xlu1 %3869  ;;  %6835 = vmatpush3.msra.mxu0 %v9375_v33  ;;  %v9491_v33 = vld [vmem:[%s10168_s4] sm:$0xff] }
0x2432   : > { %6825 = vmatmul.mubr.msk.f32.vlgmr.msra.gmra.mrb[40].mxu1 %vm493_vm5, %v3870_v37  ;;  %v3878_v34 = vsel %vm457_vm6, %v3876_v0, %v3870_v37 }
0x2433   : > { %3985 = vmatprep.mubr.f32.mxu0 %v3878_v34  ;;  %6831 = vmatprep.mubr.msk.f32.mxu1 %vm292_vm0, %v9190_v7 }
0x2434   : > { %3986 = vmatmul.mubr.f32.gmra.mrb[44].mxu0 %v3874_v49 }
0x2435   : > { %v3739_v50 = vpop.permute.xlu1 %3738 }
0x2436   : > { %5928 = vst.msk [vmem:[%s8291_s23 + $0x48] sm:$0xff] %vm1006_vm8, %v3739_v50 }
0x2503   : > { %v6461_v39 = vpop.f32.mrb[42].mxu0 }
0x2504   : > { %v6462_v46 = vpop.f32.mrb[43].mxu0 }
0x2505   : > { %v6463_v51 = vadd.f32 %v6462_v46, %v6461_v39  ;;  %v6826_v63 = vpop.f32.mrb[40].mxu1 }
0x2506   : > { %v4057_v6 = vpop.f32.mrb[41].mxu1 }
0x2507   : > { %v3983_v40 = vadd.f32 %v9491_v33, %v6463_v51  ;;  %v6464_v54 = vpop.f32.mrb[44].mxu0 }
0x2508   : > { %v6465_v53 = vpop.f32.mrb[45].mxu0 }
0x2509   : > { %v4058_v32 = vadd.f32 %v4057_v6, %v3983_v40  ;;  %v6466_v59 = vadd.f32 %v6465_v53, %v6464_v54 }
0x250b   : > { %v5935_v15 = vmul.f32 -1.442695, %v4058_v32  ;;  %v3988_v5 = vadd.f32 %v9497_v27, %v6466_v59 }
0x250d   : > { %7634 = vpow2.f32 %v5935_v15  ;;  %v4063_v45 = vadd.f32 %v6826_v63, %v3988_v5 }
0x250f   : > { %v5936_v17 = vmul.f32 -1.442695, %v4063_v45 }
0x2511   : > { %7636 = vpow2.f32 %v5936_v17 }
0x2517   : > { %v7635_v18 = vpop.eup %7634 }
0x2518   : > { %v4072_v14 = vadd.f32 1.0, %v7635_v18 }
0x251a   : > { %7638 = vrcp.f32 %v4072_v14 }
0x251b   : > { %v7637_v30 = vpop.eup %7636 }
0x251c   : > { %v4073_v13 = vadd.f32 1.0, %v7637_v30 }
0x251e   : > { %7640 = vrcp.f32 %v4073_v13 }
0x2524   : > { %v9500_v55 = vpop.eup %7638 }
0x2525   : > { %v4078_v61 = vmul.f32 %v9500_v55, %v3737_v48 }
0x2527   : > { %4082 = vrot.lane.b32.xlu0 %v4078_v61, %s7700_s17 }
0x2528   : > { %v9504_v12 = vpop.eup %7640 }
0x2529   : > { %v4079_v62 = vmul.f32 %v9504_v12, %v3739_v50 }
0x252b   : > { %4084 = vrot.lane.b32.xlu1 %v4079_v62, %s7700_s17 }
0x2599   : > { %v4083_v8 = vpop.permute.xlu0 %4082 }
0x259a   : > { %v4088_v0 = vsel %vm289_vm1, %v9439_v26, %v4083_v8 }
0x259d   : > { %v4085_v38 = vpop.permute.xlu1 %4084 }
0x259e   : > { %v4089_v37 = vsel %vm289_vm1, %v9442_v10, %v4085_v38  ;;  %v4404_v38 = vsub.f32 1.0, %v9500_v55 }
0x259f   : > { %v7285_v34 = vpack.c.bf16 %v4089_v37, %v4088_v0 }
0x25a1   : > { %7286 = vmatprep.subr.bf16.mxu1 %v7285_v34 }
0x25a2   : > { %7288 = vmatpush3.bf16.msra.mxu1 %v7285_v34 }
0x25a3   : > { %7290 = vmatprep.subr.bf16.mxu1 %v9234_v23 }
0x25a5   : > { %6832 = vmatmul.mubr.msk.f32.vlgmr.msra.gmra.mrb[42].mxu1 %vm292_vm0, %v9219_v35 }
0x25a6   : > { %7292 = vmatpush3.bf16.msra.mxu1 %v9245_v57 }
0x25a7   : > { %7294 = vmatprep.subr.bf16.mxu1 %v9247_v42 }
0x25aa   : > { %7296 = vmatpush3.bf16.msra.mxu1 %v9263_v16 }
0x25ab   : > { %7298 = vmatprep.subr.bf16.mxu1 %v9266_v20 }
0x25ae   : > { %7300 = vmatpush3.bf16.msra.mxu1 %v9281_v41 }
0x25af   : > { %7302 = vmatprep.subr.bf16.mxu1 %v9284_v28 }
0x25b2   : > { %7304 = vmatpush3.bf16.msra.mxu1 %v9299_v2 }
0x25b3   : > { %7306 = vmatprep.subr.bf16.mxu1 %v9302_v9 }
0x25b6   : > { %7308 = vmatpush3.bf16.msra.mxu1 %v9317_v11 }
0x25b7   : > { %7310 = vmatprep.subr.bf16.mxu1 %v9320_v31 }
0x25ba   : > { %7312 = vmatpush3.bf16.msra.mxu1 %v9329_v1 }
0x25bb   : > { %7314 = vmatprep.subr.bf16.mxu1 %v9339_v60 }
0x25be   : > { %7316 = vmatpush3.bf16.msra.mxu1 %v9347_v29 }
0x25bf   : > { %7318 = vmatprep.subr.bf16.mxu1 %v9357_v19 }
0x25c2   : > { %7320 = vmatpush3.bf16.msra.mxu1 %v9365_v52 }
0x2678   : > { %v6833_v23 = vpop.f32.mrb[42].mxu1 }
0x2679   : > { %4169 = vrot.lane.b32.xlu1 %v6833_v23, %s7696_s15  ;;  %v4156_v57 = vpop.f32.mrb[43].mxu1 }
0x267a   : > { %4167 = vrot.lane.b32.xlu0 %v4156_v57, %s7696_s15  ;;  %v4403_v57 = vmul.f32 %v9504_v12, %v9434_v3 }
0x26eb   : > { %v4170_v42 = vpop.permute.xlu1 %4169 }
0x26ec   : > { %v4174_v16 = vsel %vm382_vm3, %v4089_v37, %v4170_v42  ;;  %v4168_v20 = vpop.permute.xlu0 %4167 }
0x26ed   : > { %v4178_v41 = vmul.f32 %v4174_v16, %v7886_v44  ;;  %v4173_v28 = vsel %vm382_vm3, %v4088_v0, %v4168_v20  ;;  %v4180_v31 = vmul.f32 %v4174_v16, %v7920_v56  ;;  %v4182_v60 = vmul.f32 %v4174_v16, %v7970_v22  ;;  %v9576_v20 = vld [vmem:[%s7773_s12 + $0x60] sm:$0xff] }
0x26ee   : > { %v4177_v2 = vmul.f32 %v4173_v28, %v7924_v58  ;;  %v4179_v9 = vmul.f32 %v4173_v28, %v7948_v4  ;;  %v4181_v1 = vmul.f32 %v4173_v28, %v7884_v43  ;;  %v4175_v10 = vmul.f32 %v4173_v28, %v7976_v25 }
0x26ef   : > { %v4176_v51 = vmul.f32 %v4174_v16, %v7974_v24  ;;  %v4402_v0 = vmul.f32 %v9500_v55, %v9427_v47  ;;  %v9579_v55 = vld [vmem:[%s7773_s12 + $0x68] sm:$0xff] }
0x26f0   : > { %4193 = vrot.lane.b32.xlu1 %v4179_v9, %s7697_s8  ;;  %v7548_v11 = vpack.i.bf16 %v4178_v41, %v4177_v2 }
0x26f2   : > { %7549 = vrot.lane.b32.xlu0 %v7548_v11, %s7698_s9  ;;  %v4579_v11 = vld [vmem:[%s10166_s2 + $0x80] sm:$0xff] }
0x26f4   : > { %4195 = vrot.lane.b32.xlu1 %v4180_v31, %s7697_s8  ;;  %v4580_v31 = vld [vmem:[%s10166_s2 + $0x88] sm:$0xff] }
0x26f6   : > { %4201 = vrot.lane.b32.xlu0 %v4181_v1, %s7699_s10  ;;  %v4563_v1 = vld [vmem:[%s10166_s2] sm:$0xff] }
0x26fa   : > { %4203 = vrot.lane.b32.xlu0 %v4182_v60, %s7699_s10  ;;  %v9604_v60 = vpack.c.bf16 %v4580_v31, %v4579_v11  ;;  %v4578_v11 = vld [vmem:[%s10166_s2 + $0x78] sm:$0xff] }
0x26fc   : > { %7326 = vmatprep.subr.bf16.mxu1 %v9604_v60 }
0x2762   : > { %v4194_v29 = vpop.permute.xlu1 %4193 }
0x2764   : > { %v7550_v19 = vpop.permute.xlu0 %7549 }
0x2765   : > { %v7551_v52 = vunpack.i.l.bf16 %v7550_v19  ;;  %v7552_v48 = vunpack.i.h.bf16 %v7550_v19  ;;  %v4581_v19 = vld [vmem:[%s10166_s2 + $0x90] sm:$0xff] }
0x2766   : > { %v4196_v50 = vpop.permute.xlu1 %4195 }
0x2767   : > { %v4209_v26 = vsel %vm454_vm4, %v7551_v52, %v4194_v29  ;;  %v4207_v46 = vsel %vm451_vm7, %v4175_v10, %v7551_v52  ;;  %v4210_v63 = vsel %vm454_vm4, %v7552_v48, %v4196_v50  ;;  %v4208_v54 = vsel %vm451_vm7, %v4176_v51, %v7552_v48  ;;  %v4564_v29 = vld [vmem:[%s10166_s2 + $0x8] sm:$0xff]  ;;  %v4582_v52 = vld [vmem:[%s10166_s2 + $0x98] sm:$0xff]  ;;  %v4565_v48 = vld [vmem:[%s10166_s2 + $0x10] sm:$0xff] }
0x2768   : > { %v4202_v49 = vpop.permute.xlu0 %4201  ;;  %v9617_v10 = vpack.c.bf16 %v4582_v52, %v4581_v19  ;;  %v4583_v50 = vld [vmem:[%s10166_s2 + $0xa0] sm:$0xff] }
0x2769   : > { %6836 = vmatprep.mubr.msk.f32.mxu0 %vm493_vm5, %v4202_v49  ;;  %v4211_v39 = vsel %vm457_vm6, %v4209_v26, %v4202_v49  ;;  %v9615_v26 = vpack.c.bf16 %v4564_v29, %v4563_v1  ;;  %v4566_v49 = vld [vmem:[%s10166_s2 + $0x18] sm:$0xff]  ;;  %v9742_v29 = vld [vmem:[%s10166_s2 + $0x100] sm:$0xff] }
0x276a   : > { %4314 = vmatprep.mubr.f32.mxu1 %v4211_v39  ;;  %v4584_v39 = vld [vmem:[%s10166_s2 + $0xa8] sm:$0xff] }
0x276b   : > { %4315 = vmatmul.mubr.f32.vlgmr.msra.gmra.mrb[44].mxu1 %v4207_v46  ;;  %v9633_v46 = vpack.c.bf16 %v4566_v49, %v4565_v48  ;;  %v9636_v51 = vpack.c.bf16 %v4584_v39, %v4583_v50 }
0x276c   : > { %v4204_v6 = vpop.permute.xlu0 %4203  ;;  %7328 = vmatpush3.bf16.msra.mxu1 %v9615_v26 }
0x276d   : > { %6837 = vmatmul.mubr.msk.f32.vlgmr.msra.gmra.mrb[46].mxu0 %vm493_vm5, %v4204_v6  ;;  %v4212_v40 = vsel %vm457_vm6, %v4210_v63, %v4204_v6  ;;  %7330 = vmatprep.subr.bf16.mxu1 %v9617_v10  ;;  %v4567_v63 = vld [vmem:[%s10166_s2 + $0x20] sm:$0xff]  ;;  %v4568_v6 = vld [vmem:[%s10166_s2 + $0x28] sm:$0xff] }
0x276e   : > { %4319 = vmatprep.mubr.f32.mxu1 %v4212_v40  ;;  %6843 = vmatprep.mubr.msk.f32.mxu0 %vm292_vm0, %v9190_v7  ;;  %v4585_v40 = vld [vmem:[%s10166_s2 + $0xb0] sm:$0xff] }
0x276f   : > { %4320 = vmatmul.mubr.f32.gmra.mrb[46].mxu1 %v4208_v54  ;;  %v4586_v54 = vld [vmem:[%s10166_s2 + $0xb8] sm:$0xff] }
0x2770   : > { %7332 = vmatpush3.bf16.msra.mxu1 %v9633_v46 }
0x2771   : > { %7334 = vmatprep.subr.bf16.mxu1 %v9636_v51 }
0x283e   : > { %v6506_v53 = vpop.f32.mrb[44].mxu1 }
0x283f   : > { %v6507_v32 = vpop.f32.mrb[45].mxu1 }
0x2840   : > { %v6508_v59 = vadd.f32 %v6507_v32, %v6506_v53  ;;  %v6838_v15 = vpop.f32.mrb[46].mxu0  ;;  %v9651_v53 = vpack.c.bf16 %v4568_v6, %v4567_v63  ;;  %v9654_v32 = vpack.c.bf16 %v4586_v54, %v4585_v40 }
0x2841   : > { %v4391_v5 = vpop.f32.mrb[47].mxu0 }
0x2842   : > { %v4317_v45 = vadd.f32 %v8960_v36, %v6508_v59  ;;  %v6509_v17 = vpop.f32.mrb[46].mxu1  ;;  %v4569_v59 = vld [vmem:[%s10166_s2 + $0x30] sm:$0xff]  ;;  %7336 = vmatpush3.bf16.msra.mxu1 %v9651_v53 }
0x2843   : > { %v6510_v18 = vpop.f32.mrb[47].mxu1  ;;  %7338 = vmatprep.subr.bf16.mxu1 %v9654_v32 }
0x2844   : > { %v4392_v14 = vadd.f32 %v4391_v5, %v4317_v45  ;;  %v6511_v30 = vadd.f32 %v6510_v18, %v6509_v17  ;;  %v4587_v5 = vld [vmem:[%s10166_s2 + $0xc0] sm:$0xff]  ;;  %v4588_v45 = vld [vmem:[%s10166_s2 + $0xc8] sm:$0xff] }
0x2845   : > { %v9672_v18 = vpack.c.bf16 %v4588_v45, %v4587_v5 }
0x2846   : > { %7642 = vtanh.f32 %v4392_v14  ;;  %v4322_v13 = vadd.f32 %v8966_v21, %v6511_v30  ;;  %v4405_v21 = vsub.f32 1.0, %v9504_v12  ;;  %v4571_v14 = vld [vmem:[%s10166_s2 + $0x40] sm:$0xff]  ;;  %v4572_v30 = vld [vmem:[%s10166_s2 + $0x48] sm:$0xff] }
0x2848   : > { %v4397_v61 = vadd.f32 %v6838_v15, %v4322_v13  ;;  %v4570_v15 = vld [vmem:[%s10166_s2 + $0x38] sm:$0xff]  ;;  %v4589_v13 = vld [vmem:[%s10166_s2 + $0xd0] sm:$0xff] }
0x2849   : > { %v9669_v17 = vpack.c.bf16 %v4570_v15, %v4569_v59 }
0x284a   : > { %7644 = vtanh.f32 %v4397_v61  ;;  %v4590_v61 = vld [vmem:[%s10166_s2 + $0xd8] sm:$0xff] }
0x284b   : > { %7340 = vmatpush3.bf16.msra.mxu1 %v9669_v17 }
0x284c   : > { %7342 = vmatprep.subr.bf16.mxu1 %v9672_v18 }
0x2850   : > { %v7643_v62 = vpop.eup %7642 }
0x2851   : > { %4408 = vrot.lane.b32.xlu1 %v7643_v62, %s7701_s18  ;;  %v9687_v62 = vpack.c.bf16 %v4572_v30, %v4571_v14 }
0x2853   : > { %7344 = vmatpush3.bf16.msra.mxu1 %v9687_v62 }
0x2854   : > { %v7645_v8 = vpop.eup %7644 }
0x2855   : > { %4410 = vrot.lane.b32.xlu0 %v7645_v8, %s7701_s18  ;;  %v9690_v8 = vpack.c.bf16 %v4590_v61, %v4589_v13 }
0x2857   : > { %7346 = vmatprep.subr.bf16.mxu1 %v9690_v8 }
0x28c3   : > { %v4409_v36 = vpop.permute.xlu1 %4408 }
0x28c4   : > { %v4414_v37 = vmul.f32 %v4409_v36, %v4404_v38  ;;  %v4573_v38 = vld [vmem:[%s10166_s2 + $0x50] sm:$0xff]  ;;  %v4574_v36 = vld [vmem:[%s10166_s2 + $0x58] sm:$0xff] }
0x28c6   : > { %v9564_v34 = vadd.f32 %v4414_v37, %v4402_v0  ;;  %v9699_v0 = vpack.c.bf16 %v4574_v36, %v4573_v38  ;;  %v4591_v37 = vld [vmem:[%s10166_s2 + $0xe0] sm:$0xff] }
0x28c7   : > { %v4411_v23 = vpop.permute.xlu0 %4410 }
0x28c8   : > { %v4415_v42 = vmul.f32 %v4411_v23, %v4405_v21  ;;  %4432 = vrot.lane.b32.xlu1 %v9564_v34, %s7702_s19  ;;  %7348 = vmatpush3.bf16.msra.mxu1 %v9699_v0  ;;  %v4592_v21 = vld [vmem:[%s10166_s2 + $0xe8] sm:$0xff] }
0x28c9   : > { %v9709_v23 = vpack.c.bf16 %v4592_v21, %v4591_v37 }
0x28ca   : > { %v9571_v16 = vadd.f32 %v4415_v42, %v4403_v57  ;;  %v4575_v57 = vld [vmem:[%s10166_s2 + $0x60] sm:$0xff]  ;;  %v4576_v42 = vld [vmem:[%s10166_s2 + $0x68] sm:$0xff] }
0x28cb   : > { %7350 = vmatprep.subr.bf16.mxu1 %v9709_v23 }
0x28cc   : > { %4434 = vrot.lane.b32.xlu0 %v9571_v16, %s7702_s19 }
0x293a   : > { %v4433_v47 = vpop.permute.xlu1 %4432 }
0x293b   : > { %v9583_v28 = vsel %vm289_vm1, %v9576_v20, %v4433_v47  ;;  %v9717_v47 = vpack.c.bf16 %v4576_v42, %v4575_v57 }
0x293d   : > { %7352 = vmatpush3.bf16.msra.mxu1 %v9717_v47 }
0x293e   : > { %v4435_v41 = vpop.permute.xlu0 %4434 }
0x293f   : > { %v9587_v3 = vsel %vm289_vm1, %v9579_v55, %v4435_v41  ;;  %v4593_v41 = vld [vmem:[%s10166_s2 + $0xf0] sm:$0xff] }
0x2940   : > { %v7321_v12 = vpack.c.bf16 %v9587_v3, %v9583_v28 }
0x2942   : > { %7322 = vmatprep.subr.bf16.mxu0 %v7321_v12 }
0x2943   : > { %7324 = vmatpush3.bf16.msra.mxu0 %v7321_v12  ;;  %v4594_v12 = vld [vmem:[%s10166_s2 + $0xf8] sm:$0xff] }
0x2944   : > { %6846 = vmatprep.subr.mxu0 %v9742_v29 }
0x2946   : > { %6844 = vmatmul.mubr.msk.f32.vlgmr.msra.gmra.mrb[48].mxu0 %vm292_vm0, %v9219_v35 }
0x2947   : > { %6847 = vmatpush3.msra.mxu0 %v9742_v29 }
0x2a19   : > { %v6845_v2 = vpop.f32.mrb[48].mxu0 }
0x2a1a   : > { %4519 = vrot.lane.b32.xlu0 %v6845_v2, %s7696_s15  ;;  %v4506_v9 = vpop.f32.mrb[49].mxu0  ;;  %v9727_v2 = vpack.c.bf16 %v4594_v12, %v4593_v41 }
0x2a1b   : > { %4517 = vrot.lane.b32.xlu1 %v4506_v9, %s7696_s15  ;;  %v4577_v9 = vld [vmem:[%s10166_s2 + $0x70] sm:$0xff] }
0x2a1c   : > { %v9735_v31 = vpack.c.bf16 %v4578_v11, %v4577_v9  ;;  %7354 = vmatprep.subr.bf16.mxu1 %v9727_v2 }
0x2a1e   : > { %7356 = vmatpush3.bf16.msra.mxu1 %v9735_v31 }
0x2a8c   : > { %v4520_v1 = vpop.permute.xlu0 %4519 }
0x2a8d   : > { %v4524_v19 = vsel %vm382_vm3, %v9587_v3, %v4520_v1  ;;  %v4518_v52 = vpop.permute.xlu1 %4517 }
0x2a8e   : > { %v4528_v48 = vmul.f32 %v4524_v19, %v7886_v44  ;;  %v4523_v49 = vsel %vm382_vm3, %v9583_v28, %v4518_v52  ;;  %v4530_v6 = vmul.f32 %v4524_v19, %v7920_v56  ;;  %v4532_v40 = vmul.f32 %v4524_v19, %v7970_v22 }
0x2a8f   : > { %v4527_v50 = vmul.f32 %v4523_v49, %v7924_v58  ;;  %v4529_v39 = vmul.f32 %v4523_v49, %v7948_v4  ;;  %v4531_v3 = vmul.f32 %v4523_v49, %v7884_v43  ;;  %v4525_v45 = vmul.f32 %v4523_v49, %v7976_v25 }
0x2a90   : > { %v4526_v36 = vmul.f32 %v4524_v19, %v7974_v24 }
0x2a91   : > { %4543 = vrot.lane.b32.xlu0 %v4529_v39, %s7697_s8  ;;  %v7553_v63 = vpack.i.bf16 %v4528_v48, %v4527_v50 }
0x2a93   : > { %7554 = vrot.lane.b32.xlu1 %v7553_v63, %s7698_s9 }
0x2a95   : > { %4545 = vrot.lane.b32.xlu0 %v4530_v6, %s7697_s8 }
0x2a97   : > { %4551 = vrot.lane.b32.xlu1 %v4531_v3, %s7699_s10 }
0x2a99   : > { %4420 = vrot.lane.b32.xlu0 %v9564_v34, %s7703_s20 }
0x2a9b   : > { %4553 = vrot.lane.b32.xlu1 %v4532_v40, %s7699_s10 }
0x2a9f   : > { %4422 = vrot.lane.b32.xlu1 %v9571_v16, %s7703_s20 }
0x2b03   : > { %v4544_v28 = vpop.permute.xlu0 %4543 }
0x2b05   : > { %v7555_v54 = vpop.permute.xlu1 %7554 }
0x2b06   : > { %v7556_v59 = vunpack.i.l.bf16 %v7555_v54  ;;  %v7557_v14 = vunpack.i.h.bf16 %v7555_v54 }
0x2b07   : > { %v4546_v15 = vpop.permute.xlu0 %4545 }
0x2b08   : > { %v4559_v5 = vsel %vm454_vm4, %v7556_v59, %v4544_v28  ;;  %v4557_v38 = vsel %vm451_vm7, %v4525_v45, %v7556_v59  ;;  %v4560_v37 = vsel %vm454_vm4, %v7557_v14, %v4546_v15  ;;  %v4558_v42 = vsel %vm451_vm7, %v4526_v36, %v7557_v14 }
0x2b09   : > { %v4552_v30 = vpop.permute.xlu1 %4551 }
0x2b0a   : > { %6848 = vmatprep.mubr.msk.f32.mxu0 %vm493_vm5, %v4552_v30  ;;  %v4561_v13 = vsel %vm457_vm6, %v4559_v5, %v4552_v30 }
0x2b0b   : > { %v4421_v61 = vpop.permute.xlu0 %4420  ;;  %4664 = vmatprep.mubr.f32.mxu1 %v4561_v13 }
0x2b0c   : > { %5941 = vst.msk [vmem:[%s8291_s23 + $0x50] sm:$0xff] %vm1006_vm8, %v4421_v61  ;;  %4665 = vmatmul.mubr.f32.vlgmr.msra.gmra.mrb[48].mxu1 %v4557_v38 }
0x2b0d   : > { %v4554_v21 = vpop.permute.xlu1 %4553 }
0x2b0e   : > { %6849 = vmatmul.mubr.msk.f32.vlgmr.msra.gmra.mrb[50].mxu0 %vm493_vm5, %v4554_v21  ;;  %v4562_v57 = vsel %vm457_vm6, %v4560_v37, %v4554_v21 }
0x2b0f   : > { %4669 = vmatprep.mubr.f32.mxu1 %v4562_v57  ;;  %6855 = vmatprep.mubr.msk.f32.mxu0 %vm292_vm0, %v9190_v7  ;;  %v4897_v57 = vld [vmem:[%s10167_s3] sm:$0xff] }
0x2b10   : > { %4670 = vmatmul.mubr.f32.gmra.mrb[50].mxu1 %v4558_v42 }
0x2b11   : > { %v4423_v41 = vpop.permute.xlu1 %4422 }
0x2b12   : > { %5942 = vst.msk [vmem:[%s8291_s23 + $0x58] sm:$0xff] %vm1006_vm8, %v4423_v41 }
0x2bdf   : > { %v6551_v12 = vpop.f32.mrb[48].mxu1 }
0x2be0   : > { %v6552_v9 = vpop.f32.mrb[49].mxu1 }
0x2be1   : > { %v6553_v11 = vadd.f32 %v6552_v9, %v6551_v12  ;;  %v6850_v1 = vpop.f32.mrb[50].mxu0  ;;  %v4916_v12 = vld [vmem:[%s10167_s3 + $0x98] sm:$0xff] }
0x2be2   : > { %v4741_v19 = vpop.f32.mrb[51].mxu0 }
0x2be3   : > { %v4667_v52 = vadd.f32 %v9491_v33, %v6553_v11  ;;  %v6554_v48 = vpop.f32.mrb[50].mxu1 }
0x2be4   : > { %v6555_v49 = vpop.f32.mrb[51].mxu1 }
0x2be5   : > { %v4742_v50 = vadd.f32 %v4741_v19, %v4667_v52  ;;  %v6556_v39 = vadd.f32 %v6555_v49, %v6554_v48  ;;  %v4900_v19 = vld [vmem:[%s10167_s3 + $0x18] sm:$0xff]  ;;  %v4917_v52 = vld [vmem:[%s10167_s3 + $0xa0] sm:$0xff]  ;;  %v4918_v48 = vld [vmem:[%s10167_s3 + $0xa8] sm:$0xff] }
0x2be7   : > { %v5949_v63 = vmul.f32 -1.442695, %v4742_v50  ;;  %v4672_v6 = vadd.f32 %v9497_v27, %v6556_v39  ;;  %v9846_v50 = vpack.c.bf16 %v4918_v48, %v4917_v52  ;;  %v4901_v39 = vld [vmem:[%s10167_s3 + $0x20] sm:$0xff]  ;;  %v4910_v48 = vld [vmem:[%s10167_s3 + $0x68] sm:$0xff] }
0x2be8   : > { %v4909_v52 = vld [vmem:[%s10167_s3 + $0x60] sm:$0xff] }
0x2be9   : > { %7646 = vpow2.f32 %v5949_v63  ;;  %v4747_v7 = vadd.f32 %v6850_v1, %v4672_v6  ;;  %v4899_v1 = vld [vmem:[%s10167_s3 + $0x10] sm:$0xff]  ;;  %v4902_v63 = vld [vmem:[%s10167_s3 + $0x28] sm:$0xff] }
0x2bea   : > { %v9843_v49 = vpack.c.bf16 %v4900_v19, %v4899_v1  ;;  %v4919_v6 = vld [vmem:[%s10167_s3 + $0xb0] sm:$0xff]  ;;  %v4926_v1 = vld [vmem:[%s10167_s3 + $0xe8] sm:$0xff] }
0x2beb   : > { %v5950_v3 = vmul.f32 -1.442695, %v4747_v7  ;;  %v4920_v7 = vld [vmem:[%s10167_s3 + $0xb8] sm:$0xff] }
0x2bed   : > { %7648 = vpow2.f32 %v5950_v3  ;;  %v9861_v3 = vpack.c.bf16 %v4902_v63, %v4901_v39  ;;  %v9927_v39 = vpack.c.bf16 %v4910_v48, %v4909_v52  ;;  %v4927_v63 = vld [vmem:[%s10167_s3 + $0xf0] sm:$0xff] }
0x2bf3   : > { %v7647_v40 = vpop.eup %7646 }
0x2bf4   : > { %v4756_v28 = vadd.f32 1.0, %v7647_v40  ;;  %v9864_v40 = vpack.c.bf16 %v4920_v7, %v4919_v6  ;;  %v4928_v6 = vld [vmem:[%s10167_s3 + $0xf8] sm:$0xff] }
0x2bf5   : > { %v9937_v7 = vpack.c.bf16 %v4928_v6, %v4927_v63 }
0x2bf6   : > { %7650 = vrcp.f32 %v4756_v28  ;;  %v4903_v28 = vld [vmem:[%s10167_s3 + $0x30] sm:$0xff] }
0x2bf7   : > { %v7649_v54 = vpop.eup %7648 }
0x2bf8   : > { %v4757_v59 = vadd.f32 1.0, %v7649_v54  ;;  %v4904_v54 = vld [vmem:[%s10167_s3 + $0x38] sm:$0xff] }
0x2bfa   : > { %7652 = vrcp.f32 %v4757_v59  ;;  %v4921_v59 = vld [vmem:[%s10167_s3 + $0xc0] sm:$0xff] }
0x2c00   : > { %v9783_v15 = vpop.eup %7650 }
0x2c01   : > { %v4762_v5 = vmul.f32 %v9783_v15, %v4421_v61 }
0x2c03   : > { %4766 = vrot.lane.b32.xlu0 %v4762_v5, %s7700_s17  ;;  %v4922_v5 = vld [vmem:[%s10167_s3 + $0xc8] sm:$0xff] }
0x2c04   : > { %v9787_v45 = vpop.eup %7652 }
0x2c05   : > { %v4763_v14 = vmul.f32 %v9787_v45, %v4423_v41  ;;  %v4915_v41 = vld [vmem:[%s10167_s3 + $0x90] sm:$0xff] }
0x2c06   : > { %v9827_v11 = vpack.c.bf16 %v4916_v12, %v4915_v41  ;;  %v4925_v12 = vld [vmem:[%s10167_s3 + $0xe0] sm:$0xff] }
0x2c07   : > { %4768 = vrot.lane.b32.xlu1 %v4763_v14, %s7700_s17  ;;  %v9879_v14 = vpack.c.bf16 %v4904_v54, %v4903_v28  ;;  %v9919_v19 = vpack.c.bf16 %v4926_v1, %v4925_v12  ;;  %v4911_v28 = vld [vmem:[%s10167_s3 + $0x70] sm:$0xff]  ;;  %v4912_v54 = vld [vmem:[%s10167_s3 + $0x78] sm:$0xff] }
0x2c75   : > { %v4767_v30 = vpop.permute.xlu0 %4766 }
0x2c76   : > { %v9793_v38 = vsel %vm289_vm1, %v9576_v20, %v4767_v30  ;;  %v4913_v20 = vld [vmem:[%s10167_s3 + $0x80] sm:$0xff]  ;;  %v9882_v30 = vpack.c.bf16 %v4922_v5, %v4921_v59  ;;  %v9945_v59 = vpack.c.bf16 %v4912_v54, %v4911_v28 }
0x2c79   : > { %v4769_v13 = vpop.permute.xlu1 %4768 }
0x2c7a   : > { %v9797_v36 = vsel %vm289_vm1, %v9579_v55, %v4769_v13  ;;  %v4914_v55 = vld [vmem:[%s10167_s3 + $0x88] sm:$0xff]  ;;  %v4905_v13 = vld [vmem:[%s10167_s3 + $0x40] sm:$0xff] }
0x2c7b   : > { %v7357_v61 = vpack.c.bf16 %v9797_v36, %v9793_v38  ;;  %v9814_v42 = vpack.c.bf16 %v4914_v55, %v4913_v20 }
0x2c7d   : > { %7358 = vmatprep.subr.bf16.mxu0 %v7357_v61 }
0x2c7e   : > { %7360 = vmatpush3.bf16.msra.mxu0 %v7357_v61  ;;  %v4906_v61 = vld [vmem:[%s10167_s3 + $0x48] sm:$0xff] }
0x2c7f   : > { %7362 = vmatprep.subr.bf16.mxu0 %v9814_v42  ;;  %v9897_v20 = vpack.c.bf16 %v4906_v61, %v4905_v13  ;;  %v9953_v13 = vld [vmem:[%s10167_s3 + $0x100] sm:$0xff] }
0x2c80   : > { %6858 = vmatprep.subr.mxu1 %v9953_v13 }
0x2c81   : > { %6856 = vmatmul.mubr.msk.f32.vlgmr.msra.gmra.mrb[52].mxu0 %vm292_vm0, %v9219_v35  ;;  %v4898_v35 = vld [vmem:[%s10167_s3 + $0x8] sm:$0xff]  ;;  %6859 = vmatpush3.msra.mxu1 %v9953_v13 }
0x2c82   : > { %v9825_v9 = vpack.c.bf16 %v4898_v35, %v4897_v57  ;;  %v4907_v57 = vld [vmem:[%s10167_s3 + $0x50] sm:$0xff]  ;;  %v4908_v35 = vld [vmem:[%s10167_s3 + $0x58] sm:$0xff] }
0x2c83   : > { %v9909_v41 = vpack.c.bf16 %v4908_v35, %v4907_v57 }
0x2c84   : > { %7364 = vmatpush3.bf16.msra.mxu0 %v9825_v9 }
0x2c85   : > { %7366 = vmatprep.subr.bf16.mxu0 %v9827_v11 }
0x2c88   : > { %7368 = vmatpush3.bf16.msra.mxu0 %v9843_v49 }
0x2c89   : > { %7370 = vmatprep.subr.bf16.mxu0 %v9846_v50 }
0x2c8c   : > { %7372 = vmatpush3.bf16.msra.mxu0 %v9861_v3 }
0x2c8d   : > { %7374 = vmatprep.subr.bf16.mxu0 %v9864_v40 }
0x2c90   : > { %7376 = vmatpush3.bf16.msra.mxu0 %v9879_v14 }
0x2c91   : > { %7378 = vmatprep.subr.bf16.mxu0 %v9882_v30 }
0x2c94   : > { %7380 = vmatpush3.bf16.msra.mxu0 %v9897_v20 }
0x2d54   : > { %v6857_v37 = vpop.f32.mrb[52].mxu0 }
0x2d55   : > { %4853 = vrot.lane.b32.xlu1 %v6857_v37, %s7696_s15  ;;  %v4840_v21 = vpop.f32.mrb[53].mxu0  ;;  %v4923_v37 = vld [vmem:[%s10167_s3 + $0xd0] sm:$0xff] }
0x2d56   : > { %4851 = vrot.lane.b32.xlu0 %v4840_v21, %s7696_s15  ;;  %v4924_v21 = vld [vmem:[%s10167_s3 + $0xd8] sm:$0xff] }
0x2d57   : > { %v9900_v55 = vpack.c.bf16 %v4924_v21, %v4923_v37 }
0x2d59   : > { %7382 = vmatprep.subr.bf16.mxu0 %v9900_v55 }
0x2d5a   : > { %7384 = vmatpush3.bf16.msra.mxu0 %v9909_v41 }
0x2d5b   : > { %7386 = vmatprep.subr.bf16.mxu0 %v9919_v19 }
0x2d5e   : > { %7388 = vmatpush3.bf16.msra.mxu0 %v9927_v39 }
0x2d5f   : > { %7390 = vmatprep.subr.bf16.mxu0 %v9937_v7 }
0x2d62   : > { %7392 = vmatpush3.bf16.msra.mxu0 %v9945_v59 }
0x2d63   : > { %7398 = vmatprep.subr.bf16.mxu0 %v9604_v60 }
0x2dc7   : > { %v4854_v5 = vpop.permute.xlu1 %4853 }
0x2dc8   : > { %v4858_v61 = vsel %vm382_vm3, %v9797_v36, %v4854_v5  ;;  %v4852_v37 = vpop.permute.xlu0 %4851 }
0x2dc9   : > { %v4862_v21 = vmul.f32 %v4858_v61, %v7886_v44  ;;  %v4857_v57 = vsel %vm382_vm3, %v9793_v38, %v4852_v37  ;;  %v4864_v1 = vmul.f32 %v4858_v61, %v7920_v56  ;;  %v4866_v52 = vmul.f32 %v4858_v61, %v7970_v22 }
0x2dca   : > { %v4861_v60 = vmul.f32 %v4857_v57, %v7924_v58  ;;  %v4863_v35 = vmul.f32 %v4857_v57, %v7948_v4  ;;  %v4865_v36 = vmul.f32 %v4857_v57, %v7884_v43  ;;  %v4859_v28 = vmul.f32 %v4857_v57, %v7976_v25 }
0x2dcc   : > { %4877 = vrot.lane.b32.xlu1 %v4863_v35, %s7697_s8  ;;  %v7558_v12 = vpack.i.bf16 %v4862_v21, %v4861_v60  ;;  %v4860_v35 = vmul.f32 %v4858_v61, %v7974_v24 }
0x2dce   : > { %7559 = vrot.lane.b32.xlu0 %v7558_v12, %s7698_s9 }
0x2dd0   : > { %4879 = vrot.lane.b32.xlu1 %v4864_v1, %s7697_s8 }
0x2dd2   : > { %4885 = vrot.lane.b32.xlu0 %v4865_v36, %s7699_s10 }
0x2dd6   : > { %4887 = vrot.lane.b32.xlu0 %v4866_v52, %s7699_s10  ;;  %v9987_v52 = vld [vmem:[%s10165_s1 + $0x10] sm:$0xff] }
0x2e3e   : > { %v4878_v38 = vpop.permute.xlu1 %4877 }
0x2e40   : > { %v7560_v48 = vpop.permute.xlu0 %7559 }
0x2e41   : > { %v7561_v63 = vunpack.i.l.bf16 %v7560_v48  ;;  %v7562_v54 = vunpack.i.h.bf16 %v7560_v48 }
0x2e42   : > { %v4880_v37 = vpop.permute.xlu1 %4879 }
0x2e43   : > { %v4893_v6 = vsel %vm454_vm4, %v7561_v63, %v4878_v38  ;;  %v4891_v60 = vsel %vm451_vm7, %v4859_v28, %v7561_v63  ;;  %v4894_v12 = vsel %vm454_vm4, %v7562_v54, %v4880_v37  ;;  %v4892_v36 = vsel %vm451_vm7, %v4860_v35, %v7562_v54  ;;  %v10034_v35 = vld [vmem:[%s7773_s12 + $0x70] sm:$0xff] }
0x2e44   : > { %v4886_v5 = vpop.permute.xlu0 %4885  ;;  %v5088_v38 = vsub.f32 1.0, %v9783_v15  ;;  %v5086_v63 = vmul.f32 %v9783_v15, %v9564_v34  ;;  %v5089_v54 = vsub.f32 1.0, %v9787_v45  ;;  %v5087_v37 = vmul.f32 %v9787_v45, %v9571_v16  ;;  %v10037_v15 = vld [vmem:[%s7773_s12 + $0x78] sm:$0xff] }
0x2e45   : > { %6860 = vmatprep.mubr.msk.f32.mxu1 %vm493_vm5, %v4886_v5  ;;  %v4895_v21 = vsel %vm457_vm6, %v4893_v6, %v4886_v5 }
0x2e46   : > { %4998 = vmatprep.mubr.f32.mxu0 %v4895_v21 }
0x2e47   : > { %4999 = vmatmul.mubr.f32.vlgmr.msra.gmra.mrb[54].mxu0 %v4891_v60 }
0x2e48   : > { %v4888_v1 = vpop.permute.xlu0 %4887  ;;  %7400 = vmatpush3.bf16.msra.mxu0 %v9615_v26 }
0x2e49   : > { %6861 = vmatmul.mubr.msk.f32.vlgmr.msra.gmra.mrb[52].mxu1 %vm493_vm5, %v4888_v1  ;;  %v4896_v57 = vsel %vm457_vm6, %v4894_v12, %v4888_v1  ;;  %7402 = vmatprep.subr.bf16.mxu0 %v9617_v10 }
0x2e4a   : > { %5003 = vmatprep.mubr.f32.mxu0 %v4896_v57  ;;  %6867 = vmatprep.mubr.msk.f32.mxu1 %vm292_vm0, %v9987_v52  ;;  %v10047_v57 = vld [vmem:[%s10165_s1 + $0x18] sm:$0xff] }
0x2e4b   : > { %5004 = vmatmul.mubr.f32.gmra.mrb[56].mxu0 %v4892_v36 }
0x2e4c   : > { %7404 = vmatpush3.bf16.msra.mxu0 %v9633_v46 }
0x2e4d   : > { %7406 = vmatprep.subr.bf16.mxu0 %v9636_v51 }
0x2e50   : > { %7408 = vmatpush3.bf16.msra.mxu0 %v9651_v53 }
0x2e51   : > { %7410 = vmatprep.subr.bf16.mxu0 %v9654_v32  ;;  %v10008_v32 = vld [vmem:[%s10169_s5] sm:$0xff] }
0x2e54   : > { %7412 = vmatpush3.bf16.msra.mxu0 %v9669_v17 }
0x2e55   : > { %7414 = vmatprep.subr.bf16.mxu0 %v9672_v18 }
0x2e58   : > { %7416 = vmatpush3.bf16.msra.mxu0 %v9687_v62 }
0x2e59   : > { %7418 = vmatprep.subr.bf16.mxu0 %v9690_v8 }
0x2e5c   : > { %7420 = vmatpush3.bf16.msra.mxu0 %v9699_v0 }
0x2e5d   : > { %7422 = vmatprep.subr.bf16.mxu0 %v9709_v23  ;;  %v10014_v23 = vld [vmem:[%s10169_s5 + $0x8] sm:$0xff] }
0x2e60   : > { %7424 = vmatpush3.bf16.msra.mxu0 %v9717_v47 }
0x2e61   : > { %7426 = vmatprep.subr.bf16.mxu0 %v9727_v2 }
0x2e64   : > { %7428 = vmatpush3.bf16.msra.mxu0 %v9735_v31 }
0x2e65   : > { %6882 = vmatprep.subr.mxu0 %v9953_v13 }
0x2f1a   : > { %v6596_v26 = vpop.f32.mrb[54].mxu0 }
0x2f1b   : > { %v6597_v10 = vpop.f32.mrb[55].mxu0 }
0x2f1c   : > { %v6598_v46 = vadd.f32 %v6597_v10, %v6596_v26  ;;  %v6862_v51 = vpop.f32.mrb[52].mxu1 }
0x2f1d   : > { %v5075_v53 = vpop.f32.mrb[53].mxu1 }
0x2f1e   : > { %v5001_v17 = vadd.f32 %v10008_v32, %v6598_v46  ;;  %v6599_v18 = vpop.f32.mrb[56].mxu0 }
0x2f1f   : > { %v6600_v62 = vpop.f32.mrb[57].mxu0 }
0x2f20   : > { %v5076_v8 = vadd.f32 %v5075_v53, %v5001_v17  ;;  %v6601_v0 = vadd.f32 %v6600_v62, %v6599_v18 }
0x2f22   : > { %7654 = vtanh.f32 %v5076_v8  ;;  %v5006_v47 = vadd.f32 %v10014_v23, %v6601_v0 }
0x2f24   : > { %v5081_v2 = vadd.f32 %v6862_v51, %v5006_v47 }
0x2f26   : > { %7656 = vtanh.f32 %v5081_v2 }
0x2f2c   : > { %v7655_v31 = vpop.eup %7654 }
0x2f2d   : > { %5092 = vrot.lane.b32.xlu1 %v7655_v31, %s7701_s18 }
0x2f30   : > { %v7657_v61 = vpop.eup %7656 }
0x2f31   : > { %5094 = vrot.lane.b32.xlu0 %v7657_v61, %s7701_s18 }
0x2f9f   : > { %v5093_v48 = vpop.permute.xlu1 %5092 }
0x2fa0   : > { %v5098_v6 = vmul.f32 %v5093_v48, %v5088_v38 }
0x2fa2   : > { %v10022_v28 = vadd.f32 %v5098_v6, %v5086_v63 }
0x2fa3   : > { %v5095_v5 = vpop.permute.xlu0 %5094 }
0x2fa4   : > { %v5099_v21 = vmul.f32 %v5095_v5, %v5089_v54  ;;  %5116 = vrot.lane.b32.xlu1 %v10022_v28, %s7702_s19 }
0x2fa6   : > { %v10029_v60 = vadd.f32 %v5099_v21, %v5087_v37 }
0x2fa8   : > { %5118 = vrot.lane.b32.xlu0 %v10029_v60, %s7702_s19 }
0x3016   : > { %v5117_v34 = vpop.permute.xlu1 %5116 }
0x3017   : > { %v5122_v1 = vsel %vm289_vm1, %v10034_v35, %v5117_v34 }
0x301a   : > { %v5119_v12 = vpop.permute.xlu0 %5118 }
0x301b   : > { %v5123_v16 = vsel %vm289_vm1, %v10037_v15, %v5119_v12 }
0x301c   : > { %v7393_v45 = vpack.c.bf16 %v5123_v16, %v5122_v1 }
0x301e   : > { %7394 = vmatprep.subr.bf16.mxu1 %v7393_v45 }
0x301f   : > { %7396 = vmatpush3.bf16.msra.mxu1 %v7393_v45 }
0x3020   : > { %6870 = vmatprep.subr.mxu1 %v9742_v29 }
0x3022   : > { %6868 = vmatmul.mubr.msk.f32.vlgmr.msra.gmra.mrb[54].mxu1 %vm292_vm0, %v10047_v57 }
0x3023   : > { %6871 = vmatpush3.msra.mxu1 %v9742_v29 }
0x30f5   : > { %v6869_v36 = vpop.f32.mrb[54].mxu1 }
0x30f6   : > { %5203 = vrot.lane.b32.xlu0 %v6869_v36, %s7696_s15  ;;  %v5190_v26 = vpop.f32.mrb[55].mxu1 }
0x30f7   : > { %5201 = vrot.lane.b32.xlu1 %v5190_v26, %s7696_s15 }
0x3168   : > { %v5204_v10 = vpop.permute.xlu0 %5203 }
0x3169   : > { %v5208_v46 = vsel %vm382_vm3, %v5123_v16, %v5204_v10  ;;  %v5202_v51 = vpop.permute.xlu1 %5201 }
0x316a   : > { %v5212_v53 = vmul.f32 %v5208_v46, %v7886_v44  ;;  %v5207_v17 = vsel %vm382_vm3, %v5122_v1, %v5202_v51  ;;  %v5214_v8 = vmul.f32 %v5208_v46, %v7920_v56  ;;  %v5216_v47 = vmul.f32 %v5208_v46, %v7970_v22 }
0x316b   : > { %v5211_v18 = vmul.f32 %v5207_v17, %v7924_v58  ;;  %v5213_v62 = vmul.f32 %v5207_v17, %v7948_v4  ;;  %v5215_v0 = vmul.f32 %v5207_v17, %v7884_v43  ;;  %v5209_v63 = vmul.f32 %v5207_v17, %v7976_v25 }
0x316c   : > { %v5210_v34 = vmul.f32 %v5208_v46, %v7974_v24 }
0x316d   : > { %5227 = vrot.lane.b32.xlu0 %v5213_v62, %s7697_s8  ;;  %v7563_v29 = vpack.i.bf16 %v5212_v53, %v5211_v18 }
0x316f   : > { %7564 = vrot.lane.b32.xlu1 %v7563_v29, %s7698_s9 }
0x3171   : > { %5229 = vrot.lane.b32.xlu0 %v5214_v8, %s7697_s8 }
0x3173   : > { %5235 = vrot.lane.b32.xlu1 %v5215_v0, %s7699_s10 }
0x3175   : > { %5104 = vrot.lane.b32.xlu0 %v10022_v28, %s7703_s20 }
0x3177   : > { %5237 = vrot.lane.b32.xlu1 %v5216_v47, %s7699_s10 }
0x317b   : > { %5106 = vrot.lane.b32.xlu1 %v10029_v60, %s7703_s20 }
0x31df   : > { %v5228_v2 = vpop.permute.xlu0 %5227 }
0x31e1   : > { %v7565_v31 = vpop.permute.xlu1 %7564 }
0x31e2   : > { %v7566_v61 = vunpack.i.l.bf16 %v7565_v31  ;;  %v7567_v6 = vunpack.i.h.bf16 %v7565_v31 }
0x31e3   : > { %v5230_v38 = vpop.permute.xlu0 %5229 }
0x31e4   : > { %v5243_v48 = vsel %vm454_vm4, %v7566_v61, %v5228_v2  ;;  %v5241_v21 = vsel %vm451_vm7, %v5209_v63, %v7566_v61  ;;  %v5244_v12 = vsel %vm454_vm4, %v7567_v6, %v5230_v38  ;;  %v5242_v45 = vsel %vm451_vm7, %v5210_v34, %v7567_v6 }
0x31e5   : > { %v5236_v54 = vpop.permute.xlu1 %5235 }
0x31e6   : > { %6872 = vmatprep.mubr.msk.f32.mxu1 %vm493_vm5, %v5236_v54  ;;  %v5245_v5 = vsel %vm457_vm6, %v5243_v48, %v5236_v54 }
0x31e7   : > { %v5105_v37 = vpop.permute.xlu0 %5104  ;;  %5348 = vmatprep.mubr.f32.mxu0 %v5245_v5 }
0x31e8   : > { %5955 = vst.msk [vmem:[%s8291_s23 + $0x60] sm:$0xff] %vm1006_vm8, %v5105_v37  ;;  %5349 = vmatmul.mubr.f32.vlgmr.msra.gmra.mrb[58].mxu0 %v5241_v21 }
0x31e9   : > { %v5238_v1 = vpop.permute.xlu1 %5237  ;;  %6883 = vmatpush3.msra.mxu0 %v9953_v13 }
0x31ea   : > { %6873 = vmatmul.mubr.msk.f32.vlgmr.msra.gmra.mrb[56].mxu1 %vm493_vm5, %v5238_v1  ;;  %v5246_v16 = vsel %vm457_vm6, %v5244_v12, %v5238_v1 }
0x31eb   : > { %5353 = vmatprep.mubr.f32.mxu0 %v5246_v16  ;;  %6879 = vmatprep.mubr.msk.f32.mxu1 %vm292_vm0, %v9987_v52 }
0x31ec   : > { %5354 = vmatmul.mubr.f32.gmra.mrb[60].mxu0 %v5242_v45 }
0x31ed   : > { %v5107_v36 = vpop.permute.xlu1 %5106 }
0x31ee   : > { %5956 = vst.msk [vmem:[%s8291_s23 + $0x68] sm:$0xff] %vm1006_vm8, %v5107_v36 }
0x32bb   : > { %v6641_v26 = vpop.f32.mrb[58].mxu0 }
0x32bc   : > { %v6642_v10 = vpop.f32.mrb[59].mxu0 }
0x32bd   : > { %v6643_v46 = vadd.f32 %v6642_v10, %v6641_v26  ;;  %v6874_v51 = vpop.f32.mrb[56].mxu1 }
0x32be   : > { %v5425_v53 = vpop.f32.mrb[57].mxu1 }
0x32bf   : > { %v5351_v13 = vadd.f32 %v9491_v33, %v6643_v46  ;;  %v6644_v17 = vpop.f32.mrb[60].mxu0 }
0x32c0   : > { %v6645_v18 = vpop.f32.mrb[61].mxu0 }
0x32c1   : > { %v5426_v62 = vadd.f32 %v5425_v53, %v5351_v13  ;;  %v6646_v29 = vadd.f32 %v6645_v18, %v6644_v17 }
0x32c3   : > { %v5963_v8 = vmul.f32 -1.442695, %v5426_v62  ;;  %v5356_v0 = vadd.f32 %v9497_v27, %v6646_v29 }
0x32c5   : > { %7658 = vpow2.f32 %v5963_v8  ;;  %v5431_v52 = vadd.f32 %v6874_v51, %v5356_v0 }
0x32c7   : > { %v5964_v47 = vmul.f32 -1.442695, %v5431_v52 }
0x32c9   : > { %7660 = vpow2.f32 %v5964_v47 }
0x32cf   : > { %v7659_v2 = vpop.eup %7658 }
0x32d0   : > { %v5440_v31 = vadd.f32 1.0, %v7659_v2 }
0x32d2   : > { %7662 = vrcp.f32 %v5440_v31 }
0x32d3   : > { %v7661_v61 = vpop.eup %7660 }
0x32d4   : > { %v5441_v38 = vadd.f32 1.0, %v7661_v61 }
0x32d6   : > { %7664 = vrcp.f32 %v5441_v38 }
0x32dc   : > { %v10090_v48 = vpop.eup %7662 }
0x32dd   : > { %v5446_v33 = vmul.f32 %v10090_v48, %v5105_v37  ;;  %v5772_v29 = vsub.f32 1.0, %v10090_v48  ;;  %v5770_v8 = vmul.f32 %v10090_v48, %v10022_v28 }
0x32df   : > { %5450 = vrot.lane.b32.xlu0 %v5446_v33, %s7700_s17 }
0x32e0   : > { %v10094_v63 = vpop.eup %7664 }
0x32e1   : > { %v5447_v27 = vmul.f32 %v10094_v63, %v5107_v36  ;;  %v5771_v2 = vmul.f32 %v10094_v63, %v10029_v60 }
0x32e3   : > { %5452 = vrot.lane.b32.xlu1 %v5447_v27, %s7700_s17 }
0x3351   : > { %v5451_v6 = vpop.permute.xlu0 %5450 }
0x3352   : > { %v5456_v5 = vsel %vm289_vm1, %v10034_v35, %v5451_v6 }
0x3355   : > { %v5453_v54 = vpop.permute.xlu1 %5452 }
0x3356   : > { %v5457_v21 = vsel %vm289_vm1, %v10037_v15, %v5453_v54 }
0x3357   : > { %v7429_v34 = vpack.c.bf16 %v5457_v21, %v5456_v5 }
0x3359   : > { %7430 = vmatprep.subr.bf16.mxu1 %v7429_v34 }
0x335a   : > { %7432 = vmatpush3.bf16.msra.mxu1 %v7429_v34 }
0x335b   : > { %7434 = vmatprep.subr.bf16.mxu1 %v9814_v42 }
0x335d   : > { %6880 = vmatmul.mubr.msk.f32.vlgmr.msra.gmra.mrb[58].mxu1 %vm292_vm0, %v10047_v57 }
0x335e   : > { %7436 = vmatpush3.bf16.msra.mxu1 %v9825_v9 }
0x335f   : > { %7438 = vmatprep.subr.bf16.mxu1 %v9827_v11 }
0x3362   : > { %7440 = vmatpush3.bf16.msra.mxu1 %v9843_v49 }
0x3363   : > { %7442 = vmatprep.subr.bf16.mxu1 %v9846_v50 }
0x3366   : > { %7444 = vmatpush3.bf16.msra.mxu1 %v9861_v3 }
0x3367   : > { %7446 = vmatprep.subr.bf16.mxu1 %v9864_v40 }
0x336a   : > { %7448 = vmatpush3.bf16.msra.mxu1 %v9879_v14 }
0x336b   : > { %7450 = vmatprep.subr.bf16.mxu1 %v9882_v30 }
0x336e   : > { %7452 = vmatpush3.bf16.msra.mxu1 %v9897_v20 }
0x336f   : > { %7454 = vmatprep.subr.bf16.mxu1 %v9900_v55 }
0x3372   : > { %7456 = vmatpush3.bf16.msra.mxu1 %v9909_v41 }
0x3373   : > { %7458 = vmatprep.subr.bf16.mxu1 %v9919_v19 }
0x3376   : > { %7460 = vmatpush3.bf16.msra.mxu1 %v9927_v39 }
0x3377   : > { %7462 = vmatprep.subr.bf16.mxu1 %v9937_v7 }
0x337a   : > { %7464 = vmatpush3.bf16.msra.mxu1 %v9945_v59 }
0x3430   : > { %v6881_v42 = vpop.f32.mrb[58].mxu1 }
0x3431   : > { %5537 = vrot.lane.b32.xlu1 %v6881_v42, %s7696_s15  ;;  %v5524_v9 = vpop.f32.mrb[59].mxu1 }
0x3432   : > { %5535 = vrot.lane.b32.xlu0 %v5524_v9, %s7696_s15 }
0x34a3   : > { %v5538_v11 = vpop.permute.xlu1 %5537 }
0x34a4   : > { %v5542_v49 = vsel %vm382_vm3, %v5457_v21, %v5538_v11  ;;  %v5536_v50 = vpop.permute.xlu0 %5535 }
0x34a5   : > { %v5546_v3 = vmul.f32 %v5542_v49, %v7886_v44  ;;  %v5541_v40 = vsel %vm382_vm3, %v5456_v5, %v5536_v50  ;;  %v5548_v55 = vmul.f32 %v5542_v49, %v7920_v56  ;;  %v5550_v44 = vmul.f32 %v5542_v49, %v7970_v22 }
0x34a6   : > { %v5545_v14 = vmul.f32 %v5541_v40, %v7924_v58  ;;  %v5547_v30 = vmul.f32 %v5541_v40, %v7948_v4  ;;  %v5549_v41 = vmul.f32 %v5541_v40, %v7884_v43  ;;  %v5543_v7 = vmul.f32 %v5541_v40, %v7976_v25 }
0x34a7   : > { %v5544_v22 = vmul.f32 %v5542_v49, %v7974_v24 }
0x34a8   : > { %5561 = vrot.lane.b32.xlu1 %v5547_v30, %s7697_s8  ;;  %v7568_v20 = vpack.i.bf16 %v5546_v3, %v5545_v14 }
0x34aa   : > { %7569 = vrot.lane.b32.xlu0 %v7568_v20, %s7698_s9 }
0x34ac   : > { %5563 = vrot.lane.b32.xlu1 %v5548_v55, %s7697_s8 }
0x34ae   : > { %5569 = vrot.lane.b32.xlu0 %v5549_v41, %s7699_s10 }
0x34b2   : > { %5571 = vrot.lane.b32.xlu0 %v5550_v44, %s7699_s10 }
0x351a   : > { %v5562_v58 = vpop.permute.xlu1 %5561 }
0x351c   : > { %v7570_v19 = vpop.permute.xlu0 %7569 }
0x351d   : > { %v7571_v4 = vunpack.i.l.bf16 %v7570_v19  ;;  %v7572_v56 = vunpack.i.h.bf16 %v7570_v19 }
0x351e   : > { %v5564_v35 = vpop.permute.xlu1 %5563 }
0x351f   : > { %v5577_v39 = vsel %vm454_vm4, %v7571_v4, %v5562_v58  ;;  %v5575_v15 = vsel %vm451_vm7, %v5543_v7, %v7571_v4  ;;  %v5578_v57 = vsel %vm454_vm4, %v7572_v56, %v5564_v35  ;;  %v5576_v12 = vsel %vm451_vm7, %v5544_v22, %v7572_v56 }
0x3520   : > { %v5570_v59 = vpop.permute.xlu0 %5569 }
0x3521   : > { %6884 = vmatprep.mubr.msk.f32.mxu0 %vm493_vm5, %v5570_v59  ;;  %v5579_v43 = vsel %vm457_vm6, %v5577_v39, %v5570_v59 }
0x3522   : > { %5682 = vmatprep.mubr.f32.mxu1 %v5579_v43 }
0x3523   : > { %5683 = vmatmul.mubr.f32.vlgmr.msra.gmra.mrb[60].mxu1 %v5575_v15 }
0x3524   : > { %v5572_v37 = vpop.permute.xlu0 %5571 }
0x3525   : > { %6885 = vmatmul.mubr.msk.f32.vlgmr.msra.gmra.mrb[62].mxu0 %vm493_vm5, %v5572_v37  ;;  %v5580_v25 = vsel %vm457_vm6, %v5578_v57, %v5572_v37 }
0x3526   : > { %5687 = vmatprep.mubr.f32.mxu1 %v5580_v25 }
0x3527   : > { %5688 = vmatmul.mubr.f32.gmra.mrb[62].mxu1 %v5576_v12 }
0x35f6   : > { %v6686_v1 = vpop.f32.mrb[60].mxu1 }
0x35f7   : > { %v6687_v16 = vpop.f32.mrb[61].mxu1 }
0x35f8   : > { %v6688_v45 = vadd.f32 %v6687_v16, %v6686_v1  ;;  %v6886_v36 = vpop.f32.mrb[62].mxu0 }
0x35f9   : > { %v5759_v26 = vpop.f32.mrb[63].mxu0 }
0x35fa   : > { %v5685_v10 = vadd.f32 %v10008_v32, %v6688_v45  ;;  %v6689_v46 = vpop.f32.mrb[62].mxu1 }
0x35fb   : > { %v6690_v24 = vpop.f32.mrb[63].mxu1 }
0x35fc   : > { %v5760_v51 = vadd.f32 %v5759_v26, %v5685_v10  ;;  %v6691_v53 = vadd.f32 %v6690_v24, %v6689_v46 }
0x35fe   : > { %7666 = vtanh.f32 %v5760_v51  ;;  %v5690_v13 = vadd.f32 %v10014_v23, %v6691_v53  ;;  %v5773_v23 = vsub.f32 1.0, %v10094_v63 }
0x3600   : > { %v5765_v17 = vadd.f32 %v6886_v36, %v5690_v13 }
0x3602   : > { %7668 = vtanh.f32 %v5765_v17 }
0x3608   : > { %v7667_v18 = vpop.eup %7666 }
0x3609   : > { %5776 = vrot.lane.b32.xlu1 %v7667_v18, %s7701_s18 }
0x360c   : > { %v7669_v62 = vpop.eup %7668 }
0x360d   : > { %5778 = vrot.lane.b32.xlu0 %v7669_v62, %s7701_s18 }
0x367b   : > { %v5777_v32 = vpop.permute.xlu1 %5776 }
0x367c   : > { %v5782_v0 = vmul.f32 %v5777_v32, %v5772_v29 }
0x367e   : > { %v5784_v52 = vadd.f32 %v5782_v0, %v5770_v8 }
0x367f   : > { %v5779_v47 = vpop.permute.xlu0 %5778 }
0x3680   : > { %v5783_v31 = vmul.f32 %v5779_v47, %v5773_v23  ;;  %5788 = vrot.lane.b32.xlu1 %v5784_v52, %s7703_s20 }
0x3682   : > { %v5785_v61 = vadd.f32 %v5783_v31, %v5771_v2 }
0x3684   : > { %5790 = vrot.lane.b32.xlu0 %v5785_v61, %s7703_s20 }
0x36f2   : > { %v5789_v38 = vpop.permute.xlu1 %5788 }
0x36f3   : > { %5969 = vst.msk [vmem:[%s8291_s23 + $0x70] sm:$0xff] %vm1006_vm8, %v5789_v38 }
0x36f6   : > { %v5791_v33 = vpop.permute.xlu0 %5790 }
0x36f7   : > { %5970 = vst.msk [vmem:[%s8291_s23 + $0x78] sm:$0xff] %vm1006_vm8, %v5791_v33 }
0x36f8 PF: > { %s17_s24 = sadd.s32 1, %s7690_s24  }
0x36f9   : > { %p14_p4 = scmp.ge.s32.totalorder %s17_s24, 4  }
0x36fb   :  { %16 = sbr.rel (!%p14_p4) target bundleno = 1 (0x1), region = 92 }

</bundles_post_ra>
